<compile_context>
chip_gen: v6e
topology: v6e:2x2x1
jax: 0.10.0
libtpu: 0.0.40
codegen_flags: <defaults>
</compile_context>

<pallas_src>
import functools

import jax
import jax.numpy as jnp
from jax import lax
from jax.experimental import pallas as pl
from jax.experimental.pallas import tpu as pltpu

KSIZE = 3  # 3x3 conv, stride=1, padding=1


def _im2col_chw(x_flat, C, H, W):
    """(C, H*W) -> (9*C, H*W) patch matrix (tap-major, channel-minor rows)."""
    x = x_flat.reshape(C, H, W)
    zrow = jnp.zeros((C, 1, W), x.dtype)
    x = jnp.concatenate([zrow, x, zrow], axis=1)        # (C, H+2, W)
    zcol = jnp.zeros((C, H + 2, 1), x.dtype)
    xpad = jnp.concatenate([zcol, x, zcol], axis=2)     # (C, H+2, W+2)
    rows = []
    for dy in range(KSIZE):
        for dx in range(KSIZE):
            rows.append(xpad[:, dy:dy + H, dx:dx + W].reshape(C, H * W))
    return jnp.concatenate(rows, axis=0)                # (9*C, H*W)


def fused_block_kernel(x_ref, w1_ref, b1_ref, w2_ref, b2_ref, o_ref, *, H, W):
    """Fused conv1+bn1+relu -> conv2+bn2+residual+relu for one batch element.

    x_ref : (1, Cin, H*W)   f32 input block (NCHW, spatial flattened on lanes)
    w1_ref: (Cout, 9*Cin)   bf16 weights, BN1 scale folded in
    b1_ref: (Cout, 1)       f32 BN1 shift
    w2_ref: (Cout, 9*Cout)  bf16 weights, BN2 scale folded in
    b2_ref: (Cout, 1)       f32 BN2 shift
    o_ref : (1, Cout, H*W)  f32 output block
    """
    Cin = x_ref.shape[1]
    Cout = o_ref.shape[1]

    x = x_ref[0]                                        # (Cin, H*W) f32, lane-dense

    # ---- stage 1: conv1 (single im2col GEMM, K = 9*Cin) + bn1 + relu ----
    p1 = _im2col_chw(x.astype(jnp.bfloat16), Cin, H, W)      # (9*Cin, H*W) bf16
    acc1 = jnp.dot(w1_ref[...], p1, preferred_element_type=jnp.float32)
    h1 = jnp.maximum(acc1 + b1_ref[...], 0.0)                # (Cout, H*W) f32

    # ---- stage 2: conv2 + bn2 + residual + relu (intermediate stays in VMEM) ----
    p2 = _im2col_chw(h1.astype(jnp.bfloat16), Cout, H, W)    # (9*Cout, H*W) bf16
    acc2 = jnp.dot(w2_ref[...], p2, preferred_element_type=jnp.float32)
    out = jnp.maximum(acc2 + b2_ref[...] + x, 0.0)           # residual add in f32
    o_ref[...] = out.reshape(1, Cout, H * W).astype(o_ref.dtype)


def _fold_bn_into_conv(w_oihw, gamma, beta, mean, var, eps=1e-5):
    """Fold BN scale into conv weights; return ((Cout, 9*Cin) bf16, (Cout, 1) f32)."""
    scale = gamma / jnp.sqrt(var + eps)                 # (Cout,)
    shift = beta - mean * scale                         # (Cout,)
    w = jnp.transpose(w_oihw, (0, 2, 3, 1))             # OIHW -> (O, kh, kw, I)
    w = w * scale[:, None, None, None]
    co, kh, kw, ci = w.shape
    w2d = w.reshape(co, kh * kw * ci).astype(jnp.bfloat16)   # tap-major, chan-minor
    return w2d, shift.reshape(co, 1).astype(jnp.float32)


def block_forward(x_nchw, params):
    """ResNet Block forward (binW=False, binA=False, stride=1, downsample=None)."""
    N, Cin, H, W = x_nchw.shape

    w1, b1 = _fold_bn_into_conv(params["conv1_w"], params["bn1_gamma"],
                                params["bn1_beta"], params["bn1_mean"],
                                params["bn1_var"])
    w2, b2 = _fold_bn_into_conv(params["conv2_w"], params["bn2_gamma"],
                                params["bn2_beta"], params["bn2_mean"],
                                params["bn2_var"])
    Cout = b1.shape[0]
    assert Cin == Cout, "stride=1 / downsample=None block requires Cin == Cout"

    x_flat = x_nchw.reshape(N, Cin, H * W)              # free bitcast reshape
    kernel = functools.partial(fused_block_kernel, H=H, W=W)

    out = pl.pallas_call(
        kernel,
        out_shape=jax.ShapeDtypeStruct((N, Cout, H * W), x_nchw.dtype),
        grid_spec=pltpu.PrefetchScalarGridSpec(
            num_scalar_prefetch=0,
            grid=(N,),
            in_specs=[
                pl.BlockSpec((1, Cin, H * W), lambda n: (n, 0, 0)),
                pl.BlockSpec(w1.shape, lambda n: (0, 0)),
                pl.BlockSpec(b1.shape, lambda n: (0, 0)),
                pl.BlockSpec(w2.shape, lambda n: (0, 0)),
                pl.BlockSpec(b2.shape, lambda n: (0, 0)),
            ],
            out_specs=pl.BlockSpec((1, Cout, H * W), lambda n: (n, 0, 0)),
        ),
        compiler_params=pltpu.CompilerParams(
            dimension_semantics=("parallel",)),
    )(x_flat, w1, b1, w2, b2)
    return out.reshape(N, Cout, H, W)                   # free bitcast reshape


def block_reference(x_nchw, params):
    """Plain-JAX f32 reference (same math) for verification."""

    def conv(inp, w_oihw):
        return lax.conv_general_dilated(
            inp, w_oihw, window_strides=(1, 1), padding=((1, 1), (1, 1)),
            dimension_numbers=("NCHW", "OIHW", "NCHW"))

    def bn(inp, g, b, m, v, eps=1e-5):
        g = g[None, :, None, None]
        b = b[None, :, None, None]
        m = m[None, :, None, None]
        v = v[None, :, None, None]
        return (inp - m) / jnp.sqrt(v + eps) * g + b

    out = conv(x_nchw, params["conv1_w"])
    out = bn(out, params["bn1_gamma"], params["bn1_beta"],
             params["bn1_mean"], params["bn1_var"])
    out = jnp.maximum(out, 0.0)
    out = conv(out, params["conv2_w"])
    out = bn(out, params["bn2_gamma"], params["bn2_beta"],
             params["bn2_mean"], params["bn2_var"])
    out = out + x_nchw
    return jnp.maximum(out, 0.0)


def make_params(key, in_ch, out_ch):
    ks = jax.random.split(key, 10)
    return {
        "conv1_w": jax.random.normal(ks[0], (out_ch, in_ch, 3, 3), jnp.float32) * 0.1,
        "conv2_w": jax.random.normal(ks[1], (out_ch, out_ch, 3, 3), jnp.float32) * 0.1,
        "bn1_gamma": 1.0 + 0.1 * jax.random.normal(ks[2], (out_ch,), jnp.float32),
        "bn1_beta": 0.1 * jax.random.normal(ks[3], (out_ch,), jnp.float32),
        "bn1_mean": 0.1 * jax.random.normal(ks[4], (out_ch,), jnp.float32),
        "bn1_var": 1.0 + 0.1 * jax.random.uniform(ks[5], (out_ch,), jnp.float32),
        "bn2_gamma": 1.0 + 0.1 * jax.random.normal(ks[6], (out_ch,), jnp.float32),
        "bn2_beta": 0.1 * jax.random.normal(ks[7], (out_ch,), jnp.float32),
        "bn2_mean": 0.1 * jax.random.normal(ks[8], (out_ch,), jnp.float32),
        "bn2_var": 1.0 + 0.1 * jax.random.uniform(ks[9], (out_ch,), jnp.float32),
    }


if __name__ == "__main__":
    key = jax.random.PRNGKey(0)
    k_x, k_p = jax.random.split(key)

    N, C, H, W = 2, 4, 16, 16  # in_channel == out_channel, stride=1, downsample=None
    x = jax.random.normal(k_x, (N, C, H, W), jnp.float32)
    params = make_params(k_p, C, C)

    out = jax.jit(block_forward)(x, params)
    out = jax.block_until_ready(out)

    ref = block_reference(x, params)
    assert out.shape == (N, C, H, W)
    # bf16 MXU operands (f32 accumulation) -> looser tolerance than pure-f32.
    max_err = jnp.max(jnp.abs(out - ref))
    assert jnp.allclose(out, ref, atol=5e-2, rtol=5e-2), (
        f"mismatch vs reference: max abs err = {max_err:.4e}")

    print("KERNEL_OK")
</pallas_src>

<mosaic_0001>
module attributes {stable_mosaic.version = 11 : i64} {
  func.func @fused_block_kernel(%arg0: i32, %arg1: memref<1x4x256xf32, #tpu.memory_space<vmem>>, %arg2: memref<4x36xbf16, #tpu.memory_space<vmem>>, %arg3: memref<4x1xf32, #tpu.memory_space<vmem>>, %arg4: memref<4x36xbf16, #tpu.memory_space<vmem>>, %arg5: memref<4x1xf32, #tpu.memory_space<vmem>>, %arg6: memref<1x4x256xf32, #tpu.memory_space<vmem>>) attributes {dimension_semantics = [#tpu.dimension_semantics<parallel>], iteration_bounds = array<i64: 2>, scalar_prefetch = 0 : i64, scratch_operands = 0 : i64, tpu.core_type = #tpu.core_type<tc>, window_params = [{transform_indices = @transform_0, window_bounds = array<i64: 1, 4, 256>}, {pipeline_mode = #tpu.pipeline_mode<synchronous>, transform_indices = @transform_1, window_bounds = array<i64: 4, 36>}, {pipeline_mode = #tpu.pipeline_mode<synchronous>, transform_indices = @transform_2, window_bounds = array<i64: 4, 1>}, {pipeline_mode = #tpu.pipeline_mode<synchronous>, transform_indices = @transform_3, window_bounds = array<i64: 4, 36>}, {pipeline_mode = #tpu.pipeline_mode<synchronous>, transform_indices = @transform_4, window_bounds = array<i64: 4, 1>}, {transform_indices = @transform_5, window_bounds = array<i64: 1, 4, 256>}]} {
    %c0 = arith.constant 0 : index
    %c0_0 = arith.constant 0 : index
    %c0_1 = arith.constant 0 : index
    %0 = vector.load %arg1[%c0, %c0_0, %c0_1] : memref<1x4x256xf32, #tpu.memory_space<vmem>>, vector<1x4x256xf32>
    %1 = vector.shape_cast %0 : vector<1x4x256xf32> to vector<4x256xf32>
    %2 = arith.truncf %1 : vector<4x256xf32> to vector<4x256xbf16>
    %3 = vector.shape_cast %2 : vector<4x256xbf16> to vector<4x16x16xbf16>
    %cst = arith.constant 0.000000e+00 : bf16
    %4 = vector.broadcast %cst : bf16 to vector<4x1x16xbf16>
    %5 = tpu.concatenate %4, %3, %4 in 1 : vector<4x1x16xbf16>, vector<4x16x16xbf16>, vector<4x1x16xbf16> -> vector<4x18x16xbf16>
    %cst_2 = arith.constant 0.000000e+00 : bf16
    %6 = vector.broadcast %cst_2 : bf16 to vector<4x18x1xbf16>
    %7 = tpu.concatenate %6, %5, %6 in 2 : vector<4x18x1xbf16>, vector<4x18x16xbf16>, vector<4x18x1xbf16> -> vector<4x18x18xbf16>
    %8 = vector.extract_strided_slice %7 {offsets = [0, 0, 0], sizes = [4, 16, 16], strides = [1, 1, 1]} : vector<4x18x18xbf16> to vector<4x16x16xbf16>
    %9 = vector.shape_cast %8 : vector<4x16x16xbf16> to vector<4x256xbf16>
    %10 = vector.extract_strided_slice %7 {offsets = [0, 0, 1], sizes = [4, 16, 16], strides = [1, 1, 1]} : vector<4x18x18xbf16> to vector<4x16x16xbf16>
    %11 = vector.shape_cast %10 : vector<4x16x16xbf16> to vector<4x256xbf16>
    %12 = vector.extract_strided_slice %7 {offsets = [0, 0, 2], sizes = [4, 16, 16], strides = [1, 1, 1]} : vector<4x18x18xbf16> to vector<4x16x16xbf16>
    %13 = vector.shape_cast %12 : vector<4x16x16xbf16> to vector<4x256xbf16>
    %14 = vector.extract_strided_slice %7 {offsets = [0, 1, 0], sizes = [4, 16, 16], strides = [1, 1, 1]} : vector<4x18x18xbf16> to vector<4x16x16xbf16>
    %15 = vector.shape_cast %14 : vector<4x16x16xbf16> to vector<4x256xbf16>
    %16 = vector.extract_strided_slice %7 {offsets = [0, 1, 1], sizes = [4, 16, 16], strides = [1, 1, 1]} : vector<4x18x18xbf16> to vector<4x16x16xbf16>
    %17 = vector.shape_cast %16 : vector<4x16x16xbf16> to vector<4x256xbf16>
    %18 = vector.extract_strided_slice %7 {offsets = [0, 1, 2], sizes = [4, 16, 16], strides = [1, 1, 1]} : vector<4x18x18xbf16> to vector<4x16x16xbf16>
    %19 = vector.shape_cast %18 : vector<4x16x16xbf16> to vector<4x256xbf16>
    %20 = vector.extract_strided_slice %7 {offsets = [0, 2, 0], sizes = [4, 16, 16], strides = [1, 1, 1]} : vector<4x18x18xbf16> to vector<4x16x16xbf16>
    %21 = vector.shape_cast %20 : vector<4x16x16xbf16> to vector<4x256xbf16>
    %22 = vector.extract_strided_slice %7 {offsets = [0, 2, 1], sizes = [4, 16, 16], strides = [1, 1, 1]} : vector<4x18x18xbf16> to vector<4x16x16xbf16>
    %23 = vector.shape_cast %22 : vector<4x16x16xbf16> to vector<4x256xbf16>
    %24 = vector.extract_strided_slice %7 {offsets = [0, 2, 2], sizes = [4, 16, 16], strides = [1, 1, 1]} : vector<4x18x18xbf16> to vector<4x16x16xbf16>
    %25 = vector.shape_cast %24 : vector<4x16x16xbf16> to vector<4x256xbf16>
    %26 = tpu.concatenate %9, %11, %13, %15, %17, %19, %21, %23, %25 in 0 : vector<4x256xbf16>, vector<4x256xbf16>, vector<4x256xbf16>, vector<4x256xbf16>, vector<4x256xbf16>, vector<4x256xbf16>, vector<4x256xbf16>, vector<4x256xbf16>, vector<4x256xbf16> -> vector<36x256xbf16>
    %c0_3 = arith.constant 0 : index
    %c0_4 = arith.constant 0 : index
    %27 = vector.load %arg2[%c0_3, %c0_4] : memref<4x36xbf16, #tpu.memory_space<vmem>>, vector<4x36xbf16>
    %cst_5 = arith.constant dense<0.000000e+00> : vector<4x256xf32>
    %28 = tpu.matmul %27, %26, %cst_5 {dimension_numbers = #tpu.dot_dimension_numbers<[1], [0], [0], [1], [0, 0, 1, 1], [], []>} : vector<4x36xbf16>, vector<36x256xbf16>, vector<4x256xf32> -> vector<4x256xf32>
    %c0_6 = arith.constant 0 : index
    %c0_7 = arith.constant 0 : index
    %29 = vector.load %arg3[%c0_6, %c0_7] : memref<4x1xf32, #tpu.memory_space<vmem>>, vector<4x1xf32>
    %30 = vector.broadcast %29 : vector<4x1xf32> to vector<4x256xf32>
    %31 = arith.addf %28, %30 : vector<4x256xf32>
    %cst_8 = arith.constant 0.000000e+00 : f32
    %32 = vector.broadcast %cst_8 : f32 to vector<4x256xf32>
    %33 = arith.maximumf %31, %32 : vector<4x256xf32>
    %34 = arith.truncf %33 : vector<4x256xf32> to vector<4x256xbf16>
    %35 = vector.shape_cast %34 : vector<4x256xbf16> to vector<4x16x16xbf16>
    %cst_9 = arith.constant 0.000000e+00 : bf16
    %36 = vector.broadcast %cst_9 : bf16 to vector<4x1x16xbf16>
    %37 = tpu.concatenate %36, %35, %36 in 1 : vector<4x1x16xbf16>, vector<4x16x16xbf16>, vector<4x1x16xbf16> -> vector<4x18x16xbf16>
    %cst_10 = arith.constant 0.000000e+00 : bf16
    %38 = vector.broadcast %cst_10 : bf16 to vector<4x18x1xbf16>
    %39 = tpu.concatenate %38, %37, %38 in 2 : vector<4x18x1xbf16>, vector<4x18x16xbf16>, vector<4x18x1xbf16> -> vector<4x18x18xbf16>
    %40 = vector.extract_strided_slice %39 {offsets = [0, 0, 0], sizes = [4, 16, 16], strides = [1, 1, 1]} : vector<4x18x18xbf16> to vector<4x16x16xbf16>
    %41 = vector.shape_cast %40 : vector<4x16x16xbf16> to vector<4x256xbf16>
    %42 = vector.extract_strided_slice %39 {offsets = [0, 0, 1], sizes = [4, 16, 16], strides = [1, 1, 1]} : vector<4x18x18xbf16> to vector<4x16x16xbf16>
    %43 = vector.shape_cast %42 : vector<4x16x16xbf16> to vector<4x256xbf16>
    %44 = vector.extract_strided_slice %39 {offsets = [0, 0, 2], sizes = [4, 16, 16], strides = [1, 1, 1]} : vector<4x18x18xbf16> to vector<4x16x16xbf16>
    %45 = vector.shape_cast %44 : vector<4x16x16xbf16> to vector<4x256xbf16>
    %46 = vector.extract_strided_slice %39 {offsets = [0, 1, 0], sizes = [4, 16, 16], strides = [1, 1, 1]} : vector<4x18x18xbf16> to vector<4x16x16xbf16>
    %47 = vector.shape_cast %46 : vector<4x16x16xbf16> to vector<4x256xbf16>
    %48 = vector.extract_strided_slice %39 {offsets = [0, 1, 1], sizes = [4, 16, 16], strides = [1, 1, 1]} : vector<4x18x18xbf16> to vector<4x16x16xbf16>
    %49 = vector.shape_cast %48 : vector<4x16x16xbf16> to vector<4x256xbf16>
    %50 = vector.extract_strided_slice %39 {offsets = [0, 1, 2], sizes = [4, 16, 16], strides = [1, 1, 1]} : vector<4x18x18xbf16> to vector<4x16x16xbf16>
    %51 = vector.shape_cast %50 : vector<4x16x16xbf16> to vector<4x256xbf16>
    %52 = vector.extract_strided_slice %39 {offsets = [0, 2, 0], sizes = [4, 16, 16], strides = [1, 1, 1]} : vector<4x18x18xbf16> to vector<4x16x16xbf16>
    %53 = vector.shape_cast %52 : vector<4x16x16xbf16> to vector<4x256xbf16>
    %54 = vector.extract_strided_slice %39 {offsets = [0, 2, 1], sizes = [4, 16, 16], strides = [1, 1, 1]} : vector<4x18x18xbf16> to vector<4x16x16xbf16>
    %55 = vector.shape_cast %54 : vector<4x16x16xbf16> to vector<4x256xbf16>
    %56 = vector.extract_strided_slice %39 {offsets = [0, 2, 2], sizes = [4, 16, 16], strides = [1, 1, 1]} : vector<4x18x18xbf16> to vector<4x16x16xbf16>
    %57 = vector.shape_cast %56 : vector<4x16x16xbf16> to vector<4x256xbf16>
    %58 = tpu.concatenate %41, %43, %45, %47, %49, %51, %53, %55, %57 in 0 : vector<4x256xbf16>, vector<4x256xbf16>, vector<4x256xbf16>, vector<4x256xbf16>, vector<4x256xbf16>, vector<4x256xbf16>, vector<4x256xbf16>, vector<4x256xbf16>, vector<4x256xbf16> -> vector<36x256xbf16>
    %c0_11 = arith.constant 0 : index
    %c0_12 = arith.constant 0 : index
    %59 = vector.load %arg4[%c0_11, %c0_12] : memref<4x36xbf16, #tpu.memory_space<vmem>>, vector<4x36xbf16>
    %cst_13 = arith.constant dense<0.000000e+00> : vector<4x256xf32>
    %60 = tpu.matmul %59, %58, %cst_13 {dimension_numbers = #tpu.dot_dimension_numbers<[1], [0], [0], [1], [0, 0, 1, 1], [], []>} : vector<4x36xbf16>, vector<36x256xbf16>, vector<4x256xf32> -> vector<4x256xf32>
    %c0_14 = arith.constant 0 : index
    %c0_15 = arith.constant 0 : index
    %61 = vector.load %arg5[%c0_14, %c0_15] : memref<4x1xf32, #tpu.memory_space<vmem>>, vector<4x1xf32>
    %62 = vector.broadcast %61 : vector<4x1xf32> to vector<4x256xf32>
    %63 = arith.addf %60, %62 : vector<4x256xf32>
    %64 = arith.addf %63, %1 : vector<4x256xf32>
    %cst_16 = arith.constant 0.000000e+00 : f32
    %65 = vector.broadcast %cst_16 : f32 to vector<4x256xf32>
    %66 = arith.maximumf %64, %65 : vector<4x256xf32>
    %67 = vector.shape_cast %66 : vector<4x256xf32> to vector<1x4x256xf32>
    %c0_17 = arith.constant 0 : index
    %c0_18 = arith.constant 0 : index
    %c0_19 = arith.constant 0 : index
    %68 = vector.load %arg6[%c0_17, %c0_18, %c0_19] : memref<1x4x256xf32, #tpu.memory_space<vmem>>, vector<1x4x256xf32>
    tpu.vector_store %arg6[%c0_17, %c0_18, %c0_19], %67 {strides = array<i32>} : memref<1x4x256xf32, #tpu.memory_space<vmem>>, vector<1x4x256xf32>,
    return
  }
  func.func @transform_0(%arg0: i32) -> (i32, i32, i32) {
    %c0_i32 = arith.constant 0 : i32
    %c0_i32_0 = arith.constant 0 : i32
    %c0_i32_1 = arith.constant 0 : i32
    return %arg0, %c0_i32, %c0_i32_0 : i32, i32, i32
  }
  func.func @transform_1(%arg0: i32) -> (i32, i32) {
    %c0_i32 = arith.constant 0 : i32
    %c0_i32_0 = arith.constant 0 : i32
    %c0_i32_1 = arith.constant 0 : i32
    return %c0_i32, %c0_i32_0 : i32, i32
  }
  func.func @transform_2(%arg0: i32) -> (i32, i32) {
    %c0_i32 = arith.constant 0 : i32
    %c0_i32_0 = arith.constant 0 : i32
    %c0_i32_1 = arith.constant 0 : i32
    return %c0_i32, %c0_i32_0 : i32, i32
  }
  func.func @transform_3(%arg0: i32) -> (i32, i32) {
    %c0_i32 = arith.constant 0 : i32
    %c0_i32_0 = arith.constant 0 : i32
    %c0_i32_1 = arith.constant 0 : i32
    return %c0_i32, %c0_i32_0 : i32, i32
  }
  func.func @transform_4(%arg0: i32) -> (i32, i32) {
    %c0_i32 = arith.constant 0 : i32
    %c0_i32_0 = arith.constant 0 : i32
    %c0_i32_1 = arith.constant 0 : i32
    return %c0_i32, %c0_i32_0 : i32, i32
  }
  func.func @transform_5(%arg0: i32) -> (i32, i32, i32) {
    %c0_i32 = arith.constant 0 : i32
    %c0_i32_0 = arith.constant 0 : i32
    %c0_i32_1 = arith.constant 0 : i32
    return %arg0, %c0_i32, %c0_i32_0 : i32, i32, i32
  }
}

</mosaic_0001>

<bundles_post_ra>
// kernel: block_forward.1
= control target key start
LH: loop header
LB: loop body
LE: loop exit
PB: predicated region body
PF: predicated region fallthrough
CT: control target
= control target key end

     0   :  { %s5286_s18 = smov 0   ;;  %s8027_s0 = inlined_call_operand.vmem [shape: f32[2,4,256], index: 0, kind: input, shape index: {}]   ;;  %s8028_s1 = inlined_call_operand.vmem [shape: bf16[4,36], index: 1, kind: input, shape index: {}]   ;;  %s8029_s2 = inlined_call_operand.vmem [shape: f32[4,1], index: 2, kind: input, shape index: {}]   ;;  %s8030_s3 = inlined_call_operand.vmem [shape: bf16[4,36], index: 3, kind: input, shape index: {}]   ;;  %s8031_s4 = inlined_call_operand.vmem [shape: f32[4,1], index: 4, kind: input, shape index: {}]   ;;  %s8032_s5 = inlined_call_operand.vmem [shape: f32[2,4,256], index: 5, kind: output, shape index: {}]  }
   0x1 LB: > { %s5194_s19 = sadd.s32 4294967295, %s5241_s18   ;;  %p5198_p0 = scmp.ge.s32.totalorder %s5241_s18, 1  ;;  %s5241_s18 = sphi %s5286_s18, %s15_s18  }
   0x2   : > { %p187_p1 = scmp.lt.s32.totalorder %s5241_s18, 3 }
   0x4   : > { %p188_p2 = pnand %p5198_p0, %p187_p1 }
   0x6   : > { %191 = sbr.rel (%p188_p2) target bundleno = 1858 (0x742), region = 40 }
   0xb   : > { %p215_p3 = scmp.lt.s32.totalorder %s5194_s19, 1  ;;  %s5243_s24 = smov 80   ;;  %v5250_v10 = vmov 1983009808   ;;  %v280_v12 = vlaneseq  ;;  %v5251_v19 = vmov 1934713408  }
   0xc   : > { %s5244_s25 = smov 112   ;;  %s5245_s26 = smov 64   ;;  %v278_v11 = vunpack.c.l.s4 %v5250_v10  ;;  %v310_v20 = vunpack.c.l.s4 %v5251_v19  ;;  %vm424_vm0 = vcmask 1040384   ;;  %vm425_vm1 = vsmask.f32 256 }
   0xd   : > { %s8237_s19 = smov (!%p215_p3, %s5194_s19), 1  ;;  %s5246_s27 = smov 96   ;;  %v281_v16 = vshrl.u32 %v280_v12, 7  ;;  %vm5339_vm2 = vmand %vm424_vm0, %vm425_vm1  ;;  %vm459_vm3 = vcmask 7168   ;;  %vm477_vm4 = vcmask 138240   ;;  %vm1891_vm5 = vcmask 1046528  }
   0xe   : > { %s5209_s20 = sshll.u32 %s8237_s19, 3  ;;  %s5247_s28 = smov 32   ;;  %v279_v15 = vunpack.c.0.s8 %v278_v11  ;;  %v311_v28 = vunpack.c.0.s8 %v310_v20  ;;  %vm1174_vm6 = vsmask.f32 7424  ;;  %vm677_vm7 = vcmask 130048  }
   0xf   : > { %s5302_s23 = scalar_lea.vmem %s8027_s0, %s5209_s20  ;;  %s5248_s29 = smov 48   ;;  %vm681_vm8 = vcmask 261120   ;;  %vm684_vm9 = vcmask 392192   ;;  %vm687_vm10 = vcmask 523264   ;;  %vm690_vm11 = vcmask 654336  }
  0x10   : > { %v226_v0 = vld [vmem:[%s5302_s23] sm:$0xff]  ;;  %s5249_s30 = smov 16   ;;  %v5323_v23 = vsub.s32 %v279_v15, %v281_v16  ;;  %v5329_v39 = vsub.s32 %v311_v28, %v281_v16  ;;  %s5252_s6 = smov 1   ;;  %vm693_vm12 = vcmask 785408   ;;  %vm696_vm13 = vcmask 916480  }
  0x11   : > { %v230_v1 = vpack.c.bf16 %v226_v0, %v226_v0  ;;  %v5309_v2 = vcombine.high %v226_v0, %v226_v0  ;;  %s5254_s7 = smov 127   ;;  %s5255_s8 = smov 126   ;;  %vm2604_vm14 = vcmask 1041408   ;;  %vm2609_vm15 = vcmask 1043456  }
  0x12   : > { %8059 = vst [vmem:[#allocation3_spill] sm:$0xff] %v5323_v23  ;;  %8060 = vst [vmem:[#allocation4_spill] sm:$0xff] %v5329_v39  ;;  %vm2614_vm0 = vcmask 1045504   ;;  %vm2642_vm1 = vcmask 293888   ;;  %s224_s22 = scalar_lea.vmem %s8032_s5, %s5209_s20 }
  0x13   : > { %239 = vrot.lane.b32.xlu1 %v230_v1, %s5243_s24  ;;  %233 = vrot.lane.b32.xlu0 %v230_v1, %s5244_s25  ;;  %8058 = vst [vmem:[#allocation2_spill] sm:$0xff] %v5309_v2  ;;  %v231_v3 = vpack.c.bf16 %v5309_v2, %v5309_v2 }
  0x17   : > { %242 = vrot.lane.b32.xlu1 %v230_v1, %s5245_s26  ;;  %236 = vrot.lane.b32.xlu0 %v230_v1, %s5246_s27 }
  0x1b   : > { %248 = vrot.lane.b32.xlu1 %v230_v1, %s5247_s28  ;;  %245 = vrot.lane.b32.xlu0 %v230_v1, %s5248_s29 }
  0x1f   : > { %251 = vrot.lane.b32.xlu0 %v230_v1, %s5249_s30  ;;  %255 = vrot.lane.b32.xlu1 %v231_v3, %s5244_s25 }
  0x23   : > { %258 = vrot.lane.b32.xlu0 %v231_v3, %s5246_s27  ;;  %261 = vrot.lane.b32.xlu1 %v231_v3, %s5243_s24 }
  0x27   : > { %264 = vrot.lane.b32.xlu0 %v231_v3, %s5245_s26  ;;  %267 = vrot.lane.b32.xlu1 %v231_v3, %s5248_s29 }
  0x2b   : > { %270 = vrot.lane.b32.xlu0 %v231_v3, %s5247_s28  ;;  %273 = vrot.lane.b32.xlu1 %v231_v3, %s5249_s30 }
  0x85   : > { %v240_v4 = vpop.permute.xlu1 %239  ;;  %v234_v5 = vpop.permute.xlu0 %233 }
  0x89   : > { %v243_v6 = vpop.permute.xlu1 %242  ;;  %v237_v7 = vpop.permute.xlu0 %236 }
  0x8a   : > { %v276_v24 = vcombine.low %v230_v1, %v243_v6  ;;  %v8061_v1 = vmov 0 }
  0x8b   : > { %v8062_v1 = vsel %vm5339_vm2, 4294967295, %v8061_v1 }
  0x8c   : > { %v283_v33 = vrot.slane %v276_v24, %v5323_v23  ;;  %8063 = vst [vmem:[#allocation5_spill] sm:$0xff] %v8062_v1 }
  0x8d   : > { %v249_v8 = vpop.permute.xlu1 %248  ;;  %v246_v9 = vpop.permute.xlu0 %245 }
  0x8e   : > { %v284_v21 = vcombine.low %v237_v7, %v249_v8  ;;  %v326_v25 = vcombine.low %v234_v5, %v246_v9 }
  0x90   : > { %v291_v29 = vrot.slane %v284_v21, %v5323_v23  ;;  %v333_v34 = vrot.slane %v326_v25, %v5323_v23 }
  0x91   : > { %v252_v13 = vpop.permute.xlu0 %251  ;;  %v256_v14 = vpop.permute.xlu1 %255 }
  0x92   : > { %v334_v22 = vcombine.low %v240_v4, %v252_v13  ;;  %v308_v40 = vcombine.low %v283_v33, %v291_v29  ;;  %v8039_v13 = vmov 0  }
  0x93   : > { %2682 = vmatprep.mubr.bf16.mxu0 %v8039_v13  ;;  %5232 = vset.pattern.permute.xlu0 %v8039_v13 }
  0x94   : > { %v341_v30 = vrot.slane %v334_v22, %v5323_v23  ;;  %v315_v48 = vrot.slane %v308_v40, %v5329_v39  ;;  %5121 = vmatprep.mubr.bf16.mxu1 %v8039_v13 }
  0x95   : > { %v259_v17 = vpop.permute.xlu0 %258  ;;  %v262_v18 = vpop.permute.xlu1 %261 }
  0x96   : > { %v358_v41 = vcombine.low %v333_v34, %v341_v30 }
  0x98   : > { %v365_v49 = vrot.slane %v358_v41, %v5329_v39 }
  0x99   : > { %v265_v26 = vpop.permute.xlu0 %264  ;;  %v268_v27 = vpop.permute.xlu1 %267 }
  0x9a   : > { %v292_v31 = vcombine.low %v231_v3, %v265_v26  ;;  %v342_v32 = vcombine.low %v256_v14, %v268_v27 }
  0x9c   : > { %v299_v42 = vrot.slane %v292_v31, %v5323_v23  ;;  %v349_v43 = vrot.slane %v342_v32, %v5323_v23 }
  0x9d   : > { %v271_v35 = vpop.permute.xlu0 %270  ;;  %v274_v36 = vpop.permute.xlu1 %273 }
  0x9e   : > { %v300_v37 = vcombine.low %v259_v17, %v271_v35  ;;  %v350_v38 = vcombine.low %v262_v18, %v274_v36 }
  0xa0   : > { %v307_v44 = vrot.slane %v300_v37, %v5323_v23  ;;  %v357_v45 = vrot.slane %v350_v38, %v5323_v23 }
  0xa2   : > { %v316_v46 = vcombine.low %v299_v42, %v307_v44  ;;  %v366_v47 = vcombine.low %v349_v43, %v357_v45 }
  0xa4   : > { %v323_v50 = vrot.slane %v316_v46, %v5329_v39  ;;  %v373_v51 = vrot.slane %v366_v47, %v5329_v39 }
  0xa6   : > { %v324_v52 = vcombine.low %v315_v48, %v323_v50  ;;  %v374_v53 = vcombine.low %v365_v49, %v373_v51  ;;  %v325_v54 = vcombine.high %v315_v48, %v323_v50  ;;  %v375_v55 = vcombine.high %v365_v49, %v373_v51 }
  0xa8   : > { %v378_v56 = vpack.i.b16 %v374_v53, %v324_v52  ;;  %v379_v57 = vshrl.u32 %v324_v52, 16  ;;  %v380_v58 = vshrl.u32 %v374_v53, 16  ;;  %v384_v59 = vpack.i.b16 %v375_v55, %v325_v54 }
  0xa9   : > { %v385_v60 = vshrl.u32 %v325_v54, 16  ;;  %v386_v61 = vshrl.u32 %v375_v55, 16 }
  0xaa   : > { %v389_v62 = vshrl.u32 %v378_v56, 16  ;;  %v381_v63 = vpack.i.b16 %v380_v58, %v379_v57  ;;  %v403_v0 = vshrl.u32 %v384_v59, 16  ;;  %v392_v12 = vshll.u32 %v378_v56, 16 }
  0xab   : > { %v387_v3 = vpack.i.b16 %v386_v61, %v385_v60  ;;  %v406_v19 = vshll.u32 %v384_v59, 16 }
  0xac   : > { %v391_v4 = vrot.slane %v389_v62, 7  ;;  %v396_v5 = vshrl.u32 %v381_v63, 16  ;;  %v405_v9 = vrot.slane %v403_v0, 7  ;;  %v399_v16 = vshll.u32 %v381_v63, 16 }
  0xad   : > { %v410_v6 = vshrl.u32 %v387_v3, 16  ;;  %v413_v22 = vshll.u32 %v387_v3, 16 }
  0xae   : > { %v431_v7 = vsel %vm5339_vm2, %v391_v4, 0  ;;  %v398_v8 = vrot.slane %v396_v5, 7  ;;  %v433_v14 = vsel %vm5339_vm2, %v405_v9, 0  ;;  %v394_v15 = vor.u32 %v392_v12, %v391_v4 }
  0xaf   : > { %445 = vrot.lane.b32.xlu0 %v431_v7, %s5252_s6  ;;  %v412_v11 = vrot.slane %v410_v6, 7  ;;  %v408_v21 = vor.u32 %v406_v19, %v405_v9 }
  0xb0   : > { %v432_v10 = vsel %vm5339_vm2, %v398_v8, 0  ;;  %v401_v18 = vor.u32 %v399_v16, %v398_v8  ;;  %v427_v20 = vsel %vm5339_vm2, 0, %v394_v15 }
  0xb1   : > { %449 = vrot.lane.b32.xlu1 %v432_v10, %s5252_s6  ;;  %v434_v17 = vsel %vm5339_vm2, %v412_v11, 0  ;;  %v415_v25 = vor.u32 %v413_v22, %v412_v11  ;;  %v429_v26 = vsel %vm5339_vm2, 0, %v408_v21 }
  0xb2   : > { %v428_v24 = vsel %vm5339_vm2, 0, %v401_v18 }
  0xb3   : > { %453 = vrot.lane.b32.xlu0 %v433_v14, %s5252_s6  ;;  %v430_v27 = vsel %vm5339_vm2, 0, %v415_v25 }
  0xb5   : > { %457 = vrot.lane.b32.xlu1 %v434_v17, %s5252_s6 }
  0xb7   : > { %443 = vrot.lane.b32.xlu0 %v427_v20, %s5252_s6 }
  0xb9   : > { %447 = vrot.lane.b32.xlu1 %v428_v24, %s5252_s6 }
  0xbb   : > { %451 = vrot.lane.b32.xlu0 %v429_v26, %s5252_s6 }
  0xbd   : > { %455 = vrot.lane.b32.xlu1 %v430_v27, %s5252_s6 }
 0x121   : > { %v446_v28 = vpop.permute.xlu0 %445 }
 0x122   : > { %v464_v45 = vsel %vm459_vm3, 0, %v446_v28 }
 0x123   : > { %v450_v29 = vpop.permute.xlu1 %449  ;;  %v479_v47 = vsel %vm477_vm4, %v464_v45, 0 }
 0x124   : > { %v468_v46 = vsel %vm459_vm3, 0, %v450_v29  ;;  %v1893_v51 = vrot.slane %v479_v47, 1  ;;  %v1180_v7 = vshll.u32 %v479_v47, 16 }
 0x125   : > { %v454_v30 = vpop.permute.xlu0 %453  ;;  %v481_v50 = vsel %vm477_vm4, %v468_v46, 0 }
 0x126   : > { %v472_v48 = vsel %vm459_vm3, 0, %v454_v30  ;;  %v1896_v55 = vrot.slane %v481_v50, 1  ;;  %v1189_v11 = vshll.u32 %v481_v50, 16  ;;  %v1182_v16 = vrot.slane %v1180_v7, 1 }
 0x127   : > { %v458_v31 = vpop.permute.xlu1 %457  ;;  %v483_v54 = vsel %vm477_vm4, %v472_v48, 0 }
 0x128   : > { %v476_v52 = vsel %vm459_vm3, 0, %v458_v31  ;;  %v1899_v59 = vrot.slane %v483_v54, 1  ;;  %v1198_v17 = vshll.u32 %v483_v54, 16  ;;  %v1191_v21 = vrot.slane %v1189_v11, 1 }
 0x129   : > { %v444_v32 = vpop.permute.xlu0 %443  ;;  %v485_v58 = vsel %vm477_vm4, %v476_v52, 0 }
 0x12a   : > { %v462_v33 = vsel %vm459_vm3, 0, %v444_v32  ;;  %v1902_v62 = vrot.slane %v485_v58, 1  ;;  %v1207_v22 = vshll.u32 %v485_v58, 16  ;;  %v1200_v28 = vrot.slane %v1198_v17, 1 }
 0x12b   : > { %v5372_v34 = vsel %vm477_vm4, %v462_v33, 0  ;;  %v448_v35 = vpop.permute.xlu1 %447 }
 0x12c   : > { %v466_v36 = vsel %vm459_vm3, 0, %v448_v35  ;;  %718 = vrot.lane.b32.xlu0 %v5372_v34, %s5254_s7  ;;  %v1892_v49 = vrot.slane %v5372_v34, 1  ;;  %v1176_v0 = vshll.u32 %v5372_v34, 16  ;;  %v488_v8 = vshrl.u32 %v5372_v34, 16 }
 0x12d   : > { %v5378_v37 = vsel %vm477_vm4, %v466_v36, 0  ;;  %v452_v38 = vpop.permute.xlu0 %451  ;;  %v1209_v32 = vrot.slane %v1207_v22, 1 }
 0x12e   : > { %v470_v40 = vsel %vm459_vm3, 0, %v452_v38  ;;  %720 = vrot.lane.b32.xlu1 %v5378_v37, %s5254_s7  ;;  %v1895_v53 = vrot.slane %v5378_v37, 1  ;;  %v5412_v56 = vsel %vm1891_vm5, %v1892_v49, %v1893_v51  ;;  %v1185_v4 = vshll.u32 %v5378_v37, 16 }
 0x12f   : > { %v5384_v41 = vsel %vm477_vm4, %v470_v40, 0  ;;  %v456_v42 = vpop.permute.xlu1 %455  ;;  %v1178_v5 = vrot.slane %v1176_v0, 1  ;;  %v489_v14 = vshrl.u32 %v5378_v37, 16  ;;  %v486_v31 = vpack.i.b16 %v5378_v37, %v5372_v34 }
 0x130   : > { %v474_v43 = vsel %vm459_vm3, 0, %v456_v42  ;;  %722 = vrot.lane.b32.xlu0 %v5384_v41, %s5254_s7  ;;  %v1898_v57 = vrot.slane %v5384_v41, 1  ;;  %v5419_v60 = vsel %vm1891_vm5, %v1895_v53, %v1896_v55  ;;  %v1194_v6 = vshll.u32 %v5384_v41, 16 }
 0x131   : > { %v5390_v44 = vsel %vm477_vm4, %v474_v43, 0  ;;  %v1187_v9 = vrot.slane %v1185_v4, 1  ;;  %v1179_v12 = vor.u32 %v1178_v5, %v488_v8  ;;  %v494_v19 = vshrl.u32 %v5384_v41, 16 }
 0x132   : > { %724 = vrot.lane.b32.xlu1 %v5390_v44, %s5254_s7  ;;  %v1901_v61 = vrot.slane %v5390_v44, 1  ;;  %v5425_v63 = vsel %vm1891_vm5, %v1898_v57, %v1899_v59  ;;  %v1203_v10 = vshll.u32 %v5390_v44, 16  ;;  %v1196_v15 = vrot.slane %v1194_v6, 1 }
 0x133   : > { %v1188_v18 = vor.u32 %v1187_v9, %v489_v14  ;;  %v5450_v24 = vsel %vm1174_vm6, %v1179_v12, %v1182_v16  ;;  %v495_v26 = vshrl.u32 %v5390_v44, 16  ;;  %v492_v27 = vpack.i.b16 %v5390_v44, %v5384_v41 }
 0x134   : > { %946 = vrot.lane.b32.xlu0 %v5372_v34, %s5255_s8  ;;  %v5431_v3 = vsel %vm1891_vm5, %v1901_v61, %v1902_v62  ;;  %v1205_v20 = vrot.slane %v1203_v10, 1  ;;  %v1197_v25 = vor.u32 %v1196_v15, %v494_v19  ;;  %v5475_v38 = vpack.i.b16 %v8039_v13, %v8039_v13 }
 0x135   : > { %v5458_v29 = vsel %vm1174_vm6, %v1188_v18, %v1191_v21  ;;  %v525_v35 = vrot.slane %v492_v27, %v5323_v23  ;;  %v510_v34 = vrot.slane %v486_v31, %v5323_v23  ;;  %v1914_v49 = vpack.i.b16 %v5431_v3, %v5425_v63 }
 0x136   : > { %948 = vrot.lane.b32.xlu1 %v5378_v37, %s5255_s8  ;;  %v1206_v30 = vor.u32 %v1205_v20, %v495_v26  ;;  %v5465_v33 = vsel %vm1174_vm6, %v1197_v25, %v1200_v28  ;;  %8064 = vst [vmem:[#allocation6_spill] sm:$0xff] %v5475_v38  ;;  %v496_v37 = vpack.i.b16 %v495_v26, %v494_v19  ;;  %v1917_v9 = vshrl.u32 %v5431_v3, 16 }
 0x137   : > { %v533_v40 = vcombine.low %v510_v34, %v525_v35  ;;  %v518_v42 = vcombine.high %v492_v27, %v5475_v38  ;;  %v534_v43 = vcombine.high %v510_v34, %v525_v35  ;;  %v503_v45 = vcombine.high %v486_v31, %v5475_v38 }
 0x138   : > { %950 = vrot.lane.b32.xlu0 %v5384_v41, %s5255_s8  ;;  %v5471_v36 = vsel %vm1174_vm6, %v1206_v30, %v1209_v32  ;;  %v490_v41 = vpack.i.b16 %v489_v14, %v488_v8  ;;  %v1906_v53 = vpack.i.b16 %v5419_v60, %v5412_v56  ;;  %v1942_v59 = vrot.slane %v1914_v49, %v5323_v23 }
 0x139   : > { %v5490_v46 = vrot.slane %v533_v40, %v5329_v39  ;;  %v532_v48 = vrot.slane %v518_v42, %v5323_v23  ;;  %v548_v50 = vrot.slane %v534_v43, %v5329_v39  ;;  %v517_v52 = vrot.slane %v503_v45, %v5323_v23 }
 0x13a   : > { %952 = vrot.lane.b32.xlu1 %v5390_v44, %s5255_s8  ;;  %v591_v44 = vrot.slane %v496_v37, %v5323_v23  ;;  %v576_v47 = vrot.slane %v490_v41, %v5323_v23  ;;  %v584_v61 = vcombine.high %v496_v37, %v5475_v38  ;;  %v1927_v0 = vrot.slane %v1906_v53, %v5323_v23 }
 0x13b   : > { %v565_v54 = vcombine.high %v5490_v46, %v8039_v13  ;;  %v550_v55 = vcombine.high %v517_v52, %v532_v48  ;;  %v549_v4 = vcombine.low %v517_v52, %v532_v48  ;;  %v569_v5 = vcombine.high %v490_v41, %v5475_v38 }
 0x13c   : > { %2352 = vrot.lane.b32.xlu0 %v5412_v56, %s5255_s8  ;;  %v599_v51 = vcombine.low %v576_v47, %v591_v44  ;;  %v600_v58 = vcombine.high %v576_v47, %v591_v44  ;;  %v1951_v7 = vcombine.high %v1927_v0, %v1942_v59  ;;  %v598_v8 = vrot.slane %v584_v61, %v5323_v23 }
 0x13d   : > { %v564_v62 = vrot.slane %v550_v55, %v5329_v39  ;;  %v566_v10 = vcombine.high %v548_v50, %v8039_v13  ;;  %v5523_v11 = vrot.slane %v549_v4, %v5329_v39  ;;  %v583_v12 = vrot.slane %v569_v5, %v5323_v23 }
 0x13e   : > { %2354 = vrot.lane.b32.xlu1 %v5419_v60, %s5255_s8  ;;  %v607_v57 = vrot.slane %v599_v51, %v5329_v39  ;;  %v5515_v6 = vrot.slane %v600_v58, %v5329_v39  ;;  %v1909_v14 = vshrl.u32 %v5419_v60, 16  ;;  %v1916_v15 = vshrl.u32 %v5425_v63, 16 }
 0x13f   : > { %v1965_v16 = vrot.slane %v1951_v7, %v5329_v39  ;;  %v615_v17 = vcombine.low %v583_v12, %v598_v8  ;;  %v567_v19 = vcombine.high %v5523_v11, %v8039_v13  ;;  %v616_v20 = vcombine.high %v583_v12, %v598_v8 }
 0x140   : > { %2356 = vrot.lane.b32.xlu0 %v5425_v63, %s5255_s8  ;;  %v1918_v18 = vpack.i.b16 %v1917_v9, %v1916_v15  ;;  %v1935_v22 = vcombine.high %v1914_v49, %v5475_v38  ;;  %v1920_v25 = vcombine.high %v1906_v53, %v5475_v38  ;;  %v631_v27 = vcombine.high %v607_v57, %v8039_v13 }
 0x141   : > { %v568_v32 = vcombine.high %v564_v62, %v8039_v13  ;;  %v1983_v49 = vcombine.high %v1965_v16, %v8039_v13  ;;  %v1221_v53 = vpack.i.b16 %v5471_v36, %v5465_v33  ;;  %v1216_v58 = vshrl.u32 %v5458_v29, 16 }
 0x142   : > { %2358 = vrot.lane.b32.xlu1 %v5431_v3, %s5255_s8  ;;  %v2008_v26 = vrot.slane %v1918_v18, %v5323_v23  ;;  %v1949_v31 = vrot.slane %v1935_v22, %v5323_v23  ;;  %v1934_v34 = vrot.slane %v1920_v25, %v5323_v23  ;;  %v2001_v37 = vcombine.high %v1918_v18, %v5475_v38 }
 0x143   : > { %v1223_v61 = vshrl.u32 %v5465_v33, 16  ;;  %v1215_v4 = vshrl.u32 %v5450_v24, 16  ;;  %v1249_v8 = vrot.slane %v1221_v53, %v5323_v23 }
 0x144   : > { %2124 = vrot.lane.b32.xlu0 %v5412_v56, %s5254_s7  ;;  %v1967_v41 = vcombine.high %v1934_v34, %v1949_v31  ;;  %v2015_v44 = vrot.slane %v2001_v37, %v5323_v23 }
 0x146   : > { %2126 = vrot.lane.b32.xlu1 %v5419_v60, %s5254_s7  ;;  %v623_v60 = vrot.slane %v615_v17, %v5329_v39  ;;  %v1981_v45 = vrot.slane %v1967_v41, %v5329_v39 }
 0x148   : > { %2128 = vrot.lane.b32.xlu0 %v5425_v63, %s5254_s7  ;;  %v1950_v63 = vcombine.low %v1927_v0, %v1942_v59  ;;  %v633_v55 = vcombine.high %v623_v60, %v8039_v13  ;;  %v1213_v59 = vpack.i.b16 %v5458_v29, %v5450_v24 }
 0x14a   : > { %2130 = vrot.lane.b32.xlu1 %v5431_v3, %s5254_s7  ;;  %v1908_v3 = vshrl.u32 %v5412_v56, 16  ;;  %v630_v56 = vrot.slane %v616_v20, %v5329_v39  ;;  %v5544_v28 = vrot.slane %v1950_v63, %v5329_v39  ;;  %v1234_v9 = vrot.slane %v1213_v59, %v5323_v23 }
 0x14b   : > { %v1227_v18 = vcombine.high %v1213_v59, %v5475_v38 }
 0x14c   : > { %1659 = vrot.lane.b32.xlu0 %v5450_v24, %s5255_s8  ;;  %v1910_v21 = vpack.i.b16 %v1909_v14, %v1908_v3  ;;  %v1982_v40 = vcombine.high %v5544_v28, %v8039_v13  ;;  %v634_v5 = vcombine.high %v630_v56, %v8039_v13  ;;  %v1985_v14 = vcombine.high %v1981_v45, %v8039_v13 }
 0x14d   : > { %v1257_v20 = vcombine.low %v1234_v9, %v1249_v8 }
 0x14e   : > { %1661 = vrot.lane.b32.xlu1 %v5458_v29, %s5255_s8  ;;  %v1993_v30 = vrot.slane %v1910_v21, %v5323_v23  ;;  %v1986_v42 = vcombine.high %v1910_v21, %v5475_v38 }
 0x150   : > { %1663 = vrot.lane.b32.xlu0 %v5465_v33, %s5255_s8  ;;  %v2016_v35 = vcombine.low %v1993_v30, %v2008_v26  ;;  %v2017_v47 = vcombine.high %v1993_v30, %v2008_v26  ;;  %v2000_v48 = vrot.slane %v1986_v42, %v5323_v23  ;;  %v1241_v26 = vrot.slane %v1227_v18, %v5323_v23 }
 0x152   : > { %1665 = vrot.lane.b32.xlu1 %v5471_v36, %s5255_s8  ;;  %v2024_v43 = vrot.slane %v2016_v35, %v5329_v39  ;;  %v2031_v51 = vrot.slane %v2017_v47, %v5329_v39  ;;  %v2033_v0 = vcombine.high %v2000_v48, %v2015_v44 }
 0x154   : > { %1431 = vrot.lane.b32.xlu0 %v5450_v24, %s5254_s7 }
 0x156   : > { %1433 = vrot.lane.b32.xlu1 %v5458_v29, %s5254_s7  ;;  %v1217_v29 = vpack.i.b16 %v1216_v58, %v1215_v4 }
 0x158   : > { %1435 = vrot.lane.b32.xlu0 %v5465_v33, %s5254_s7  ;;  %v2047_v33 = vrot.slane %v2033_v0, %v5329_v39  ;;  %v1300_v15 = vrot.slane %v1217_v29, %v5323_v23  ;;  %v1293_v63 = vcombine.high %v1217_v29, %v5475_v38 }
 0x15a   : > { %1437 = vrot.lane.b32.xlu1 %v5471_v36, %s5254_s7  ;;  %v1307_v35 = vrot.slane %v1293_v63, %v5323_v23 }
 0x15c   : > { %645 = vrot.lane.b32.xlu0 %v548_v50, %s5245_s26  ;;  %v2032_v50 = vcombine.low %v2000_v48, %v2015_v44 }
 0x15e   : > { %639 = vrot.lane.b32.xlu1 %v565_v54, %s5247_s28  ;;  %v2040_v52 = vrot.slane %v2032_v50, %v5329_v39  ;;  %v1224_v54 = vshrl.u32 %v5471_v36, 16 }
 0x160   : > { %636 = vrot.lane.b32.xlu0 %v607_v57, %s5249_s30  ;;  %v1966_v57 = vcombine.low %v1934_v34, %v1949_v31  ;;  %v1225_v36 = vpack.i.b16 %v1224_v54, %v1223_v61  ;;  %v2050_v25 = vcombine.high %v2040_v52, %v8039_v13 }
 0x162   : > { %666 = vrot.lane.b32.xlu1 %v564_v62, %s5245_s26  ;;  %v2048_v62 = vcombine.high %v2024_v43, %v8039_v13  ;;  %v5583_v7 = vrot.slane %v1966_v57, %v5329_v39  ;;  %v1315_v12 = vrot.slane %v1225_v36, %v5323_v23  ;;  %v1308_v21 = vcombine.high %v1225_v36, %v5475_v38 }
 0x164   : > { %648 = vrot.lane.b32.xlu0 %v5515_v6, %s5243_s24  ;;  %v1984_v24 = vcombine.high %v5583_v7, %v8039_v13  ;;  %v1323_v3 = vcombine.low %v1300_v15, %v1315_v12  ;;  %v1322_v31 = vrot.slane %v1308_v21, %v5323_v23  ;;  %v1324_v41 = vcombine.high %v1300_v15, %v1315_v12 }
 0x166   : > { %651 = vrot.lane.b32.xlu1 %v566_v10, %s5246_s27  ;;  %v1258_v10 = vcombine.high %v1234_v9, %v1249_v8  ;;  %v1331_v22 = vrot.slane %v1323_v3, %v5329_v39  ;;  %v5632_v44 = vrot.slane %v1324_v41, %v5329_v39  ;;  %v1340_v58 = vcombine.high %v1307_v35, %v1322_v31 }
 0x168   : > { %2062 = vrot.lane.b32.xlu0 %v1965_v16, %s5245_s26  ;;  %v1242_v16 = vcombine.high %v1221_v53, %v5475_v38  ;;  %v5599_v17 = vrot.slane %v1258_v10, %v5329_v39  ;;  %v1355_v34 = vcombine.high %v1331_v22, %v8039_v13 }
 0x16a   : > { %660 = vrot.lane.b32.xlu1 %v567_v19, %s5247_s28  ;;  %v2049_v19 = vcombine.high %v2031_v51, %v8039_v13 }
 0x16c   : > { %657 = vrot.lane.b32.xlu0 %v623_v60, %s5249_s30  ;;  %v1256_v60 = vrot.slane %v1242_v16, %v5323_v23 }
 0x16e   : > { %669 = vrot.lane.b32.xlu1 %v630_v56, %s5243_s24  ;;  %v5613_v56 = vrot.slane %v1257_v20, %v5329_v39  ;;  %v1274_v30 = vcombine.high %v1241_v26, %v1256_v60 }
 0x170   : > { %642 = vrot.lane.b32.xlu0 %v631_v27, %s5248_s29  ;;  %8065 = vst [vmem:[#allocation7_spill] sm:$0xff] %v5613_v56  ;;  %v2051_v27 = vcombine.high %v2047_v33, %v8039_v13  ;;  %v1288_v37 = vrot.slane %v1274_v30, %v5329_v39 }
 0x172   : > { %672 = vrot.lane.b32.xlu1 %v568_v32, %s5246_s27  ;;  %v1289_v32 = vcombine.high %v5613_v56, %v8039_v13  ;;  %v1292_v42 = vcombine.high %v1288_v37, %v8039_v13 }
 0x174   : > { %2056 = vrot.lane.b32.xlu0 %v1982_v40, %s5247_s28  ;;  %v1339_v40 = vcombine.low %v1307_v35, %v1322_v31 }
 0x176   : > { %2053 = vrot.lane.b32.xlu1 %v2024_v43, %s5249_s30  ;;  %v1347_v43 = vrot.slane %v1339_v40, %v5329_v39 }
 0x178   : > { %2083 = vrot.lane.b32.xlu0 %v1981_v45, %s5245_s26  ;;  %v1273_v45 = vcombine.low %v1241_v26, %v1256_v60  ;;  %v1357_v48 = vcombine.high %v1347_v43, %v8039_v13 }
 0x17a   : > { %2068 = vrot.lane.b32.xlu1 %v1983_v49, %s5246_s27  ;;  %v5639_v50 = vrot.slane %v1273_v45, %v5329_v39 }
 0x17c   : > { %2065 = vrot.lane.b32.xlu0 %v2031_v51, %s5243_s24  ;;  %8066 = vst [vmem:[#allocation8_spill] sm:$0xff] %v5639_v50  ;;  %v1291_v57 = vcombine.high %v5639_v50, %v8039_v13 }
 0x17e   : > { %2074 = vrot.lane.b32.xlu1 %v2040_v52, %s5249_s30 }
 0x180   : > { %663 = vrot.lane.b32.xlu0 %v633_v55, %s5248_s29 }
 0x182   : > { %2059 = vrot.lane.b32.xlu1 %v2048_v62, %s5248_s29 }
 0x184   : > { %675 = vrot.lane.b32.xlu0 %v634_v5, %s5244_s25 }
 0x186   : > { %2086 = vrot.lane.b32.xlu1 %v2047_v33, %s5243_s24  ;;  %v5652_v33 = vrot.slane %v1340_v58, %v5329_v39 }
 0x188   : > { %2077 = vrot.lane.b32.xlu0 %v1984_v24, %s5247_s28 }
 0x18a   : > { %2089 = vrot.lane.b32.xlu1 %v1985_v14, %s5246_s27 }
 0x18c   : > { %1369 = vrot.lane.b32.xlu0 %v5599_v17, %s5245_s26 }
 0x18e   : > { %2071 = vrot.lane.b32.xlu1 %v2049_v19, %s5244_s25 }
 0x190   : > { %1360 = vrot.lane.b32.xlu0 %v1331_v22, %s5249_s30 }
 0x192   : > { %2080 = vrot.lane.b32.xlu1 %v2050_v25, %s5248_s29 }
 0x194   : > { %2092 = vrot.lane.b32.xlu0 %v2051_v27, %s5244_s25 }
 0x196   : > { %1363 = vrot.lane.b32.xlu1 %v1289_v32, %s5247_s28 }
 0x198   : > { %1366 = vrot.lane.b32.xlu0 %v1355_v34, %s5248_s29 }
 0x19a   : > { %1390 = vrot.lane.b32.xlu1 %v1288_v37, %s5245_s26 }
 0x19c   : > { %1396 = vrot.lane.b32.xlu0 %v1292_v42, %s5246_s27 }
 0x19e   : > { %1372 = vrot.lane.b32.xlu1 %v5632_v44, %s5243_s24  ;;  %v719_v47 = vpop.permute.xlu0 %718 }
 0x19f   : > { %v730_v53 = vshrl.u32 %v719_v47, 16 }
 0x1a0   : > { %v721_v49 = vpop.permute.xlu1 %720  ;;  %1387 = vrot.lane.b32.xlu0 %v1357_v48, %s5248_s29 }
 0x1a1   : > { %v731_v51 = vshrl.u32 %v721_v49, 16  ;;  %v728_v54 = vpack.i.b16 %v721_v49, %v719_v47 }
 0x1a2   : > { %1381 = vrot.lane.b32.xlu1 %v1347_v43, %s5249_s30  ;;  %v723_v52 = vpop.permute.xlu0 %722 }
 0x1a3   : > { %v5644_v61 = vpack.i.b16 %v731_v51, %v730_v53  ;;  %v738_v62 = vshrl.u32 %v723_v52, 16  ;;  %v749_v5 = vrot.slane %v728_v54, %v5323_v23  ;;  %v742_v40 = vcombine.high %v728_v54, %v5475_v38 }
 0x1a4   : > { %v725_v55 = vpop.permute.xlu1 %724 }
 0x1a5   : > { %v736_v59 = vpack.i.b16 %v725_v55, %v723_v52  ;;  %v739_v0 = vshrl.u32 %v725_v55, 16  ;;  %v5656_v9 = vrot.slane %v5644_v61, %v5323_v23 }
 0x1a6   : > { %1384 = vrot.lane.b32.xlu1 %v1291_v57, %s5247_s28  ;;  %v947_v4 = vpop.permute.xlu0 %946  ;;  %v5710_v57 = vrot.slane %v742_v40, %v5323_v23 }
 0x1a7   : > { %v764_v36 = vrot.slane %v736_v59, %v5323_v23  ;;  %v5649_v8 = vpack.i.b16 %v739_v0, %v738_v62  ;;  %v958_v20 = vshrl.u32 %v947_v4, 16  ;;  %v757_v25 = vcombine.high %v736_v59, %v5475_v38 }
 0x1a8   : > { %v949_v29 = vpop.permute.xlu1 %948 }
 0x1a9   : > { %v5660_v24 = vrot.slane %v5649_v8, %v5323_v23  ;;  %v773_v12 = vcombine.high %v749_v5, %v764_v36  ;;  %v956_v14 = vpack.i.b16 %v949_v29, %v947_v4  ;;  %v959_v15 = vshrl.u32 %v949_v29, 16 }
 0x1aa   : > { %1393 = vrot.lane.b32.xlu1 %v5652_v33, %s5243_s24  ;;  %v951_v10 = vpop.permute.xlu0 %950  ;;  %v772_v16 = vcombine.low %v749_v5, %v764_v36  ;;  %v5695_v48 = vrot.slane %v757_v25, %v5323_v23 }
 0x1ab   : > { %v5665_v18 = vrot.slane %v773_v12, %v5329_v39  ;;  %v838_v19 = vcombine.low %v5656_v9, %v5660_v24  ;;  %v966_v22 = vshrl.u32 %v951_v10, 16  ;;  %v960_v26 = vpack.i.b16 %v959_v15, %v958_v20 }
 0x1ac   : > { %v953_v3 = vpop.permute.xlu1 %952  ;;  %v977_v27 = vrot.slane %v956_v14, %v5323_v23  ;;  %v5683_v37 = vrot.slane %v772_v16, %v5329_v39  ;;  %v970_v42 = vcombine.high %v956_v14, %v5475_v38  ;;  %v789_v0 = vcombine.high %v5710_v57, %v5695_v48 }
 0x1ad   : > { %v964_v21 = vpack.i.b16 %v953_v3, %v951_v10  ;;  %v967_v60 = vshrl.u32 %v953_v3, 16  ;;  %v5680_v34 = vrot.slane %v838_v19, %v5329_v39  ;;  %v1043_v49 = vrot.slane %v960_v26, %v5323_v23 }
 0x1ae   : > { %884 = vrot.lane.b32.xlu1 %v5665_v18, %s5245_s26  ;;  %v5671_v63 = vpop.permute.xlu0 %2352  ;;  %8067 = vst [vmem:[#allocation9_spill] sm:$0xff] %v5683_v37  ;;  %v804_v54 = vcombine.high %v5683_v37, %v8039_v13  ;;  %v5713_v58 = vrot.slane %v970_v42, %v5323_v23  ;;  %v803_v20 = vrot.slane %v789_v0, %v5329_v39 }
 0x1af   : > { %v992_v30 = vrot.slane %v964_v21, %v5323_v23  ;;  %v968_v31 = vpack.i.b16 %v967_v60, %v966_v22  ;;  %v985_v32 = vcombine.high %v964_v21, %v5475_v38  ;;  %v839_v21 = vcombine.high %v5656_v9, %v5660_v24 }
 0x1b0   : > { %v5677_v35 = vpop.permute.xlu1 %2354  ;;  %v1036_v22 = vcombine.high %v960_v26, %v5475_v38  ;;  %v823_v42 = vcombine.high %v5649_v8, %v5475_v38 }
 0x1b1   : > { %v1000_v41 = vcombine.low %v977_v27, %v992_v30  ;;  %v5688_v43 = vrot.slane %v968_v31, %v5323_v23  ;;  %v1001_v47 = vcombine.high %v977_v27, %v992_v30  ;;  %v5699_v51 = vrot.slane %v985_v32, %v5323_v23 }
 0x1b2   : > { %875 = vrot.lane.b32.xlu1 %v5680_v34, %s5249_s30  ;;  %v5692_v45 = vpop.permute.xlu0 %2356  ;;  %v5735_v12 = vpack.i.b16 %v5677_v35, %v5671_v63  ;;  %v1051_v15 = vcombine.high %v968_v31, %v5475_v38  ;;  %v5774_v26 = vrot.slane %v839_v21, %v5329_v39  ;;  %v1050_v32 = vrot.slane %v1036_v22, %v5323_v23 }
 0x1b3   : > { %v1015_v53 = vrot.slane %v1001_v47, %v5329_v39  ;;  %v5707_v55 = vrot.slane %v1000_v41, %v5329_v39  ;;  %v1066_v62 = vcombine.low %v1043_v49, %v5688_v43  ;;  %v1017_v10 = vcombine.high %v5713_v58, %v5699_v51 }
 0x1b4   : > { %v5701_v52 = vpop.permute.xlu1 %2358  ;;  %v5757_v60 = vrot.slane %v5735_v12, %v5323_v23  ;;  %v1065_v27 = vrot.slane %v1051_v15, %v5323_v23  ;;  %v805_v47 = vcombine.high %v5665_v18, %v8039_v13  ;;  %v1067_v0 = vcombine.high %v1043_v49, %v5688_v43 }
 0x1b5   : > { %8068 = vst [vmem:[#allocation10_spill] sm:$0xff] %v5707_v55  ;;  %1112 = vrot.lane.b32.xlu0 %v1015_v53, %s5245_s26  ;;  %v5724_v4 = vpack.i.b16 %v5701_v52, %v5692_v45  ;;  %v1032_v5 = vcombine.high %v5707_v55, %v8039_v13  ;;  %v1074_v29 = vrot.slane %v1066_v62, %v5329_v39  ;;  %v2372_v56 = vshrl.u32 %v5692_v45, 16 }
 0x1b6   : > { %878 = vrot.lane.b32.xlu1 %v804_v54, %s5247_s28  ;;  %v5717_v59 = vpop.permute.xlu0 %2124  ;;  %v5749_v19 = vrot.slane %v1017_v10, %v5329_v39  ;;  %v1033_v31 = vcombine.high %v1015_v53, %v8039_v13  ;;  %v808_v10 = vcombine.high %v5644_v61, %v5475_v38  ;;  %v1081_v21 = vrot.slane %v1067_v0, %v5329_v39 }
 0x1b7   : > { %v5744_v16 = vrot.slane %v5724_v4, %v5323_v23  ;;  %v5818_v61 = vrot.slane %v823_v42, %v5323_v23  ;;  %v1083_v1 = vcombine.high %v1050_v32, %v1065_v27  ;;  %v870_v45 = vcombine.high %v5680_v34, %v8039_v13 }
 0x1b8   : > { %v5726_v36 = vpop.permute.xlu1 %2126 }
 0x1b9   : > { %1106 = vrot.lane.b32.xlu0 %v1032_v5, %s5247_s28  ;;  %v2407_v30 = vcombine.high %v5757_v60, %v5744_v16  ;;  %v5780_v40 = vpack.i.b16 %v5726_v36, %v5717_v59  ;;  %v1082_v5 = vcombine.low %v1050_v32, %v1065_v27  ;;  %v2373_v32 = vshrl.u32 %v5701_v52, 16 }
 0x1ba   : > { %1103 = vrot.lane.b32.xlu1 %v1074_v29, %s5249_s30  ;;  %v5739_v14 = vpop.permute.xlu0 %2128  ;;  %v2364_v52 = vshrl.u32 %v5671_v63, 16 }
 0x1bb   : > { %v5798_v62 = vrot.slane %v2407_v30, %v5329_v39  ;;  %v2155_v8 = vrot.slane %v5780_v40, %v5323_v23  ;;  %v5814_v43 = vrot.slane %v1082_v5, %v5329_v39  ;;  %v822_v30 = vrot.slane %v808_v10, %v5323_v23 }
 0x1bc   : > { %v5746_v3 = vpop.permute.xlu1 %2130  ;;  %v807_v10 = vcombine.high %v803_v20, %v8039_v13 }
 0x1bd   : > { %1133 = vrot.lane.b32.xlu0 %v5749_v19, %s5245_s26  ;;  %v5769_v9 = vpack.i.b16 %v5746_v3, %v5739_v14  ;;  %v854_v42 = vcombine.low %v822_v30, %v5818_v61 }
 0x1be   : > { %905 = vrot.lane.b32.xlu1 %v803_v20, %s5245_s26  ;;  %v5762_v25 = vpop.permute.xlu0 %1659 }
 0x1bf   : > { %v5793_v53 = vrot.slane %v5769_v9, %v5323_v23 }
 0x1c0   : > { %v5771_v24 = vpop.permute.xlu1 %1661 }
 0x1c1   : > { %887 = vrot.lane.b32.xlu0 %v5774_v26, %s5243_s24  ;;  %v2179_v49 = vcombine.high %v2155_v8, %v5793_v53 }
 0x1c2   : > { %1118 = vrot.lane.b32.xlu1 %v1033_v31, %s5246_s27  ;;  %v5785_v41 = vpop.permute.xlu0 %1663  ;;  %v788_v31 = vcombine.low %v5710_v57, %v5695_v48  ;;  %v1016_v48 = vcombine.low %v5713_v58, %v5699_v51  ;;  %v5861_v58 = vrot.slane %v1083_v1, %v5329_v39  ;;  %v2178_v1 = vcombine.low %v2155_v8, %v5793_v53 }
 0x1c3   : > { %v5832_v5 = vrot.slane %v2179_v49, %v5329_v39  ;;  %v2148_v53 = vcombine.high %v5780_v40, %v5475_v38  ;;  %v2374_v8 = vpack.i.b16 %v2373_v32, %v2372_v56  ;;  %v855_v40 = vcombine.high %v822_v30, %v5818_v61 }
 0x1c4   : > { %v5795_v54 = vpop.permute.xlu1 %1665  ;;  %v5849_v49 = vrot.slane %v788_v31, %v5329_v39  ;;  %v2145_v31 = vshrl.u32 %v5746_v3, 16  ;;  %v2365_v3 = vshrl.u32 %v5677_v35, 16 }
 0x1c5   : > { %890 = vrot.lane.b32.xlu0 %v805_v47, %s5246_s27  ;;  %v1098_v47 = vcombine.high %v1074_v29, %v8039_v13  ;;  %v5846_v29 = vrot.slane %v854_v42, %v5329_v39  ;;  %v5864_v42 = vrot.slane %v1016_v48, %v5329_v39  ;;  %v1035_v48 = vcombine.high %v5749_v19, %v8039_v13 }
 0x1c6   : > { %2518 = vrot.lane.b32.xlu1 %v5798_v62, %s5245_s26  ;;  %v5808_v18 = vpop.permute.xlu0 %1431  ;;  %8071 = vst [vmem:[#allocation13_spill] sm:$0xff] %v5849_v49  ;;  %v806_v51 = vcombine.high %v5849_v49, %v8039_v13  ;;  %v5907_v34 = vrot.slane %v2148_v53, %v5323_v23  ;;  %v869_v30 = vrot.slane %v855_v40, %v5329_v39 }
 0x1c7   : > { %8072 = vst [vmem:[#allocation14_spill] sm:$0xff] %v5864_v42 }
 0x1c8   : > { %v5810_v15 = vpop.permute.xlu1 %1433 }
 0x1c9   : > { %1115 = vrot.lane.b32.xlu0 %v1081_v21, %s5243_s24 }
 0x1ca   : > { %1124 = vrot.lane.b32.xlu1 %v5814_v43, %s5249_s30  ;;  %v5823_v22 = vpop.permute.xlu0 %1435 }
 0x1cc   : > { %v5829_v0 = vpop.permute.xlu1 %1437 }
 0x1cd   : > { %2290 = vrot.lane.b32.xlu0 %v5832_v5, %s5245_s26 }
 0x1ce   : > { %1109 = vrot.lane.b32.xlu1 %v1098_v47, %s5248_s29  ;;  %v5838_v2 = vpop.permute.xlu0 %645 }
 0x1cf   : > { %8069 = vst [vmem:[#allocation11_spill] sm:$0xff] %v5838_v2 }
 0x1d0   : > { %v5843_v57 = vpop.permute.xlu1 %639 }
 0x1d1   : > { %8070 = vst [vmem:[#allocation12_spill] sm:$0xff] %v5843_v57  ;;  %896 = vrot.lane.b32.xlu0 %v5846_v29, %s5249_s30 }
 0x1d2   : > { %911 = vrot.lane.b32.xlu1 %v807_v10, %s5246_s27  ;;  %v5854_v47 = vpop.permute.xlu0 %636  ;;  %v2163_v10 = vcombine.high %v5769_v9, %v5475_v38  ;;  %v2137_v9 = vshrl.u32 %v5726_v36, 16  ;;  %v1099_v36 = vcombine.high %v1081_v21, %v8039_v13 }
 0x1d4   : > { %v5856_v20 = vpop.permute.xlu1 %666  ;;  %v5897_v35 = vrot.slane %v2163_v10, %v5323_v23 }
 0x1d5   : > { %899 = vrot.lane.b32.xlu0 %v806_v51, %s5247_s28  ;;  %v1034_v51 = vcombine.high %v5864_v42, %v8039_v13 }
 0x1d6   : > { %1136 = vrot.lane.b32.xlu1 %v5861_v58, %s5243_s24  ;;  %v5869_v27 = vpop.permute.xlu0 %648  ;;  %v2195_v32 = vcombine.high %v5907_v34, %v5897_v35 }
 0x1d7   : > { %8073 = vst [vmem:[#allocation15_spill] sm:$0xff] %v5869_v27  ;;  %v2144_v27 = vshrl.u32 %v5739_v14, 16  ;;  %v2136_v14 = vshrl.u32 %v5717_v59, 16  ;;  %v5914_v59 = vrot.slane %v2374_v8, %v5323_v23 }
 0x1d8   : > { %v5878_v37 = vpop.permute.xlu1 %651  ;;  %v5937_v53 = vrot.slane %v2195_v32, %v5329_v39 }
 0x1d9   : > { %8074 = vst [vmem:[#allocation16_spill] sm:$0xff] %v5878_v37  ;;  %1127 = vrot.lane.b32.xlu0 %v1034_v51, %s5247_s28  ;;  %v2146_v63 = vpack.i.b16 %v2145_v31, %v2144_v27  ;;  %v2366_v51 = vpack.i.b16 %v2365_v3, %v2364_v52  ;;  %v2138_v42 = vpack.i.b16 %v2137_v9, %v2136_v14 }
 0x1da   : > { %1139 = vrot.lane.b32.xlu1 %v1035_v48, %s5246_s27  ;;  %v5891_v19 = vpop.permute.xlu0 %2062  ;;  %v5904_v48 = vrot.slane %v2178_v1, %v5329_v39  ;;  %v2406_v52 = vcombine.low %v5757_v60, %v5744_v16  ;;  %v871_v3 = vcombine.high %v5774_v26, %v8039_v13  ;;  %v2391_v16 = vcombine.high %v5724_v4, %v5475_v38 }
 0x1db   : > { %v2236_v21 = vrot.slane %v2146_v63, %v5323_v23  ;;  %v2449_v31 = vrot.slane %v2366_v51, %v5323_v23  ;;  %v2221_v10 = vrot.slane %v2138_v42, %v5323_v23  ;;  %v2457_v60 = vcombine.high %v2374_v8, %v5475_v38 }
 0x1dc   : > { %v5900_v37 = vpop.permute.xlu1 %660  ;;  %8075 = vst [vmem:[#allocation17_spill] sm:$0xff] %v5904_v48  ;;  %v2210_v27 = vcombine.high %v5904_v48, %v8039_v13  ;;  %v5957_v32 = vrot.slane %v2406_v52, %v5329_v39  ;;  %v2442_v13 = vcombine.high %v2366_v51, %v5475_v38  ;;  %v2405_v8 = vrot.slane %v2391_v16, %v5323_v23 }
 0x1dd   : > { %881 = vrot.lane.b32.xlu0 %v870_v45, %s5248_s29  ;;  %v2472_v45 = vcombine.low %v2449_v31, %v5914_v59  ;;  %v2245_v14 = vcombine.high %v2221_v10, %v2236_v21  ;;  %v5971_v52 = vrot.slane %v2457_v60, %v5323_v23  ;;  %v2244_v55 = vcombine.low %v2221_v10, %v2236_v21 }
 0x1de   : > { %1121 = vrot.lane.b32.xlu1 %v1099_v36, %s5244_s25  ;;  %v5911_v56 = vpop.permute.xlu0 %657  ;;  %v2456_v49 = vrot.slane %v2442_v13, %v5323_v23  ;;  %v2214_v16 = vcombine.high %v2138_v42, %v5475_v38 }
 0x1df   : > { %v5951_v40 = vrot.slane %v2472_v45, %v5329_v39  ;;  %v2229_v45 = vcombine.high %v2146_v63, %v5475_v38 }
 0x1e0   : > { %v5917_v61 = vpop.permute.xlu1 %669  ;;  %v2488_v13 = vcombine.low %v2456_v49, %v5971_v52  ;;  %v2228_v42 = vrot.slane %v2214_v16, %v5323_v23 }
 0x1e1   : > { %908 = vrot.lane.b32.xlu0 %v869_v30, %s5243_s24  ;;  %v5987_v60 = vrot.slane %v2229_v45, %v5323_v23 }
 0x1e2   : > { %2284 = vrot.lane.b32.xlu1 %v2210_v27, %s5247_s28  ;;  %v5928_v1 = vpop.permute.xlu0 %642  ;;  %v5954_v27 = vrot.slane %v2245_v14, %v5329_v39 }
 0x1e3   : > { %8076 = vst [vmem:[#allocation18_spill] sm:$0xff] %v5928_v1  ;;  %v2260_v16 = vcombine.low %v2228_v42, %v5987_v60 }
 0x1e4   : > { %v5934_v9 = vpop.permute.xlu1 %672 }
 0x1e5   : > { %8077 = vst [vmem:[#allocation19_spill] sm:$0xff] %v5934_v9  ;;  %893 = vrot.lane.b32.xlu0 %v871_v3, %s5244_s25  ;;  %v2376_v3 = vcombine.high %v5735_v12, %v5475_v38  ;;  %v8079_v12 = vmov 0  }
 0x1e6   : > { %2311 = vrot.lane.b32.xlu1 %v5937_v53, %s5245_s26  ;;  %v5943_v36 = vpop.permute.xlu0 %2056  ;;  %v2438_v51 = vcombine.high %v5957_v32, %v8079_v12  ;;  %v1100_v48 = vcombine.high %v5814_v43, %v8079_v12  ;;  %v5992_v43 = vrot.slane %v2244_v55, %v5329_v39  ;;  %v873_v21 = vcombine.high %v869_v30, %v8079_v12 }
 0x1e7   : > { %v2390_v2 = vrot.slane %v2376_v3, %v5323_v23  ;;  %v6008_v30 = vrot.slane %v2488_v13, %v5329_v39  ;;  %v6035_v13 = vpack.i.b16 %v5771_v24, %v5762_v25 }
 0x1e8   : > { %v5948_v26 = vpop.permute.xlu1 %2053 }
 0x1e9   : > { %2509 = vrot.lane.b32.xlu0 %v5951_v40, %s5249_s30  ;;  %v2423_v10 = vcombine.high %v2390_v2, %v2405_v8  ;;  %v6058_v9 = vrot.slane %v6035_v13, %v5323_v23 }
 0x1ea   : > { %2293 = vrot.lane.b32.xlu1 %v5954_v27, %s5243_s24  ;;  %v5966_v4 = vpop.permute.xlu0 %2083 }
 0x1eb   : > { %v6005_v55 = vrot.slane %v2423_v10, %v5329_v39 }
 0x1ec   : > { %v5973_v14 = vpop.permute.xlu1 %2068 }
 0x1ed   : > { %8078 = vst [vmem:[#allocation20_spill] sm:$0xff] %v5973_v14  ;;  %2512 = vrot.lane.b32.xlu0 %v2438_v51, %s5247_s28  ;;  %v2473_v51 = vcombine.high %v2449_v31, %v5914_v59  ;;  %v6028_v59 = vrot.slane %v2260_v16, %v5329_v39 }
 0x1ee   : > { %1130 = vrot.lane.b32.xlu1 %v1100_v48, %s5248_s29  ;;  %v5984_v63 = vpop.permute.xlu0 %2065  ;;  %v2422_v48 = vcombine.low %v2390_v2, %v2405_v8  ;;  %v2194_v2 = vcombine.low %v5907_v34, %v5897_v35  ;;  %v6020_v8 = vpack.i.b16 %v5795_v54, %v5785_v41 }
 0x1ef   : > { %v6025_v10 = vrot.slane %v2473_v51, %v5329_v39 }
 0x1f0   : > { %v5989_v14 = vpop.permute.xlu1 %2074  ;;  %v6031_v31 = vrot.slane %v2422_v48, %v5329_v39  ;;  %v6045_v34 = vrot.slane %v6020_v8, %v5323_v23  ;;  %v2439_v48 = vcombine.high %v5798_v62, %v8079_v12  ;;  %v2211_v62 = vcombine.high %v5832_v5, %v8079_v12 }
 0x1f1   : > { %2281 = vrot.lane.b32.xlu0 %v5992_v43, %s5249_s30  ;;  %v2489_v5 = vcombine.high %v2456_v49, %v5971_v52  ;;  %v2261_v49 = vcombine.high %v2228_v42, %v5987_v60  ;;  %v6101_v52 = vpack.i.b16 %v5810_v15, %v5808_v18  ;;  %v2504_v42 = vcombine.high %v5951_v40, %v8079_v12 }
 0x1f2   : > { %914 = vrot.lane.b32.xlu1 %v873_v21, %s5244_s25  ;;  %v6000_v3 = vpop.permute.xlu0 %663  ;;  %v2440_v16 = vcombine.high %v6031_v31, %v8079_v12  ;;  %v1671_v40 = vshrl.u32 %v5762_v25, 16 }
 0x1f4   : > { %v6002_v45 = vpop.permute.xlu1 %2059 }
 0x1f5   : > { %2539 = vrot.lane.b32.xlu0 %v6005_v55, %s5245_s26 }
 0x1f6   : > { %2530 = vrot.lane.b32.xlu1 %v6008_v30, %s5249_s30  ;;  %v6037_v35 = vpop.permute.xlu0 %675 }
 0x1f7   : > { %8081 = vst [vmem:[#allocation22_spill] sm:$0xff] %v6037_v35  ;;  %v6054_v35 = vrot.slane %v2194_v2, %v5329_v39 }
 0x1f8   : > { %v6022_v21 = vpop.permute.xlu1 %2086 }
 0x1f9   : > { %8080 = vst [vmem:[#allocation21_spill] sm:$0xff] %v6022_v21  ;;  %2521 = vrot.lane.b32.xlu0 %v6025_v10, %s5243_s24  ;;  %8083 = vst [vmem:[#allocation24_spill] sm:$0xff] %v6054_v35  ;;  %v2212_v2 = vcombine.high %v6054_v35, %v8079_v12  ;;  %v1679_v35 = vshrl.u32 %v5785_v41, 16  ;;  %v1443_v41 = vshrl.u32 %v5808_v18, 16 }
 0x1fa   : > { %2302 = vrot.lane.b32.xlu1 %v6028_v59, %s5249_s30  ;;  %v6066_v1 = vpop.permute.xlu0 %2077 }
 0x1fc   : > { %v6047_v51 = vpop.permute.xlu1 %2089 }
 0x1fd   : > { %8082 = vst [vmem:[#allocation23_spill] sm:$0xff] %v6047_v51  ;;  %2524 = vrot.lane.b32.xlu0 %v2439_v48, %s5246_s27  ;;  %v1714_v51 = vcombine.high %v6058_v9, %v6045_v34  ;;  %v872_v48 = vcombine.high %v5846_v29, %v8079_v12  ;;  %v1101_v29 = vcombine.high %v5861_v58, %v8079_v12 }
 0x1fe   : > { %2533 = vrot.lane.b32.xlu1 %v2440_v16, %s5247_s28  ;;  %v6082_v50 = vpop.permute.xlu0 %1369 }
 0x1ff   : > { %v6079_v57 = vrot.slane %v1714_v51, %v5329_v39  ;;  %8085 = vst [vmem:[#allocation26_spill] sm:$0xff] %v6082_v50  ;;  %v6096_v51 = vrot.slane %v2489_v5, %v5329_v39  ;;  %v1452_v50 = vshrl.u32 %v5829_v0, 16 }
 0x200   : > { %v6068_v21 = vpop.permute.xlu1 %2071 }
 0x201   : > { %8084 = vst [vmem:[#allocation25_spill] sm:$0xff] %v6068_v21  ;;  %2296 = vrot.lane.b32.xlu0 %v2211_v62, %s5246_s27  ;;  %v6089_v62 = vpack.i.b16 %v5829_v0, %v5823_v22  ;;  %v1444_v0 = vshrl.u32 %v5810_v15, 16 }
 0x202   : > { %2305 = vrot.lane.b32.xlu1 %v2212_v2, %s5247_s28  ;;  %v6112_v5 = vpop.permute.xlu0 %1360 }
 0x203   : > { %v6110_v58 = vrot.slane %v6089_v62, %v5323_v23  ;;  %8087 = vst [vmem:[#allocation28_spill] sm:$0xff] %v6112_v5  ;;  %v1451_v5 = vshrl.u32 %v5823_v22, 16  ;;  %v2276_v22 = vcombine.high %v5992_v43, %v8079_v12  ;;  %v6148_v25 = vpack.i.b16 %v1444_v0, %v1443_v41 }
 0x204   : > { %v6076_v16 = vpop.permute.xlu1 %2080  ;;  %v1698_v0 = vcombine.high %v6020_v8, %v5475_v38 }
 0x205   : > { %902 = vrot.lane.b32.xlu0 %v872_v48, %s5248_s29  ;;  %v1680_v48 = vshrl.u32 %v5795_v54, 16  ;;  %v1672_v54 = vshrl.u32 %v5771_v24, 16  ;;  %v6136_v24 = vpack.i.b16 %v1452_v50, %v1451_v5 }
 0x206   : > { %1825 = vrot.lane.b32.xlu1 %v6079_v57, %s5245_s26 }
 0x207   : > { %v6146_v21 = vpack.i.b16 %v1672_v54, %v1671_v40  ;;  %v1543_v18 = vrot.slane %v6136_v24, %v5323_v23  ;;  %v1528_v54 = vrot.slane %v6148_v25, %v5323_v23  ;;  %v1713_v40 = vcombine.low %v6058_v9, %v6045_v34 }
 0x208   : > { %v6091_v2 = vpop.permute.xlu1 %1363  ;;  %v6189_v9 = vrot.slane %v1698_v0, %v5323_v23 }
 0x209   : > { %8086 = vst [vmem:[#allocation27_spill] sm:$0xff] %v6091_v2  ;;  %1142 = vrot.lane.b32.xlu0 %v1101_v29, %s5244_s25  ;;  %v6119_v29 = vrot.slane %v2261_v49, %v5329_v39  ;;  %v6126_v2 = vrot.slane %v6101_v52, %v5323_v23  ;;  %v6133_v49 = vpack.i.b16 %v1680_v48, %v1679_v35  ;;  %v6150_v35 = vpop.permute.xlu0 %2092 }
 0x20a   : > { %2542 = vrot.lane.b32.xlu1 %v6096_v51, %s5243_s24  ;;  %v2505_v48 = vcombine.high %v6025_v10, %v8079_v12  ;;  %v1756_v5 = vrot.slane %v6146_v21, %v5323_v23 }
 0x20b   : > { %v1486_v15 = vcombine.high %v6126_v2, %v6110_v58  ;;  %v1771_v50 = vrot.slane %v6133_v49, %v5323_v23 }
 0x20c   : > { %v6114_v60 = vpop.permute.xlu1 %1390 }
 0x20d   : > { %8088 = vst [vmem:[#allocation29_spill] sm:$0xff] %v6114_v60  ;;  %2515 = vrot.lane.b32.xlu0 %v2504_v42, %s5248_s29  ;;  %v2441_v42 = vcombine.high %v6005_v55, %v8079_v12  ;;  %v6161_v55 = vrot.slane %v1486_v15, %v5329_v39  ;;  %v6176_v41 = vpop.permute.xlu0 %1366  ;;  %v2213_v15 = vcombine.high %v5937_v53, %v8079_v12 }
 0x20e   : > { %2314 = vrot.lane.b32.xlu1 %v6119_v29, %s5243_s24  ;;  %8090 = vst [vmem:[#allocation31_spill] sm:$0xff] %v6176_v41 }
 0x210   : > { %v6140_v60 = vpop.permute.xlu1 %1372 }
 0x211   : > { %8089 = vst [vmem:[#allocation30_spill] sm:$0xff] %v6140_v60  ;;  %2287 = vrot.lane.b32.xlu0 %v2276_v22, %s5248_s29  ;;  %v2277_v22 = vcombine.high %v5954_v27, %v8079_v12  ;;  %v1779_v60 = vcombine.low %v1756_v5, %v1771_v50  ;;  %v6200_v27 = vrot.slane %v1713_v40, %v5329_v39  ;;  %v6203_v41 = vpop.permute.xlu0 %1396 }
 0x212   : > { %2545 = vrot.lane.b32.xlu1 %v2441_v42, %s5246_s27  ;;  %v1551_v42 = vcombine.low %v1528_v54, %v1543_v18  ;;  %8091 = vst [vmem:[#allocation32_spill] sm:$0xff] %v6203_v41  ;;  %v1780_v40 = vcombine.high %v1756_v5, %v1771_v50  ;;  %v1455_v5 = vcombine.high %v6101_v52, %v5475_v38 }
 0x213   : > { %v6197_v53 = vrot.slane %v1779_v60, %v5329_v39  ;;  %v1745_v60 = vcombine.high %v6200_v27, %v8079_v12  ;;  %v2506_v52 = vcombine.high %v6008_v30, %v8079_v12 }
 0x214   : > { %v6158_v43 = vpop.permute.xlu1 %1381  ;;  %v6194_v34 = vrot.slane %v1551_v42, %v5329_v39  ;;  %v1470_v42 = vcombine.high %v6089_v62, %v5475_v38  ;;  %v1764_v62 = vcombine.high %v6133_v49, %v5475_v38  ;;  %v1469_v49 = vrot.slane %v1455_v5, %v5323_v23 }
 0x215   : > { %1597 = vrot.lane.b32.xlu0 %v6161_v55, %s5245_s26  ;;  %v1536_v5 = vcombine.high %v6136_v24, %v5475_v38 }
 0x216   : > { %2527 = vrot.lane.b32.xlu1 %v2505_v48, %s5244_s25  ;;  %v1683_v48 = vcombine.high %v6035_v13, %v5475_v38 }
 0x217   : > { %v1550_v24 = vrot.slane %v1536_v5, %v5323_v23 }
 0x218   : > { %v6178_v10 = vpop.permute.xlu1 %1384  ;;  %v1697_v13 = vrot.slane %v1683_v48, %v5323_v23  ;;  %v1485_v48 = vcombine.low %v6126_v2, %v6110_v58  ;;  %v1484_v2 = vrot.slane %v1470_v42, %v5323_v23  ;;  %v1778_v42 = vrot.slane %v1764_v62, %v5323_v23 }
 0x219   : > { %2317 = vrot.lane.b32.xlu0 %v2213_v15, %s5246_s27  ;;  %v2278_v15 = vcombine.high %v6028_v59, %v8079_v12  ;;  %v6227_v59 = vrot.slane %v1780_v40, %v5329_v39  ;;  %v1552_v40 = vcombine.high %v1528_v54, %v1543_v18 }
 0x21a   : > { %2299 = vrot.lane.b32.xlu1 %v2277_v22, %s5244_s25  ;;  %v1730_v22 = vcombine.high %v1697_v13, %v6189_v9  ;;  %v1502_v54 = vcombine.high %v1469_v49, %v1484_v2 }
 0x21b   : > { %v6260_v30 = vrot.slane %v1552_v40, %v5329_v39 }
 0x21c   : > { %v6191_v8 = vpop.permute.xlu1 %1393  ;;  %v1744_v50 = vrot.slane %v1730_v22, %v5329_v39  ;;  %v6247_v22 = vrot.slane %v1485_v48, %v5329_v39  ;;  %v1729_v48 = vcombine.low %v1697_v13, %v6189_v9  ;;  %v1516_v40 = vrot.slane %v1502_v54, %v5329_v39 }
 0x21d   : > { %1588 = vrot.lane.b32.xlu0 %v6194_v34, %s5249_s30  ;;  %v1501_v9 = vcombine.low %v1469_v49, %v1484_v2 }
 0x21e   : > { %1816 = vrot.lane.b32.xlu1 %v6197_v53, %s5249_s30  ;;  %v1517_v18 = vcombine.high %v6247_v22, %v8079_v12  ;;  %v6291_v54 = vrot.slane %v1729_v48, %v5329_v39 }
 0x21f   : > { %v6305_v48 = vrot.slane %v1501_v9, %v5329_v39 }
 0x220   : > { %v6209_v0 = vpop.permute.xlu1 %884  ;;  %8099 = vst [vmem:[#allocation40_spill] sm:$0xff] %v6291_v54  ;;  %v1747_v5 = vcombine.high %v6291_v54, %v8079_v12 }
 0x221   : > { %8092 = vst [vmem:[#allocation33_spill] sm:$0xff] %v6209_v0  ;;  %2308 = vrot.lane.b32.xlu0 %v2278_v15, %s5248_s29  ;;  %v6222_v0 = vpop.permute.xlu0 %1387  ;;  %8101 = vst [vmem:[#allocation42_spill] sm:$0xff] %v6305_v48 }
 0x222   : > { %1819 = vrot.lane.b32.xlu1 %v1745_v60, %s5247_s28  ;;  %v1746_v60 = vcombine.high %v6079_v57, %v8079_v12 }
 0x224   : > { %v6224_v41 = vpop.permute.xlu1 %875 }
 0x225   : > { %8093 = vst [vmem:[#allocation34_spill] sm:$0xff] %v6224_v41  ;;  %1828 = vrot.lane.b32.xlu0 %v6227_v59, %s5243_s24  ;;  %v1749_v41 = vcombine.high %v6146_v21, %v5475_v38 }
 0x226   : > { %1846 = vrot.lane.b32.xlu1 %v1744_v50, %s5245_s26 }
 0x227   : > { %v6238_v58 = vpop.permute.xlu0 %1112  ;;  %v1763_v21 = vrot.slane %v1749_v41, %v5323_v23 }
 0x228   : > { %8094 = vst [vmem:[#allocation35_spill] sm:$0xff] %v6238_v58  ;;  %v6240_v15 = vpop.permute.xlu1 %878  ;;  %v1521_v58 = vcombine.high %v6148_v25, %v5475_v38  ;;  %v1519_v38 = vcombine.high %v6305_v48, %v8079_v12 }
 0x229   : > { %8095 = vst [vmem:[#allocation36_spill] sm:$0xff] %v6240_v15  ;;  %1831 = vrot.lane.b32.xlu0 %v1746_v60, %s5246_s27  ;;  %v1795_v41 = vcombine.low %v1763_v21, %v1778_v42 }
 0x22a   : > { %2536 = vrot.lane.b32.xlu1 %v2506_v52, %s5248_s29  ;;  %v2507_v52 = vcombine.high %v6096_v51, %v8079_v12  ;;  %v1518_v51 = vcombine.high %v6161_v55, %v8079_v12  ;;  %v1535_v25 = vrot.slane %v1521_v58, %v5323_v23  ;;  %v1796_v23 = vcombine.high %v1763_v21, %v1778_v42 }
 0x22b   : > { %v6255_v15 = vpop.permute.xlu0 %1106  ;;  %v1583_v42 = vcombine.high %v6194_v34, %v8079_v12  ;;  %v1520_v21 = vcombine.high %v1516_v40, %v8079_v12  ;;  %v1358_v34 = vcombine.high %v5652_v33, %v8079_v12 }
 0x22c   : > { %v6257_v57 = vpop.permute.xlu1 %1103  ;;  %v1567_v55 = vcombine.low %v1535_v25, %v1550_v24 }
 0x22d   : > { %1600 = vrot.lane.b32.xlu0 %v6260_v30, %s5243_s24 }
 0x22e   : > { %1591 = vrot.lane.b32.xlu1 %v1517_v18, %s5247_s28 }
 0x22f   : > { %v6271_v62 = vpop.permute.xlu0 %1133 }
 0x230   : > { %8096 = vst [vmem:[#allocation37_spill] sm:$0xff] %v6271_v62  ;;  %v6273_v60 = vpop.permute.xlu1 %905  ;;  %v1803_v62 = vrot.slane %v1795_v41, %v5329_v39 }
 0x231   : > { %2548 = vrot.lane.b32.xlu0 %v2507_v52, %s5244_s25  ;;  %v2279_v52 = vcombine.high %v6119_v29, %v8079_v12 }
 0x232   : > { %1618 = vrot.lane.b32.xlu1 %v1516_v40, %s5245_s26  ;;  %v1813_v33 = vcombine.high %v1803_v62, %v8079_v12 }
 0x233   : > { %v6283_v13 = vpop.permute.xlu0 %887 }
 0x234   : > { %8097 = vst [vmem:[#allocation38_spill] sm:$0xff] %v6283_v13  ;;  %v6285_v18 = vpop.permute.xlu1 %1118 }
 0x235   : > { %8098 = vst [vmem:[#allocation39_spill] sm:$0xff] %v6285_v18  ;;  %1837 = vrot.lane.b32.xlu0 %v1803_v62, %s5249_s30  ;;  %v1290_v62 = vcombine.high %v5599_v17, %v8079_v12 }
 0x236   : > { %1603 = vrot.lane.b32.xlu1 %v1518_v51, %s5246_s27  ;;  %v1575_v51 = vrot.slane %v1567_v55, %v5329_v39 }
 0x237   : > { %v6296_v2 = vpop.permute.xlu0 %890 }
 0x238   : > { %8100 = vst [vmem:[#allocation41_spill] sm:$0xff] %v6296_v2  ;;  %v6298_v49 = vpop.permute.xlu1 %2518  ;;  %v1568_v2 = vcombine.high %v1535_v25, %v1550_v24  ;;  %v1812_v25 = vcombine.high %v6227_v59, %v8079_v12  ;;  %v1356_v59 = vcombine.high %v5632_v44, %v8079_v12 }
 0x239   : > { %1840 = vrot.lane.b32.xlu0 %v1747_v5, %s5247_s28  ;;  %v1811_v5 = vcombine.high %v6197_v53, %v8079_v12 }
 0x23a   : > { %2320 = vrot.lane.b32.xlu1 %v2279_v52, %s5244_s25  ;;  %v1748_v52 = vcombine.high %v1744_v50, %v8079_v12  ;;  %v1582_v13 = vrot.slane %v1568_v2, %v5329_v39 }
 0x23b   : > { %v6309_v58 = vpop.permute.xlu0 %1115 }
 0x23c   : > { %8102 = vst [vmem:[#allocation43_spill] sm:$0xff] %v6309_v58  ;;  %v6311_v41 = vpop.permute.xlu1 %1124 }
 0x23d   : > { %1609 = vrot.lane.b32.xlu0 %v1575_v51, %s5249_s30 }
 0x23e   : > { %1612 = vrot.lane.b32.xlu1 %v1519_v38, %s5247_s28  ;;  %v1810_v38 = vrot.slane %v1796_v23, %v5329_v39 }
 0x23f   : > { %v6318_v29 = vpop.permute.xlu0 %2290 }
 0x240   : > { %8103 = vst [vmem:[#allocation44_spill] sm:$0xff] %v6318_v29  ;;  %v6320_v9 = vpop.permute.xlu1 %1109  ;;  %v1814_v2 = vcombine.high %v1810_v38, %v8079_v12 }
 0x241   : > { %1822 = vrot.lane.b32.xlu0 %v1811_v5, %s5248_s29 }
 0x242   : > { %1852 = vrot.lane.b32.xlu1 %v1748_v52, %s5246_s27  ;;  %v1584_v52 = vcombine.high %v6260_v30, %v8079_v12 }
 0x243   : > { %v6327_v55 = vpop.permute.xlu0 %896 }
 0x244   : > { %v6329_v18 = vpop.permute.xlu1 %911 }
 0x245   : > { %8104 = vst [vmem:[#allocation45_spill] sm:$0xff] %v6329_v18  ;;  %1849 = vrot.lane.b32.xlu0 %v1810_v38, %s5243_s24 }
 0x246   : > { %1621 = vrot.lane.b32.xlu1 %v1582_v13, %s5243_s24 }
 0x247   : > { %v6335_v53 = vpop.permute.xlu0 %899 }
 0x248   : > { %v6337_v50 = vpop.permute.xlu1 %1136 }
 0x249   : > { %8105 = vst [vmem:[#allocation46_spill] sm:$0xff] %v6337_v50  ;;  %1594 = vrot.lane.b32.xlu0 %v1583_v42, %s5248_s29 }
 0x24a   : > { %1624 = vrot.lane.b32.xlu1 %v1520_v21, %s5246_s27 }
 0x24b   : > { %v6344_v23 = vpop.permute.xlu0 %1127 }
 0x24c   : > { %v6346_v24 = vpop.permute.xlu1 %1139 }
 0x24d   : > { %8106 = vst [vmem:[#allocation47_spill] sm:$0xff] %v6346_v24  ;;  %1834 = vrot.lane.b32.xlu0 %v1812_v25, %s5244_s25  ;;  %v1585_v25 = vcombine.high %v1575_v51, %v8079_v12  ;;  %v632_v51 = vcombine.high %v5515_v6, %v8079_v12 }
 0x24e   : > { %1855 = vrot.lane.b32.xlu1 %v1814_v2, %s5244_s25 }
 0x24f   : > { %v6355_v40 = vpop.permute.xlu0 %881 }
 0x250   : > { %8107 = vst [vmem:[#allocation48_spill] sm:$0xff] %v6355_v40  ;;  %v6357_v5 = vpop.permute.xlu1 %1121 }
 0x251   : > { %8108 = vst [vmem:[#allocation49_spill] sm:$0xff] %v6357_v5  ;;  %1606 = vrot.lane.b32.xlu0 %v1584_v52, %s5244_s25 }
 0x252   : > { %1399 = vrot.lane.b32.xlu1 %v1358_v34, %s5244_s25  ;;  %v1586_v34 = vcombine.high %v1582_v13, %v8079_v12  ;;  %v2636_v13 = vld [vmem:[%s8029_s2] sm:$0xf] }
 0x253   : > { %v6365_v38 = vpop.permute.xlu0 %908 }
 0x254   : > { %8109 = vst [vmem:[#allocation50_spill] sm:$0xff] %v6365_v38  ;;  %v6367_v42 = vpop.permute.xlu1 %2284 }
 0x255   : > { %8110 = vst [vmem:[#allocation51_spill] sm:$0xff] %v6367_v42  ;;  %1843 = vrot.lane.b32.xlu0 %v1813_v33, %s5248_s29 }
 0x256   : > { %1378 = vrot.lane.b32.xlu1 %v1356_v59, %s5244_s25 }
 0x257   : > { %v6372_v21 = vpop.permute.xlu0 %893 }
 0x258   : > { %8111 = vst [vmem:[#allocation52_spill] sm:$0xff] %v6372_v21  ;;  %v6374_v30 = vpop.permute.xlu1 %2311 }
 0x259   : > { %8112 = vst [vmem:[#allocation53_spill] sm:$0xff] %v6374_v30  ;;  %1615 = vrot.lane.b32.xlu0 %v1585_v25, %s5248_s29 }
 0x25b   : > { %v2510_v2 = vpop.permute.xlu0 %2509 }
 0x25c   : > { %v6378_v44 = vpop.permute.xlu1 %2293 }
 0x25d   : > { %8113 = vst [vmem:[#allocation54_spill] sm:$0xff] %v6378_v44  ;;  %1627 = vrot.lane.b32.xlu0 %v1586_v34, %s5244_s25 }
 0x25f   : > { %v2513_v52 = vpop.permute.xlu0 %2512 }
 0x260   : > { %v6384_v59 = vpop.permute.xlu1 %1130 }
 0x261   : > { %1375 = vrot.lane.b32.xlu0 %v1290_v62, %s5246_s27 }
 0x263   : > { %v6389_v33 = vpop.permute.xlu0 %2281 }
 0x264   : > { %v6391_v25 = vpop.permute.xlu1 %914 }
 0x265   : > { %8114 = vst [vmem:[#allocation55_spill] sm:$0xff] %v6391_v25  ;;  %654 = vrot.lane.b32.xlu0 %v632_v51, %s5244_s25 }
 0x267   : > { %v2540_v34 = vpop.permute.xlu0 %2539 }
 0x268   : > { %v2531_v17 = vpop.permute.xlu1 %2530 }
 0x269   : > { %2639 = vperm.xlu0 %5232, %v2636_v13  }
 0x26b   : > { %v2522_v39 = vpop.permute.xlu0 %2521 }
 0x26c   : > { %v6397_v5 = vpop.permute.xlu1 %2302 }
 0x26f   : > { %v2525_v62 = vpop.permute.xlu0 %2524 }
 0x270   : > { %v2534_v21 = vpop.permute.xlu1 %2533 }
 0x273   : > { %v6399_v24 = vpop.permute.xlu0 %2296 }
 0x274   : > { %8115 = vst [vmem:[#allocation56_spill] sm:$0xff] %v6399_v24  ;;  %v6401_v6 = vpop.permute.xlu1 %2305 }
 0x275   : > { %8116 = vst [vmem:[#allocation57_spill] sm:$0xff] %v6401_v6 }
 0x277   : > { %v6403_v12 = vpop.permute.xlu0 %902 }
 0x278   : > { %v6405_v44 = vpop.permute.xlu1 %1825 }
 0x279   : > { %8117 = vst [vmem:[#allocation58_spill] sm:$0xff] %v6405_v44 }
 0x27b   : > { %v6407_v51 = vpop.permute.xlu0 %1142 }
 0x27c   : > { %8118 = vst [vmem:[#allocation59_spill] sm:$0xff] %v6407_v51  ;;  %v2543_v25 = vpop.permute.xlu1 %2542 }
 0x27f   : > { %v2516_v48 = vpop.permute.xlu0 %2515 }
 0x280   : > { %v6409_v50 = vpop.permute.xlu1 %2314 }
 0x281   : > { %8119 = vst [vmem:[#allocation60_spill] sm:$0xff] %v6409_v50  ;;  %v2552_v50 = vsel %vm677_vm7, %v5957_v32, %v2510_v2 }
 0x283   : > { %v6411_v13 = vpop.permute.xlu0 %2287 }
 0x284   : > { %8120 = vst [vmem:[#allocation61_spill] sm:$0xff] %v6411_v13  ;;  %v2546_v30 = vpop.permute.xlu1 %2545 }
 0x287   : > { %v6413_v29 = vpop.permute.xlu0 %1597 }
 0x288   : > { %8121 = vst [vmem:[#allocation62_spill] sm:$0xff] %v6413_v29  ;;  %v2528_v54 = vpop.permute.xlu1 %2527  ;;  %v2554_v29 = vsel %vm681_vm8, %v2552_v50, %v2513_v52 }
 0x28b   : > { %v6415_v18 = vpop.permute.xlu0 %2317 }
 0x28c   : > { %8122 = vst [vmem:[#allocation63_spill] sm:$0xff] %v6415_v18  ;;  %v6417_v24 = vpop.permute.xlu1 %2299 }
 0x28d   : > { %8123 = vst [vmem:[#allocation64_spill] sm:$0xff] %v6417_v24  ;;  %v2556_v24 = vsel %vm684_vm9, %v2554_v29, %v2516_v48 }
 0x28e   : > { %v2558_v6 = vsel %vm687_vm10, %v2556_v24, %v6298_v49 }
 0x28f   : > { %v6419_v58 = vpop.permute.xlu0 %1588  ;;  %v2560_v52 = vsel %vm690_vm11, %v2558_v6, %v2522_v39  ;;  %v2096_v6 = vsel %vm677_vm7, %v5544_v28, %v5948_v26 }
 0x290   : > { %v6421_v40 = vpop.permute.xlu1 %1816  ;;  %v2562_v49 = vsel %vm693_vm12, %v2560_v52, %v2525_v62 }
 0x291   : > { %v2564_v24 = vsel %vm696_vm13, %v2562_v49, %v2528_v54 }
 0x292   : > { %v2646_v39 = vsel %vm2604_vm14, %v2564_v24, 0  ;;  %v8126_v24 = vld [vmem:[#allocation12_spill] sm:$0xff] }
 0x293   : > { %v6423_v42 = vpop.permute.xlu0 %2308 }
 0x294   : > { %8124 = vst [vmem:[#allocation65_spill] sm:$0xff] %v6423_v42  ;;  %v6425_v51 = vpop.permute.xlu1 %1819  ;;  %v2567_v42 = vsel %vm677_vm7, %v6031_v31, %v2531_v17 }
 0x295   : > { %v2569_v38 = vsel %vm681_vm8, %v2567_v42, %v2534_v21 }
 0x297   : > { %v6430_v13 = vpop.permute.xlu0 %1828 }
 0x298   : > { %v6432_v18 = vpop.permute.xlu1 %1846 }
 0x29b   : > { %v6440_v44 = vpop.permute.xlu0 %1831 }
 0x29c   : > { %v2537_v32 = vpop.permute.xlu1 %2536 }
 0x29d   : > { %v2571_v50 = vsel %vm684_vm9, %v2569_v38, %v2537_v32 }
 0x29e   : > { %v2573_v2 = vsel %vm687_vm10, %v2571_v50, %v2540_v34  ;;  %v2098_v50 = vsel %vm681_vm8, %v2096_v6, %v5943_v36  ;;  %v8131_v6 = vld [vmem:[#allocation25_spill] sm:$0xff] }
 0x29f   : > { %v6445_v48 = vpop.permute.xlu0 %1600  ;;  %v2575_v31 = vsel %vm690_vm11, %v2573_v2, %v2543_v25  ;;  %v2100_v28 = vsel %vm684_vm9, %v2098_v50, %v6002_v45  ;;  %v8132_v50 = vld [vmem:[#allocation23_spill] sm:$0xff] }
 0x2a0   : > { %v6447_v29 = vpop.permute.xlu1 %1591  ;;  %v2577_v38 = vsel %vm693_vm12, %v2575_v31, %v2546_v30  ;;  %v701_v30 = vsel %vm677_vm7, %v5523_v11, %v5911_v56  ;;  %v2111_v31 = vsel %vm677_vm7, %v5583_v7, %v5989_v14  ;;  %v2102_v26 = vsel %vm687_vm10, %v2100_v28, %v5891_v19 }
 0x2a1   : > { %v703_v32 = vsel %vm681_vm8, %v701_v30, %v5900_v37  ;;  %v2113_v37 = vsel %vm681_vm8, %v2111_v31, %v6066_v1  ;;  %v680_v14 = vsel %vm677_vm7, %v5490_v46, %v5854_v47  ;;  %v2104_v45 = vsel %vm690_vm11, %v2102_v26, %v5984_v63  ;;  %v8135_v26 = vld [vmem:[#allocation22_spill] sm:$0xff] }
 0x2a2   : > { %v705_v11 = vsel %vm684_vm9, %v703_v32, %v6000_v3  ;;  %v2115_v56 = vsel %vm684_vm9, %v2113_v37, %v6076_v16 }
 0x2a3   : > { %v2549_v42 = vpop.permute.xlu0 %2548  ;;  %v707_v36 = vsel %vm687_vm10, %v705_v11, %v5856_v20  ;;  %v2117_v3 = vsel %vm687_vm10, %v2115_v56, %v5966_v4  ;;  %v8125_v20 = vld [vmem:[#allocation8_spill] sm:$0xff]  ;;  %v8128_v4 = vld [vmem:[#allocation18_spill] sm:$0xff]  ;;  %v8133_v11 = vld [vmem:[#allocation13_spill] sm:$0xff] }
 0x2a4   : > { %v6452_v21 = vpop.permute.xlu1 %1618  ;;  %v2579_v34 = vsel %vm696_vm13, %v2577_v38, %v2549_v42  ;;  %v709_v1 = vsel %vm690_vm11, %v707_v36, %v5917_v61  ;;  %v1418_v19 = vsel %vm677_vm7, %v8125_v20, %v6158_v43  ;;  %v683_v42 = vsel %vm681_vm8, %v680_v14, %v8126_v24  ;;  %v8127_v38 = vld [vmem:[#allocation21_spill] sm:$0xff]  ;;  %v8134_v56 = vld [vmem:[#allocation11_spill] sm:$0xff]  ;;  %v8137_v20 = vld [vmem:[#allocation28_spill] sm:$0xff] }
 0x2a5   : > { %5203 = vmatprep.subr.msk.bf16.mxu0 %vm2604_vm14, %v2579_v34  ;;  %v2119_v46 = vsel %vm690_vm11, %v2117_v3, %v8127_v38  ;;  %v1420_v47 = vsel %vm681_vm8, %v1418_v19, %v6178_v10  ;;  %v686_v61 = vsel %vm684_vm9, %v683_v42, %v8128_v4  ;;  %v8129_v34 = vld [vmem:[#allocation19_spill] sm:$0xff]  ;;  %v933_v28 = vsel %vm677_vm7, %v8133_v11, %v6327_v55  ;;  %v8136_v3 = vld [vmem:[#allocation10_spill] sm:$0xff] }
 0x2a6   : > { %2661 = vmatpush1.bf16.msra.mxu0 %v2646_v39  ;;  %v711_v63 = vsel %vm693_vm12, %v709_v1, %v8129_v34  ;;  %v8130_v39 = vld [vmem:[#allocation20_spill] sm:$0xff]  ;;  %v2121_v31 = vsel %vm693_vm12, %v2119_v46, %v8132_v50  ;;  %v1422_v10 = vsel %vm684_vm9, %v1420_v47, %v6222_v0  ;;  %v6538_v36 = vsel %vm687_vm10, %v686_v61, %v8134_v56  ;;  %v8138_v55 = vld [vmem:[#allocation7_spill] sm:$0xff]  ;;  %v8140_v46 = vld [vmem:[#allocation29_spill] sm:$0xff] }
 0x2a7   : > { %v6458_v17 = vpop.permute.xlu0 %1837  ;;  %v2106_v43 = vsel %vm693_vm12, %v2104_v45, %v8130_v39  ;;  %v6542_v14 = vsel %vm696_vm13, %v711_v63, %v8135_v26  ;;  %v1146_v1 = vsel %vm677_vm7, %v8136_v3, %v6257_v57  ;;  %v935_v0 = vsel %vm681_vm8, %v933_v28, %v6335_v53  ;;  %v8139_v57 = vld [vmem:[#allocation27_spill] sm:$0xff]  ;;  %v8141_v61 = vld [vmem:[#allocation14_spill] sm:$0xff]  ;;  %v8144_v50 = vld [vmem:[#allocation24_spill] sm:$0xff] }
 0x2a8   : > { %v6460_v25 = vpop.permute.xlu1 %1603  ;;  %v6527_v32 = vsel %vm696_vm13, %v2106_v43, %v8131_v6  ;;  %v1403_v19 = vsel %vm677_vm7, %v8138_v55, %v8137_v20  ;;  %v937_v24 = vsel %vm684_vm9, %v935_v0, %v6403_v12  ;;  %v1859_v42 = vsel %vm677_vm7, %v6200_v27, %v6421_v40  ;;  %v8146_v11 = vld [vmem:[#allocation35_spill] sm:$0xff]  ;;  %v8147_v56 = vld [vmem:[#allocation57_spill] sm:$0xff] }
 0x2a9   : > { %v2598_v45 = vrot.slane %v6527_v32, 4  ;;  %v6560_v38 = vsel %vm696_vm13, %v2121_v31, %v6150_v35  ;;  %v1405_v53 = vsel %vm681_vm8, %v1403_v19, %v8139_v57  ;;  %v1424_v47 = vsel %vm687_vm10, %v1422_v10, %v8140_v46  ;;  %v8145_v31 = vld [vmem:[#allocation58_spill] sm:$0xff]  ;;  %v8151_v0 = vld [vmem:[#allocation9_spill] sm:$0xff] }
 0x2aa   : > { %v1861_v4 = vsel %vm681_vm8, %v1859_v42, %v6425_v51  ;;  %v1161_v12 = vsel %vm677_vm7, %v8141_v61, %v6311_v41  ;;  %v1148_v27 = vsel %vm681_vm8, %v1146_v1, %v6255_v15  ;;  %v1631_v35 = vsel %vm677_vm7, %v6247_v22, %v6419_v58  ;;  %v8142_v51 = vld [vmem:[#allocation17_spill] sm:$0xff]  ;;  %v8143_v58 = vld [vmem:[#allocation31_spill] sm:$0xff]  ;;  %v8150_v1 = vld [vmem:[#allocation34_spill] sm:$0xff] }
 0x2ab   : > { %v6462_v62 = vpop.permute.xlu0 %1840  ;;  %v1150_v39 = vsel %vm684_vm9, %v1148_v27, %v6320_v9  ;;  %v2324_v43 = vsel %vm677_vm7, %v8142_v51, %v6389_v33  ;;  %v939_v41 = vsel %vm687_vm10, %v937_v24, %v6273_v60  ;;  %v1633_v15 = vsel %vm681_vm8, %v1631_v35, %v6447_v29  ;;  %v8152_v20 = vld [vmem:[#allocation61_spill] sm:$0xff]  ;;  %v8154_v42 = vld [vmem:[#allocation62_spill] sm:$0xff]  ;;  %v8157_v27 = vld [vmem:[#allocation32_spill] sm:$0xff] }
 0x2ac   : > { %v6464_v54 = vpop.permute.xlu1 %2320  ;;  %v2599_v22 = vrot.slane %v6560_v38, 4  ;;  %v1163_v6 = vsel %vm681_vm8, %v1161_v12, %v6344_v23  ;;  %v1426_v33 = vsel %vm690_vm11, %v1424_v47, %v6191_v8  ;;  %v2339_v29 = vsel %vm677_vm7, %v8144_v50, %v6397_v5  ;;  %v8149_v8 = vld [vmem:[#allocation51_spill] sm:$0xff]  ;;  %v8153_v19 = vld [vmem:[#allocation65_spill] sm:$0xff] }
 0x2ad   : > { %v1165_v60 = vsel %vm684_vm9, %v1163_v6, %v6384_v59  ;;  %v1152_v28 = vsel %vm687_vm10, %v1150_v39, %v8146_v11  ;;  %v2341_v23 = vsel %vm681_vm8, %v2339_v29, %v8147_v56  ;;  %v2326_v3 = vsel %vm681_vm8, %v2324_v43, %v8149_v8  ;;  %v8156_v47 = vld [vmem:[#allocation37_spill] sm:$0xff]  ;;  %v8159_v51 = vld [vmem:[#allocation43_spill] sm:$0xff] }
 0x2ae   : > { %v918_v5 = vsel %vm677_vm7, %v8151_v0, %v8150_v1  ;;  %v2328_v55 = vsel %vm684_vm9, %v2326_v3, %v8152_v20  ;;  %v2343_v24 = vsel %vm684_vm9, %v2341_v23, %v8153_v19  ;;  %v1428_v35 = vsel %vm693_vm12, %v1426_v33, %v8157_v27  ;;  %v8168_v1 = vld [vmem:[#allocation54_spill] sm:$0xff]  ;;  %v8169_v0 = vld [vmem:[#allocation60_spill] sm:$0xff] }
 0x2af   : > { %v6476_v2 = vpop.permute.xlu0 %1609  ;;  %v1154_v43 = vsel %vm690_vm11, %v1152_v28, %v8159_v51  ;;  %v8165_v28 = vld [vmem:[#allocation42_spill] sm:$0xff] }
 0x2b0   : > { %v6478_v52 = vpop.permute.xlu1 %1612 }
 0x2b3   : > { %v1823_v49 = vpop.permute.xlu0 %1822 }
 0x2b4   : > { %v6495_v7 = vpop.permute.xlu1 %1852  ;;  %v1863_v40 = vsel %vm684_vm9, %v1861_v4, %v1823_v49  ;;  %v6591_v49 = vsel %vm684_vm9, %v1405_v53, %v8143_v58  ;;  %v8155_v53 = vld [vmem:[#allocation36_spill] sm:$0xff]  ;;  %v1167_v4 = vsel %vm687_vm10, %v1165_v60, %v8156_v47  ;;  %v8163_v60 = vld [vmem:[#allocation53_spill] sm:$0xff] }
 0x2b5   : > { %v1865_v10 = vsel %vm687_vm10, %v1863_v40, %v8145_v31  ;;  %v920_v46 = vsel %vm681_vm8, %v918_v5, %v8155_v53  ;;  %v8158_v40 = vld [vmem:[#allocation48_spill] sm:$0xff]  ;;  %v2345_v50 = vsel %vm687_vm10, %v2343_v24, %v8163_v60 }
 0x2b6   : > { %v1867_v61 = vsel %vm690_vm11, %v1865_v10, %v6430_v13  ;;  %v922_v39 = vsel %vm684_vm9, %v920_v46, %v8158_v40  ;;  %v8161_v58 = vld [vmem:[#allocation40_spill] sm:$0xff]  ;;  %v8164_v10 = vld [vmem:[#allocation46_spill] sm:$0xff] }
 0x2b7   : > { %v6509_v16 = vpop.permute.xlu0 %1849  ;;  %v1874_v6 = vsel %vm677_vm7, %v8161_v58, %v6458_v17  ;;  %v1169_v11 = vsel %vm690_vm11, %v1167_v4, %v8164_v10  ;;  %v1646_v17 = vsel %vm677_vm7, %v8165_v28, %v6476_v2  ;;  %v1869_v56 = vsel %vm693_vm12, %v1867_v61, %v6440_v44  ;;  %v8172_v61 = vld [vmem:[#allocation56_spill] sm:$0xff]  ;;  %v8177_v28 = vld [vmem:[#allocation15_spill] sm:$0xff] }
 0x2b8   : > { %v6523_v30 = vpop.permute.xlu1 %1621  ;;  %v1876_v33 = vsel %vm681_vm8, %v1874_v6, %v6462_v62  ;;  %v2347_v44 = vsel %vm690_vm11, %v2345_v50, %v8169_v0  ;;  %v8175_v58 = vld [vmem:[#allocation64_spill] sm:$0xff] }
 0x2bb   : > { %v1595_v37 = vpop.permute.xlu0 %1594 }
 0x2bc   : > { %v6577_v34 = vpop.permute.xlu1 %1624  ;;  %v1635_v9 = vsel %vm684_vm9, %v1633_v15, %v1595_v37  ;;  %v8148_v37 = vld [vmem:[#allocation50_spill] sm:$0xff] }
 0x2bd   : > { %v941_v26 = vsel %vm690_vm11, %v939_v41, %v8148_v37  ;;  %v1637_v57 = vsel %vm687_vm10, %v1635_v9, %v8154_v42  ;;  %v8160_v41 = vld [vmem:[#allocation45_spill] sm:$0xff]  ;;  %v8162_v9 = vld [vmem:[#allocation44_spill] sm:$0xff] }
 0x2be   : > { %v943_v15 = vsel %vm693_vm12, %v941_v26, %v8160_v41  ;;  %v2330_v13 = vsel %vm687_vm10, %v2328_v55, %v8162_v9  ;;  %v1639_v29 = vsel %vm690_vm11, %v1637_v57, %v6445_v48  ;;  %v8166_v37 = vld [vmem:[#allocation33_spill] sm:$0xff]  ;;  %v8167_v26 = vld [vmem:[#allocation55_spill] sm:$0xff]  ;;  %v8174_v41 = vld [vmem:[#allocation38_spill] sm:$0xff] }
 0x2bf   : > { %v1835_v63 = vpop.permute.xlu0 %1834  ;;  %v924_v62 = vsel %vm687_vm10, %v922_v39, %v8166_v37  ;;  %v945_v48 = vsel %vm696_vm13, %v943_v15, %v8167_v26  ;;  %v2332_v2 = vsel %vm690_vm11, %v2330_v13, %v8168_v1  ;;  %v1641_v5 = vsel %vm693_vm12, %v1639_v29, %v6460_v25  ;;  %v8170_v55 = vld [vmem:[#allocation47_spill] sm:$0xff]  ;;  %v8181_v26 = vld [vmem:[#allocation52_spill] sm:$0xff] }
 0x2c0   : > { %v1856_v12 = vpop.permute.xlu1 %1855  ;;  %v1871_v8 = vsel %vm696_vm13, %v1869_v56, %v1835_v63  ;;  %v1171_v19 = vsel %vm693_vm12, %v1169_v11, %v8170_v55  ;;  %v1648_v63 = vsel %vm681_vm8, %v1646_v17, %v6478_v52  ;;  %v2583_v47 = vrot.slane %v945_v48, 6  ;;  %v8173_v52 = vld [vmem:[#allocation63_spill] sm:$0xff]  ;;  %v8178_v17 = vld [vmem:[#allocation30_spill] sm:$0xff] }
 0x2c1   : > { %v2594_v53 = vrot.slane %v1871_v8, 6  ;;  %v2334_v27 = vsel %vm693_vm12, %v2332_v2, %v8172_v61  ;;  %v926_v15 = vsel %vm690_vm11, %v924_v62, %v8174_v41  ;;  %v8182_v8 = vld [vmem:[#allocation49_spill] sm:$0xff] }
 0x2c2   : > { %v2336_v6 = vsel %vm696_vm13, %v2334_v27, %v8175_v58 }
 0x2c3   : > { %v1607_v59 = vpop.permute.xlu0 %1606  ;;  %v2602_v10 = vrot.slane %v2336_v6, 2 }
 0x2c4   : > { %v1400_v24 = vpop.permute.xlu1 %1399 }
 0x2c7   : > { %v1844_v31 = vpop.permute.xlu0 %1843 }
 0x2c8   : > { %v1878_v23 = vsel %vm684_vm9, %v1876_v33, %v1844_v31  ;;  %v8176_v31 = vld [vmem:[#allocation26_spill] sm:$0xff] }
 0x2c9   : > { %v1880_v3 = vsel %vm687_vm10, %v1878_v23, %v6432_v18  ;;  %v1643_v18 = vsel %vm696_vm13, %v1641_v5, %v1607_v59  ;;  %v2349_v59 = vsel %vm693_vm12, %v2347_v44, %v8173_v52  ;;  %v8179_v23 = vld [vmem:[#allocation39_spill] sm:$0xff]  ;;  %v8183_v44 = vld [vmem:[#allocation16_spill] sm:$0xff] }
 0x2ca   : > { %v1882_v20 = vsel %vm690_vm11, %v1880_v3, %v6509_v16  ;;  %v8171_v16 = vld [vmem:[#allocation59_spill] sm:$0xff]  ;;  %v2622_v39 = vsel %vm2604_vm14, %v1643_v18, %v2594_v53  ;;  %v1156_v32 = vsel %vm693_vm12, %v1154_v43, %v8179_v23  ;;  %v1379_v43 = vpop.permute.xlu1 %1378 }
 0x2cb   : > { %v1884_v42 = vsel %vm693_vm12, %v1882_v20, %v6495_v7  ;;  %v1616_v57 = vpop.permute.xlu0 %1615  ;;  %v1173_v4 = vsel %vm696_vm13, %v1171_v19, %v8171_v16  ;;  %v2351_v7 = vsel %vm696_vm13, %v2349_v59, %v6464_v54  ;;  %v2626_v29 = vsel %vm2609_vm15, %v2622_v39, %v2598_v45  ;;  %v8180_v45 = vld [vmem:[#allocation41_spill] sm:$0xff] }
 0x2cc   : > { %v1650_v46 = vsel %vm684_vm9, %v1648_v63, %v1616_v57  ;;  %v1886_v25 = vsel %vm696_vm13, %v1884_v42, %v1856_v12  ;;  %v1430_v12 = vsel %vm696_vm13, %v1428_v35, %v1400_v24  ;;  %v2587_v60 = vrot.slane %v1173_v4, 4  ;;  %v2635_v57 = vld [vmem:[%s8028_s1] sm:$0x3] }
 0x2cd   : > { %v1652_v40 = vsel %vm687_vm10, %v1650_v46, %v6452_v21  ;;  %v2595_v21 = vrot.slane %v1886_v25, 6  ;;  %v2608_v35 = vsel %vm2604_vm14, %v6542_v14, %v2583_v47  ;;  %v2603_v50 = vrot.slane %v2351_v7, 2 }
 0x2ce   : > { %v1654_v51 = vsel %vm690_vm11, %v1652_v40, %v6523_v30  ;;  %v2591_v30 = vrot.slane %v1430_v12, 2  ;;  %v692_v14 = vsel %vm690_vm11, %v6538_v36, %v8177_v28  ;;  %v928_v37 = vsel %vm693_vm12, %v926_v15, %v8180_v45 }
 0x2cf   : > { %v1656_v9 = vsel %vm693_vm12, %v1654_v51, %v6577_v34  ;;  %v1628_v13 = vpop.permute.xlu0 %1627  ;;  %v1409_v34 = vsel %vm687_vm10, %v6591_v49, %v8176_v31  ;;  %v930_v38 = vsel %vm696_vm13, %v928_v37, %v8181_v26  ;;  %v2630_v36 = vsel %vm2614_vm0, %v2626_v29, %v2602_v10  ;;  %v8184_v29 = vld [vmem:[#allocation3_spill] sm:$0xff] }
 0x2d0   : > { %v1658_v54 = vsel %vm696_vm13, %v1656_v9, %v1628_v13  ;;  %v1411_v56 = vsel %vm690_vm11, %v1409_v34, %v8178_v17  ;;  %v2613_v48 = vsel %vm2609_vm15, %v2608_v35, %v2587_v60  ;;  %v1158_v3 = vsel %vm696_vm13, %v1156_v32, %v8182_v8 }
 0x2d1   : > { %v2624_v33 = vsel %vm2604_vm14, %v1658_v54, %v2595_v21  ;;  %v2619_v1 = vsel %vm2614_vm0, %v2613_v48, %v2591_v30  ;;  %v2582_v0 = vrot.slane %v930_v38, 6  ;;  %v695_v5 = vsel %vm693_vm12, %v692_v14, %v8183_v44 }
 0x2d2   : > { %v2628_v11 = vsel %vm2609_vm15, %v2624_v33, %v2599_v22  ;;  %v2586_v55 = vrot.slane %v1158_v3, 4 }
 0x2d3   : > { %v1376_v62 = vpop.permute.xlu0 %1375  ;;  %v2633_v49 = vsel %vm2614_vm0, %v2628_v11, %v2603_v50 }
 0x2d4   : > { %v1413_v22 = vsel %vm693_vm12, %v1411_v56, %v1376_v62  ;;  %2662 = vmatprep.subr.bf16.mxu0 %v2633_v49  ;;  %v8185_v49 = vld [vmem:[#allocation4_spill] sm:$0xff] }
 0x2d5   : > { %2663 = vmatpush1.bf16.msra.mxu0 %v2630_v36  ;;  %v1415_v2 = vsel %vm696_vm13, %v1413_v22, %v1379_v43 }
 0x2d6   : > { %2664 = vmatprep.subr.bf16.mxu0 %v2619_v1  ;;  %v2590_v63 = vrot.slane %v1415_v2, 2 }
 0x2d7   : > { %v655_v20 = vpop.permute.xlu0 %654 }
 0x2d8   : > { %v698_v19 = vsel %vm696_vm13, %v695_v5, %v655_v20 }
 0x2d9   : > { %v2606_v18 = vsel %vm2604_vm14, %v698_v19, %v2582_v0 }
 0x2da   : > { %v2611_v24 = vsel %vm2609_vm15, %v2606_v18, %v2586_v55 }
 0x2db   : > { %v2616_v42 = vsel %vm2614_vm0, %v2611_v24, %v2590_v63 }
 0x2dc   : > { %2665 = vmatpush1.bf16.msra.mxu0 %v2616_v42 }
 0x2df   : > { %5204 = vmatmul.mubr.msk.bf16.vlgmr.msra.gmra.mxu0 %vm2642_vm1, %v2635_v57 }
 0x2e4   : > { %v2640_v53 = vpop.permute.xlu0 %2639 }
 0x39f   : > { %v2684_v46 = vpop.f32.mrf.mxu0 }
 0x3a0   : > { %v2685_v25 = vadd.f32 %v2684_v46, %v2640_v53 }
 0x3a1   : > { %v2686_v47 = vpop.f32.mrf.mxu0 }
 0x3a2   : > { %v2691_v16 = vmax.f32 %v2685_v25, 0.0  ;;  %v2687_v52 = vadd.f32 %v2686_v47, %v2640_v53 }
 0x3a3   : > { %v2688_v4 = vpop.f32.mrf.mxu0 }
 0x3a4   : > { %v2693_v61 = vpack.c.bf16 %v2691_v16, %v2691_v16  ;;  %v2692_v59 = vmax.f32 %v2687_v52, 0.0 }
 0x3a5   : > { %v2689_v27 = vpop.f32.mrf.mxu0 }
 0x3a6   : > { %2702 = vrot.lane.b32.xlu0 %v2693_v61, %s5243_s24  ;;  %2696 = vrot.lane.b32.xlu1 %v2693_v61, %s5244_s25  ;;  %v2694_v40 = vpack.c.bf16 %v2692_v59, %v2692_v59 }
 0x3aa   : > { %2708 = vrot.lane.b32.xlu0 %v2693_v61, %s5248_s29  ;;  %2699 = vrot.lane.b32.xlu1 %v2693_v61, %s5246_s27 }
 0x3ae   : > { %2714 = vrot.lane.b32.xlu0 %v2693_v61, %s5249_s30  ;;  %2705 = vrot.lane.b32.xlu1 %v2693_v61, %s5245_s26 }
 0x3b2   : > { %2721 = vrot.lane.b32.xlu0 %v2694_v40, %s5246_s27  ;;  %2711 = vrot.lane.b32.xlu1 %v2693_v61, %s5247_s28 }
 0x3b6   : > { %2727 = vrot.lane.b32.xlu0 %v2694_v40, %s5245_s26  ;;  %2718 = vrot.lane.b32.xlu1 %v2694_v40, %s5244_s25 }
 0x3ba   : > { %2733 = vrot.lane.b32.xlu0 %v2694_v40, %s5247_s28  ;;  %2724 = vrot.lane.b32.xlu1 %v2694_v40, %s5243_s24 }
 0x3be   : > { %2730 = vrot.lane.b32.xlu1 %v2694_v40, %s5248_s29 }
 0x3c2   : > { %2736 = vrot.lane.b32.xlu1 %v2694_v40, %s5249_s30 }
 0x418   : > { %v2703_v7 = vpop.permute.xlu0 %2702  ;;  %v2697_v39 = vpop.permute.xlu1 %2696 }
 0x41c   : > { %v2709_v12 = vpop.permute.xlu0 %2708  ;;  %v2700_v51 = vpop.permute.xlu1 %2699 }
 0x41d   : > { %v2789_v28 = vcombine.low %v2697_v39, %v2709_v12 }
 0x41f   : > { %v2796_v37 = vrot.slane %v2789_v28, %v8184_v29 }
 0x420   : > { %v2715_v41 = vpop.permute.xlu0 %2714  ;;  %v2706_v15 = vpop.permute.xlu1 %2705 }
 0x421   : > { %v2739_v30 = vcombine.low %v2693_v61, %v2706_v15  ;;  %v2797_v33 = vcombine.low %v2703_v7, %v2715_v41 }
 0x423   : > { %v2746_v14 = vrot.slane %v2739_v30, %v8184_v29  ;;  %v2804_v56 = vrot.slane %v2797_v33, %v8184_v29 }
 0x424   : > { %v2722_v58 = vpop.permute.xlu0 %2721  ;;  %v2712_v6 = vpop.permute.xlu1 %2711 }
 0x425   : > { %v2747_v13 = vcombine.low %v2700_v51, %v2712_v6  ;;  %v2821_v38 = vcombine.low %v2796_v37, %v2804_v56 }
 0x427   : > { %v2754_v34 = vrot.slane %v2747_v13, %v8184_v29  ;;  %v2828_v1 = vrot.slane %v2821_v38, %v8185_v49 }
 0x428   : > { %v2728_v9 = vpop.permute.xlu0 %2727  ;;  %v2719_v21 = vpop.permute.xlu1 %2718 }
 0x429   : > { %v2755_v60 = vcombine.low %v2694_v40, %v2728_v9  ;;  %v2771_v32 = vcombine.low %v2746_v14, %v2754_v34 }
 0x42b   : > { %v2762_v10 = vrot.slane %v2755_v60, %v8184_v29  ;;  %v2778_v48 = vrot.slane %v2771_v32, %v8185_v49 }
 0x42c   : > { %v2734_v54 = vpop.permute.xlu0 %2733  ;;  %v2725_v35 = vpop.permute.xlu1 %2724 }
 0x42d   : > { %v2763_v50 = vcombine.low %v2722_v58, %v2734_v54 }
 0x42f   : > { %v2770_v31 = vrot.slane %v2763_v50, %v8184_v29 }
 0x430   : > { %v2731_v11 = vpop.permute.xlu1 %2730 }
 0x431   : > { %v2779_v17 = vcombine.low %v2762_v10, %v2770_v31  ;;  %v2805_v23 = vcombine.low %v2719_v21, %v2731_v11 }
 0x433   : > { %v2786_v26 = vrot.slane %v2779_v17, %v8185_v49  ;;  %v2812_v22 = vrot.slane %v2805_v23, %v8184_v29 }
 0x434   : > { %v2737_v45 = vpop.permute.xlu1 %2736 }
 0x435   : > { %v2813_v62 = vcombine.low %v2725_v35, %v2737_v45  ;;  %v2787_v3 = vcombine.low %v2778_v48, %v2786_v26  ;;  %v2788_v43 = vcombine.high %v2778_v48, %v2786_v26 }
 0x437   : > { %v2820_v36 = vrot.slane %v2813_v62, %v8184_v29  ;;  %v2842_v5 = vshrl.u32 %v2787_v3, 16  ;;  %v2848_v20 = vshrl.u32 %v2788_v43, 16 }
 0x439   : > { %v2829_v8 = vcombine.low %v2812_v22, %v2820_v36 }
 0x43b   : > { %v2836_v2 = vrot.slane %v2829_v8, %v8185_v49 }
 0x43d   : > { %v2837_v0 = vcombine.low %v2828_v1, %v2836_v2  ;;  %v2838_v44 = vcombine.high %v2828_v1, %v2836_v2 }
 0x43f   : > { %v2841_v55 = vpack.i.b16 %v2837_v0, %v2787_v3  ;;  %v2843_v19 = vshrl.u32 %v2837_v0, 16  ;;  %v2847_v63 = vpack.i.b16 %v2838_v44, %v2788_v43  ;;  %v2849_v18 = vshrl.u32 %v2838_v44, 16 }
 0x441   : > { %v2852_v24 = vshrl.u32 %v2841_v55, 16  ;;  %v2844_v42 = vpack.i.b16 %v2843_v19, %v2842_v5  ;;  %v2866_v57 = vshrl.u32 %v2847_v63, 16  ;;  %v2850_v53 = vpack.i.b16 %v2849_v18, %v2848_v20 }
 0x442   : > { %v2855_v40 = vshll.u32 %v2841_v55, 16  ;;  %v2869_v15 = vshll.u32 %v2847_v63, 16 }
 0x443   : > { %v2854_v46 = vrot.slane %v2852_v24, 7  ;;  %v2859_v25 = vshrl.u32 %v2844_v42, 16  ;;  %v2873_v47 = vshrl.u32 %v2850_v53, 16  ;;  %v2868_v27 = vrot.slane %v2866_v57, 7 }
 0x444   : > { %v2862_v12 = vshll.u32 %v2844_v42, 16  ;;  %v2876_v9 = vshll.u32 %v2850_v53, 16 }
 0x445   : > { %v2891_v4 = vsel %vm5339_vm2, %v2854_v46, 0  ;;  %v2861_v61 = vrot.slane %v2859_v25, 7  ;;  %v2875_v59 = vrot.slane %v2873_v47, 7  ;;  %v2893_v7 = vsel %vm5339_vm2, %v2868_v27, 0 }
 0x446   : > { %2905 = vrot.lane.b32.xlu0 %v2891_v4, %s5252_s6  ;;  %v2857_v39 = vor.u32 %v2855_v40, %v2854_v46  ;;  %v2871_v6 = vor.u32 %v2869_v15, %v2868_v27 }
 0x447   : > { %v2892_v52 = vsel %vm5339_vm2, %v2861_v61, 0  ;;  %v2894_v51 = vsel %vm5339_vm2, %v2875_v59, 0  ;;  %v2864_v41 = vor.u32 %v2862_v12, %v2861_v61  ;;  %v2878_v13 = vor.u32 %v2876_v9, %v2875_v59 }
 0x448   : > { %2909 = vrot.lane.b32.xlu1 %v2892_v52, %s5252_s6  ;;  %v2887_v58 = vsel %vm5339_vm2, 0, %v2857_v39  ;;  %v2889_v60 = vsel %vm5339_vm2, 0, %v2871_v6 }
 0x449   : > { %v2888_v21 = vsel %vm5339_vm2, 0, %v2864_v41  ;;  %v2890_v54 = vsel %vm5339_vm2, 0, %v2878_v13 }
 0x44a   : > { %2913 = vrot.lane.b32.xlu0 %v2893_v7, %s5252_s6 }
 0x44c   : > { %2917 = vrot.lane.b32.xlu1 %v2894_v51, %s5252_s6 }
 0x44e   : > { %2903 = vrot.lane.b32.xlu0 %v2887_v58, %s5252_s6 }
 0x450   : > { %2907 = vrot.lane.b32.xlu1 %v2888_v21, %s5252_s6 }
 0x452   : > { %2911 = vrot.lane.b32.xlu0 %v2889_v60, %s5252_s6 }
 0x454   : > { %2915 = vrot.lane.b32.xlu1 %v2890_v54, %s5252_s6 }
 0x4b8   : > { %v2906_v35 = vpop.permute.xlu0 %2905 }
 0x4b9   : > { %v2922_v62 = vsel %vm459_vm3, 0, %v2906_v35 }
 0x4ba   : > { %v2910_v50 = vpop.permute.xlu1 %2909  ;;  %v2936_v38 = vsel %vm477_vm4, %v2922_v62, 0 }
 0x4bb   : > { %v2926_v26 = vsel %vm459_vm3, 0, %v2910_v50  ;;  %v4336_v8 = vrot.slane %v2936_v38, 1  ;;  %v3624_v25 = vshll.u32 %v2936_v38, 16 }
 0x4bc   : > { %v2914_v30 = vpop.permute.xlu0 %2913  ;;  %v2938_v48 = vsel %vm477_vm4, %v2926_v26, 0 }
 0x4bd   : > { %v2930_v22 = vsel %vm459_vm3, 0, %v2914_v30  ;;  %v4339_v2 = vrot.slane %v2938_v48, 1  ;;  %v3633_v61 = vshll.u32 %v2938_v48, 16  ;;  %v3626_v40 = vrot.slane %v3624_v25, 1 }
 0x4be   : > { %v2918_v33 = vpop.permute.xlu1 %2917  ;;  %v2940_v1 = vsel %vm477_vm4, %v2930_v22, 0 }
 0x4bf   : > { %v2934_v3 = vsel %vm459_vm3, 0, %v2918_v33  ;;  %v4342_v20 = vrot.slane %v2940_v1, 1  ;;  %v3642_v7 = vshll.u32 %v2940_v1, 16  ;;  %v3635_v41 = vrot.slane %v3633_v61, 1 }
 0x4c0   : > { %v2904_v31 = vpop.permute.xlu0 %2903  ;;  %v2942_v5 = vsel %vm477_vm4, %v2934_v3, 0 }
 0x4c1   : > { %v2920_v34 = vsel %vm459_vm3, 0, %v2904_v31  ;;  %v4345_v63 = vrot.slane %v2942_v5, 1  ;;  %v3651_v15 = vshll.u32 %v2942_v5, 16  ;;  %v3644_v13 = vrot.slane %v3642_v7, 1 }
 0x4c2   : > { %v6793_v10 = vsel %vm477_vm4, %v2920_v34, 0  ;;  %v2908_v11 = vpop.permute.xlu1 %2907 }
 0x4c3   : > { %v2924_v28 = vsel %vm459_vm3, 0, %v2908_v11  ;;  %3163 = vrot.lane.b32.xlu0 %v6793_v10, %s5254_s7  ;;  %v4335_v36 = vrot.slane %v6793_v10, 1  ;;  %v3620_v24 = vshll.u32 %v6793_v10, 16  ;;  %v2945_v47 = vshrl.u32 %v6793_v10, 16 }
 0x4c4   : > { %v6799_v14 = vsel %vm477_vm4, %v2924_v28, 0  ;;  %v2912_v17 = vpop.permute.xlu0 %2911  ;;  %v3653_v50 = vrot.slane %v3651_v15, 1 }
 0x4c5   : > { %v2928_v56 = vsel %vm459_vm3, 0, %v2912_v17  ;;  %3165 = vrot.lane.b32.xlu1 %v6799_v14, %s5254_s7  ;;  %v4338_v43 = vrot.slane %v6799_v14, 1  ;;  %v6833_v0 = vsel %vm1891_vm5, %v4335_v36, %v4336_v8  ;;  %v3629_v57 = vshll.u32 %v6799_v14, 16 }
 0x4c6   : > { %v6805_v23 = vsel %vm477_vm4, %v2928_v56, 0  ;;  %v2916_v32 = vpop.permute.xlu1 %2915  ;;  %v3622_v53 = vrot.slane %v3620_v24, 1  ;;  %v2946_v52 = vshrl.u32 %v6799_v14, 16  ;;  %v2943_v35 = vpack.i.b16 %v6799_v14, %v6793_v10 }
 0x4c7   : > { %v2932_v45 = vsel %vm459_vm3, 0, %v2916_v32  ;;  %3167 = vrot.lane.b32.xlu0 %v6805_v23, %s5254_s7  ;;  %v4341_v44 = vrot.slane %v6805_v23, 1  ;;  %v6840_v55 = vsel %vm1891_vm5, %v4338_v43, %v4339_v2  ;;  %v3638_v46 = vshll.u32 %v6805_v23, 16 }
 0x4c8   : > { %v6811_v37 = vsel %vm477_vm4, %v2932_v45, 0  ;;  %v3631_v16 = vrot.slane %v3629_v57, 1  ;;  %v3623_v27 = vor.u32 %v3622_v53, %v2945_v47  ;;  %v2951_v12 = vshrl.u32 %v6805_v23, 16 }
 0x4c9   : > { %3169 = vrot.lane.b32.xlu1 %v6811_v37, %s5254_s7  ;;  %v4344_v19 = vrot.slane %v6811_v37, 1  ;;  %v6846_v18 = vsel %vm1891_vm5, %v4341_v44, %v4342_v20  ;;  %v3647_v4 = vshll.u32 %v6811_v37, 16  ;;  %v3640_v59 = vrot.slane %v3638_v46, 1 }
 0x4ca   : > { %v3632_v39 = vor.u32 %v3631_v16, %v2946_v52  ;;  %v6871_v58 = vsel %vm1174_vm6, %v3623_v27, %v3626_v40  ;;  %v2952_v9 = vshrl.u32 %v6811_v37, 16  ;;  %v2949_v21 = vpack.i.b16 %v6811_v37, %v6805_v23 }
 0x4cb   : > { %3391 = vrot.lane.b32.xlu0 %v6793_v10, %s5255_s8  ;;  %v6852_v42 = vsel %vm1891_vm5, %v4344_v19, %v4345_v63  ;;  %v3649_v51 = vrot.slane %v3647_v4, 1  ;;  %v3641_v6 = vor.u32 %v3640_v59, %v2951_v12  ;;  %v2962_v10 = vrot.slane %v2943_v35, %v8184_v29 }
 0x4cc   : > { %v6879_v60 = vsel %vm1174_vm6, %v3632_v39, %v3635_v41  ;;  %v2977_v33 = vrot.slane %v2949_v21, %v8184_v29  ;;  %v2953_v34 = vpack.i.b16 %v2952_v9, %v2951_v12  ;;  %v2947_v11 = vpack.i.b16 %v2946_v52, %v2945_v47 }
 0x4cd   : > { %3393 = vrot.lane.b32.xlu1 %v6799_v14, %s5255_s8  ;;  %v3650_v54 = vor.u32 %v3649_v51, %v2952_v9  ;;  %v6886_v30 = vsel %vm1174_vm6, %v3641_v6, %v3644_v13  ;;  %v8187_v14 = vld [vmem:[#allocation6_spill] sm:$0xff]  ;;  %v4357_v26 = vpack.i.b16 %v6852_v42, %v6846_v18  ;;  %v4349_v48 = vpack.i.b16 %v6840_v55, %v6833_v0 }
 0x4ce   : > { %v2985_v28 = vcombine.low %v2962_v10, %v2977_v33  ;;  %v2970_v17 = vcombine.high %v2949_v21, %v8187_v14  ;;  %v2986_v56 = vcombine.high %v2962_v10, %v2977_v33  ;;  %v2955_v32 = vcombine.high %v2943_v35, %v8187_v14 }
 0x4cf   : > { %3395 = vrot.lane.b32.xlu0 %v6805_v23, %s5255_s8  ;;  %v6892_v31 = vsel %vm1174_vm6, %v3650_v54, %v3653_v50  ;;  %v3043_v23 = vrot.slane %v2953_v34, %v8184_v29  ;;  %v8189_v8 = vmov 0   ;;  %v4385_v1 = vrot.slane %v4357_v26, %v8184_v29 }
 0x4d0   : > { %v6907_v45 = vrot.slane %v2985_v28, %v8185_v49  ;;  %v2984_v62 = vrot.slane %v2970_v17, %v8184_v29  ;;  %v3000_v38 = vrot.slane %v2986_v56, %v8185_v49  ;;  %v2969_v36 = vrot.slane %v2955_v32, %v8184_v29 }
 0x4d1   : > { %3397 = vrot.lane.b32.xlu1 %v6811_v37, %s5255_s8  ;;  %v3028_v37 = vrot.slane %v2947_v11, %v8184_v29  ;;  %v3036_v5 = vcombine.high %v2953_v34, %v8187_v14  ;;  %v4370_v20 = vrot.slane %v4349_v48, %v8184_v29  ;;  %v3021_v24 = vcombine.high %v2947_v11, %v8187_v14 }
 0x4d2   : > { %8188 = vst [vmem:[#allocation8_spill] sm:$0xff] %v6907_v45  ;;  %v3017_v3 = vcombine.high %v6907_v45, %v8189_v8  ;;  %v3002_v43 = vcombine.high %v2969_v36, %v2984_v62  ;;  %v3001_v63 = vcombine.low %v2969_v36, %v2984_v62  ;;  %v4360_v25 = vshrl.u32 %v6852_v42, 16 }
 0x4d3   : > { %4795 = vrot.lane.b32.xlu0 %v6833_v0, %s5255_s8  ;;  %v3051_v22 = vcombine.low %v3028_v37, %v3043_v23  ;;  %v3052_v44 = vcombine.high %v3028_v37, %v3043_v23  ;;  %v4394_v53 = vcombine.high %v4370_v20, %v4385_v1  ;;  %v3050_v46 = vrot.slane %v3036_v5, %v8184_v29 }
 0x4d4   : > { %v3016_v19 = vrot.slane %v3002_v43, %v8185_v49  ;;  %v3018_v47 = vcombine.high %v3000_v38, %v8189_v8  ;;  %v6940_v16 = vrot.slane %v3001_v63, %v8185_v49  ;;  %v3035_v4 = vrot.slane %v3021_v24, %v8184_v29 }
 0x4d5   : > { %4797 = vrot.lane.b32.xlu1 %v6840_v55, %s5255_s8  ;;  %v3059_v2 = vrot.slane %v3051_v22, %v8185_v49  ;;  %v6932_v57 = vrot.slane %v3052_v44, %v8185_v49  ;;  %v4352_v61 = vshrl.u32 %v6840_v55, 16  ;;  %v4359_v27 = vshrl.u32 %v6846_v18, 16 }
 0x4d6   : > { %v4408_v52 = vrot.slane %v4394_v53, %v8185_v49  ;;  %v3067_v59 = vcombine.low %v3035_v4, %v3050_v46  ;;  %v3019_v7 = vcombine.high %v6940_v16, %v8189_v8  ;;  %v3068_v39 = vcombine.high %v3035_v4, %v3050_v46 }
 0x4d7   : > { %4799 = vrot.lane.b32.xlu0 %v6846_v18, %s5255_s8  ;;  %v4361_v40 = vpack.i.b16 %v4360_v25, %v4359_v27  ;;  %v4378_v51 = vcombine.high %v4357_v26, %v8187_v14  ;;  %v4363_v41 = vcombine.high %v4349_v48, %v8187_v14  ;;  %v3083_v6 = vcombine.high %v3059_v2, %v8189_v8 }
 0x4d8   : > { %v3020_v35 = vcombine.high %v3016_v19, %v8189_v8  ;;  %v4426_v37 = vcombine.high %v4408_v52, %v8189_v8  ;;  %v3665_v22 = vpack.i.b16 %v6892_v31, %v6886_v30  ;;  %v3668_v36 = vshrl.u32 %v6892_v31, 16 }
 0x4d9   : > { %4801 = vrot.lane.b32.xlu1 %v6852_v42, %s5255_s8  ;;  %v4451_v15 = vrot.slane %v4361_v40, %v8184_v29  ;;  %v4392_v13 = vrot.slane %v4378_v51, %v8184_v29  ;;  %v4444_v54 = vcombine.high %v4361_v40, %v8187_v14  ;;  %v4377_v33 = vrot.slane %v4363_v41, %v8184_v29 }
 0x4da   : > { %v3660_v43 = vshrl.u32 %v6879_v60, 16 }
 0x4db   : > { %4567 = vrot.lane.b32.xlu0 %v6833_v0, %s5254_s7  ;;  %v4410_v11 = vcombine.high %v4377_v33, %v4392_v13  ;;  %v4458_v17 = vrot.slane %v4444_v54, %v8184_v29 }
 0x4dd   : > { %4569 = vrot.lane.b32.xlu1 %v6840_v55, %s5254_s7  ;;  %v3075_v55 = vrot.slane %v3067_v59, %v8185_v49  ;;  %v4424_v56 = vrot.slane %v4410_v11, %v8185_v49 }
 0x4df   : > { %4571 = vrot.lane.b32.xlu0 %v6846_v18, %s5254_s7  ;;  %v4393_v18 = vcombine.low %v4370_v20, %v4385_v1  ;;  %v3085_v48 = vcombine.high %v3075_v55, %v8189_v8  ;;  %v3657_v1 = vpack.i.b16 %v6879_v60, %v6871_v58  ;;  %v3659_v20 = vshrl.u32 %v6871_v58, 16 }
 0x4e1   : > { %4573 = vrot.lane.b32.xlu1 %v6852_v42, %s5254_s7  ;;  %v4351_v42 = vshrl.u32 %v6833_v0, 16  ;;  %v3082_v0 = vrot.slane %v3068_v39, %v8185_v49  ;;  %v6961_v9 = vrot.slane %v4393_v18, %v8185_v49  ;;  %v3671_v59 = vcombine.high %v3657_v1, %v8187_v14 }
 0x4e3   : > { %4103 = vrot.lane.b32.xlu0 %v6871_v58, %s5255_s8  ;;  %v4353_v12 = vpack.i.b16 %v4352_v61, %v4351_v42  ;;  %8190 = vst [vmem:[#allocation12_spill] sm:$0xff] %v6961_v9  ;;  %v4425_v10 = vcombine.high %v6961_v9, %v8189_v8  ;;  %v3086_v63 = vcombine.high %v3082_v0, %v8189_v8 }
 0x4e4   : > { %v3686_v61 = vcombine.high %v3665_v22, %v8187_v14  ;;  %v3685_v41 = vrot.slane %v3671_v59, %v8184_v29 }
 0x4e5   : > { %4105 = vrot.lane.b32.xlu1 %v6879_v60, %s5255_s8  ;;  %v4436_v21 = vrot.slane %v4353_v12, %v8184_v29  ;;  %v4429_v34 = vcombine.high %v4353_v12, %v8187_v14 }
 0x4e6   : > { %v3700_v12 = vrot.slane %v3686_v61, %v8184_v29 }
 0x4e7   : > { %4107 = vrot.lane.b32.xlu0 %v6886_v30, %s5255_s8  ;;  %v4459_v50 = vcombine.low %v4436_v21, %v4451_v15  ;;  %v4460_v23 = vcombine.high %v4436_v21, %v4451_v15  ;;  %v4443_v32 = vrot.slane %v4429_v34, %v8184_v29 }
 0x4e8   : > { %v3718_v15 = vcombine.high %v3685_v41, %v3700_v12 }
 0x4e9   : > { %4109 = vrot.lane.b32.xlu1 %v6892_v31, %s5255_s8  ;;  %v4467_v28 = vrot.slane %v4459_v50, %v8185_v49  ;;  %v4475_v62 = vcombine.low %v4443_v32, %v4458_v17  ;;  %v4474_v26 = vrot.slane %v4460_v23, %v8185_v49  ;;  %v4476_v5 = vcombine.high %v4443_v32, %v4458_v17 }
 0x4eb   : > { %3875 = vrot.lane.b32.xlu0 %v6871_v58, %s5254_s7  ;;  %v4491_v44 = vcombine.high %v4467_v28, %v8189_v8  ;;  %v4490_v53 = vrot.slane %v4476_v5, %v8185_v49  ;;  %v4492_v42 = vcombine.high %v4474_v26, %v8189_v8 }
 0x4ed   : > { %3877 = vrot.lane.b32.xlu1 %v6879_v60, %s5254_s7  ;;  %v3661_v60 = vpack.i.b16 %v3660_v43, %v3659_v20 }
 0x4ef   : > { %3879 = vrot.lane.b32.xlu0 %v6886_v30, %s5254_s7  ;;  %v3744_v4 = vrot.slane %v3661_v60, %v8184_v29  ;;  %v3737_v51 = vcombine.high %v3661_v60, %v8187_v14 }
 0x4f1   : > { %3881 = vrot.lane.b32.xlu1 %v6892_v31, %s5254_s7 }
 0x4f3   : > { %3097 = vrot.lane.b32.xlu0 %v3000_v38, %s5245_s26  ;;  %v4483_v38 = vrot.slane %v4475_v62, %v8185_v49 }
 0x4f5   : > { %3091 = vrot.lane.b32.xlu1 %v3017_v3, %s5247_s28  ;;  %v4409_v3 = vcombine.low %v4377_v33, %v4392_v13  ;;  %v3751_v13 = vrot.slane %v3737_v51, %v8184_v29 }
 0x4f7   : > { %3088 = vrot.lane.b32.xlu0 %v3059_v2, %s5249_s30  ;;  %v3667_v2 = vshrl.u32 %v6886_v30, 16  ;;  %v7001_v24 = vrot.slane %v4409_v3, %v8185_v49  ;;  %v3678_v30 = vrot.slane %v3657_v1, %v8184_v29 }
 0x4f9   : > { %3118 = vrot.lane.b32.xlu1 %v3016_v19, %s5245_s26  ;;  %v3669_v31 = vpack.i.b16 %v3668_v36, %v3667_v2  ;;  %v3693_v19 = vrot.slane %v3665_v22, %v8184_v29  ;;  %8191 = vst [vmem:[#allocation21_spill] sm:$0xff] %v7001_v24  ;;  %v4427_v58 = vcombine.high %v7001_v24, %v8189_v8 }
 0x4fb   : > { %3100 = vrot.lane.b32.xlu0 %v6932_v57, %s5243_s24  ;;  %v3702_v46 = vcombine.high %v3678_v30, %v3693_v19  ;;  %v3759_v25 = vrot.slane %v3669_v31, %v8184_v29  ;;  %v3701_v40 = vcombine.low %v3678_v30, %v3693_v19 }
 0x4fd   : > { %3103 = vrot.lane.b32.xlu1 %v3018_v47, %s5246_s27  ;;  %v4428_v47 = vcombine.high %v4424_v56, %v8189_v8  ;;  %v7016_v27 = vrot.slane %v3702_v46, %v8185_v49  ;;  %v7030_v18 = vrot.slane %v3701_v40, %v8185_v49  ;;  %v3768_v33 = vcombine.high %v3744_v4, %v3759_v25 }
 0x4ff   : > { %4505 = vrot.lane.b32.xlu0 %v4408_v52, %s5245_s26  ;;  %v3767_v52 = vcombine.low %v3744_v4, %v3759_v25  ;;  %v3733_v21 = vcombine.high %v7030_v18, %v8189_v8  ;;  %v7049_v11 = vrot.slane %v3768_v33, %v8185_v49 }
 0x501   : > { %3112 = vrot.lane.b32.xlu1 %v3019_v7, %s5247_s28  ;;  %v3752_v7 = vcombine.high %v3669_v31, %v8187_v14  ;;  %v3775_v39 = vrot.slane %v3767_v52, %v8185_v49 }
 0x503   : > { %3109 = vrot.lane.b32.xlu0 %v3075_v55, %s5249_s30  ;;  %v4493_v55 = vcombine.high %v4483_v38, %v8189_v8  ;;  %v3799_v54 = vcombine.high %v3775_v39, %v8189_v8 }
 0x505   : > { %3121 = vrot.lane.b32.xlu1 %v3082_v0, %s5243_s24  ;;  %v4494_v0 = vcombine.high %v4490_v53, %v8189_v8 }
 0x507   : > { %3094 = vrot.lane.b32.xlu0 %v3083_v6, %s5248_s29  ;;  %v3766_v6 = vrot.slane %v3752_v7, %v8184_v29 }
 0x509   : > { %3124 = vrot.lane.b32.xlu1 %v3020_v35, %s5246_s27  ;;  %v3732_v35 = vrot.slane %v3718_v15, %v8185_v49  ;;  %v3783_v50 = vcombine.low %v3751_v13, %v3766_v6 }
 0x50b   : > { %4499 = vrot.lane.b32.xlu0 %v4425_v10, %s5247_s28  ;;  %v3736_v34 = vcombine.high %v3732_v35, %v8189_v8  ;;  %v3791_v10 = vrot.slane %v3783_v50, %v8185_v49 }
 0x50d   : > { %4496 = vrot.lane.b32.xlu1 %v4467_v28, %s5249_s30  ;;  %v3717_v28 = vcombine.low %v3685_v41, %v3700_v12 }
 0x50f   : > { %4526 = vrot.lane.b32.xlu0 %v4424_v56, %s5245_s26  ;;  %v3801_v56 = vcombine.high %v3791_v10, %v8189_v8  ;;  %v7056_v32 = vrot.slane %v3717_v28, %v8185_v49 }
 0x511   : > { %4511 = vrot.lane.b32.xlu1 %v4426_v37, %s5246_s27  ;;  %v3735_v36 = vcombine.high %v7056_v32, %v8189_v8 }
 0x513   : > { %4508 = vrot.lane.b32.xlu0 %v4474_v26, %s5243_s24 }
 0x515   : > { %4517 = vrot.lane.b32.xlu1 %v4483_v38, %s5249_s30 }
 0x517   : > { %3115 = vrot.lane.b32.xlu0 %v3085_v48, %s5248_s29  ;;  %v3784_v48 = vcombine.high %v3751_v13, %v3766_v6 }
 0x519   : > { %4502 = vrot.lane.b32.xlu1 %v4491_v44, %s5248_s29 }
 0x51b   : > { %3127 = vrot.lane.b32.xlu0 %v3086_v63, %s5244_s25  ;;  %v7069_v63 = vrot.slane %v3784_v48, %v8185_v49 }
 0x51d   : > { %4529 = vrot.lane.b32.xlu1 %v4490_v53, %s5243_s24 }
 0x51f   : > { %4520 = vrot.lane.b32.xlu0 %v4427_v58, %s5247_s28 }
 0x521   : > { %4532 = vrot.lane.b32.xlu1 %v4428_v47, %s5246_s27 }
 0x523   : > { %3813 = vrot.lane.b32.xlu0 %v7016_v27, %s5245_s26 }
 0x525   : > { %4514 = vrot.lane.b32.xlu1 %v4492_v42, %s5244_s25 }
 0x527   : > { %3804 = vrot.lane.b32.xlu0 %v3775_v39, %s5249_s30 }
 0x529   : > { %4523 = vrot.lane.b32.xlu1 %v4493_v55, %s5248_s29 }
 0x52b   : > { %4535 = vrot.lane.b32.xlu0 %v4494_v0, %s5244_s25 }
 0x52d   : > { %3807 = vrot.lane.b32.xlu1 %v3733_v21, %s5247_s28 }
 0x52f   : > { %3810 = vrot.lane.b32.xlu0 %v3799_v54, %s5248_s29 }
 0x531   : > { %3834 = vrot.lane.b32.xlu1 %v3732_v35, %s5245_s26 }
 0x533   : > { %3840 = vrot.lane.b32.xlu0 %v3736_v34, %s5246_s27 }
 0x535   : > { %3816 = vrot.lane.b32.xlu1 %v7049_v11, %s5243_s24  ;;  %v3164_v17 = vpop.permute.xlu0 %3163 }
 0x536   : > { %v3175_v38 = vshrl.u32 %v3164_v17, 16 }
 0x537   : > { %v3166_v23 = vpop.permute.xlu1 %3165  ;;  %3831 = vrot.lane.b32.xlu0 %v3801_v56, %s5248_s29 }
 0x538   : > { %v3176_v37 = vshrl.u32 %v3166_v23, 16  ;;  %v3173_v26 = vpack.i.b16 %v3166_v23, %v3164_v17 }
 0x539   : > { %3825 = vrot.lane.b32.xlu1 %v3791_v10, %s5249_s30  ;;  %v3168_v62 = vpop.permute.xlu0 %3167 }
 0x53a   : > { %v7061_v43 = vpack.i.b16 %v3176_v37, %v3175_v38  ;;  %v3183_v1 = vshrl.u32 %v3168_v62, 16  ;;  %v3194_v5 = vrot.slane %v3173_v26, %v8184_v29  ;;  %v3187_v33 = vcombine.high %v3173_v26, %v8187_v14 }
 0x53b   : > { %v3170_v22 = vpop.permute.xlu1 %3169 }
 0x53c   : > { %v3181_v3 = vpack.i.b16 %v3170_v22, %v3168_v62  ;;  %v3184_v2 = vshrl.u32 %v3170_v22, 16  ;;  %v7073_v30 = vrot.slane %v7061_v43, %v8184_v29 }
 0x53d   : > { %3828 = vrot.lane.b32.xlu1 %v3735_v36, %s5247_s28  ;;  %v3392_v44 = vpop.permute.xlu0 %3391  ;;  %v7132_v36 = vrot.slane %v3187_v33, %v8184_v29 }
 0x53e   : > { %v3209_v20 = vrot.slane %v3181_v3, %v8184_v29  ;;  %v7066_v31 = vpack.i.b16 %v3184_v2, %v3183_v1  ;;  %v3403_v59 = vshrl.u32 %v3392_v44, 16  ;;  %v3202_v15 = vcombine.high %v3181_v3, %v8187_v14 }
 0x53f   : > { %v3394_v19 = vpop.permute.xlu1 %3393 }
 0x540   : > { %v3218_v60 = vcombine.high %v3194_v5, %v3209_v20  ;;  %v7077_v53 = vrot.slane %v7066_v31, %v8184_v29  ;;  %v3401_v58 = vpack.i.b16 %v3394_v19, %v3392_v44  ;;  %v3404_v25 = vshrl.u32 %v3394_v19, 16 }
 0x541   : > { %3837 = vrot.lane.b32.xlu1 %v7069_v63, %s5243_s24  ;;  %v3396_v46 = vpop.permute.xlu0 %3395  ;;  %v3217_v47 = vcombine.low %v3194_v5, %v3209_v20  ;;  %v7117_v23 = vrot.slane %v3202_v15, %v8184_v29 }
 0x542   : > { %v7082_v61 = vrot.slane %v3218_v60, %v8185_v49  ;;  %v3283_v52 = vcombine.low %v7073_v30, %v7077_v53  ;;  %v3411_v42 = vshrl.u32 %v3396_v46, 16  ;;  %v3422_v39 = vrot.slane %v3401_v58, %v8184_v29 }
 0x543   : > { %v3398_v4 = vpop.permute.xlu1 %3397  ;;  %v3405_v51 = vpack.i.b16 %v3404_v25, %v3403_v59  ;;  %v7100_v13 = vrot.slane %v3217_v47, %v8185_v49  ;;  %v3415_v54 = vcombine.high %v3401_v58, %v8187_v14  ;;  %v3234_v20 = vcombine.high %v7132_v36, %v7117_v23 }
 0x544   : > { %v3409_v40 = vpack.i.b16 %v3398_v4, %v3396_v46  ;;  %v3412_v7 = vshrl.u32 %v3398_v4, 16  ;;  %v7097_v21 = vrot.slane %v3283_v52, %v8185_v49  ;;  %v3284_v46 = vcombine.high %v7073_v30, %v7077_v53 }
 0x545   : > { %3329 = vrot.lane.b32.xlu1 %v7082_v61, %s5245_s26  ;;  %v7089_v12 = vpop.permute.xlu0 %4795  ;;  %v3488_v28 = vrot.slane %v3405_v51, %v8184_v29  ;;  %v3249_v62 = vcombine.high %v7100_v13, %v8189_v8  ;;  %v7127_v38 = vrot.slane %v3415_v54, %v8184_v29  ;;  %v3248_v52 = vrot.slane %v3234_v20, %v8185_v49 }
 0x546   : > { %v3413_v55 = vpack.i.b16 %v3412_v7, %v3411_v42  ;;  %v3430_v41 = vcombine.high %v3409_v40, %v8187_v14  ;;  %v3437_v0 = vrot.slane %v3409_v40, %v8184_v29  ;;  %v3481_v59 = vcombine.high %v3405_v51, %v8187_v14 }
 0x547   : > { %v7094_v6 = vpop.permute.xlu1 %4797  ;;  %v7186_v40 = vrot.slane %v3284_v46, %v8185_v49  ;;  %v3268_v54 = vcombine.high %v7066_v31, %v8187_v14 }
 0x548   : > { %v3445_v35 = vcombine.low %v3422_v39, %v3437_v0  ;;  %v3446_v50 = vcombine.high %v3422_v39, %v3437_v0  ;;  %v7105_v34 = vrot.slane %v3413_v55, %v8184_v29  ;;  %v7113_v17 = vrot.slane %v3430_v41, %v8184_v29 }
 0x549   : > { %3320 = vrot.lane.b32.xlu1 %v7097_v21, %s5249_s30  ;;  %v7109_v10 = vpop.permute.xlu0 %4799  ;;  %v7153_v19 = vpack.i.b16 %v7094_v6, %v7089_v12  ;;  %v3496_v25 = vcombine.high %v3413_v55, %v8187_v14  ;;  %v3495_v0 = vrot.slane %v3481_v59, %v8184_v29  ;;  %v3233_v59 = vcombine.low %v7132_v36, %v7117_v23 }
 0x54a   : > { %v3460_v56 = vrot.slane %v3446_v50, %v8185_v49  ;;  %v7124_v26 = vrot.slane %v3445_v35, %v8185_v49  ;;  %v3511_v22 = vcombine.low %v3488_v28, %v7105_v34  ;;  %v3462_v1 = vcombine.high %v7127_v38, %v7113_v17 }
 0x54b   : > { %v7119_v37 = vpop.permute.xlu1 %4801  ;;  %v7176_v42 = vrot.slane %v7153_v19, %v8184_v29  ;;  %v3510_v7 = vrot.slane %v3496_v25, %v8184_v29  ;;  %v3250_v50 = vcombine.high %v7082_v61, %v8189_v8  ;;  %v3512_v33 = vcombine.high %v3488_v28, %v7105_v34 }
 0x54c   : > { %3557 = vrot.lane.b32.xlu0 %v3460_v56, %s5245_s26  ;;  %v3477_v3 = vcombine.high %v7124_v26, %v8189_v8  ;;  %v7143_v2 = vpack.i.b16 %v7119_v37, %v7109_v10  ;;  %v3519_v5 = vrot.slane %v3511_v22, %v8185_v49  ;;  %v7159_v58 = vrot.slane %v3462_v1, %v8185_v49 }
 0x54d   : > { %3323 = vrot.lane.b32.xlu1 %v3249_v62, %s5247_s28  ;;  %v7135_v48 = vpop.permute.xlu0 %4567  ;;  %v3478_v55 = vcombine.high %v3460_v56, %v8189_v8  ;;  %v3527_v22 = vcombine.low %v3495_v0, %v3510_v7  ;;  %v7228_v34 = vrot.slane %v3268_v54, %v8184_v29  ;;  %v3526_v1 = vrot.slane %v3512_v33, %v8185_v49 }
 0x54e   : > { %v7166_v47 = vrot.slane %v7143_v2, %v8184_v29  ;;  %v7263_v36 = vrot.slane %v3233_v59, %v8185_v49 }
 0x54f   : > { %v7145_v44 = vpop.permute.xlu1 %4569 }
 0x550   : > { %3551 = vrot.lane.b32.xlu0 %v3477_v3, %s5247_s28  ;;  %v4850_v39 = vcombine.high %v7176_v42, %v7166_v47  ;;  %v7196_v41 = vpack.i.b16 %v7145_v44, %v7135_v48  ;;  %v3253_v3 = vcombine.high %v7061_v43, %v8187_v14  ;;  %v7235_v43 = vrot.slane %v3527_v22, %v8185_v49 }
 0x551   : > { %3548 = vrot.lane.b32.xlu1 %v3519_v5, %s5249_s30  ;;  %v7156_v60 = vpop.permute.xlu0 %4571  ;;  %v3461_v22 = vcombine.low %v7127_v38, %v7113_v17  ;;  %v3251_v17 = vcombine.high %v7263_v36, %v8189_v8 }
 0x552   : > { %v7216_v62 = vrot.slane %v4850_v39, %v8185_v49  ;;  %v4598_v31 = vrot.slane %v7196_v41, %v8184_v29  ;;  %v3267_v46 = vrot.slane %v3253_v3, %v8184_v29 }
 0x553   : > { %v7168_v4 = vpop.permute.xlu1 %4573  ;;  %v7276_v38 = vrot.slane %v3461_v22, %v8185_v49 }
 0x554   : > { %3578 = vrot.lane.b32.xlu0 %v7159_v58, %s5245_s26  ;;  %v7183_v53 = vpack.i.b16 %v7168_v4, %v7156_v60  ;;  %v4588_v22 = vshrl.u32 %v7168_v4, 16  ;;  %v4580_v4 = vshrl.u32 %v7145_v44, 16 }
 0x555   : > { %3350 = vrot.lane.b32.xlu1 %v3248_v52, %s5245_s26  ;;  %v7179_v30 = vpop.permute.xlu0 %4103 }
 0x556   : > { %v7208_v35 = vrot.slane %v7183_v53, %v8184_v29 }
 0x557   : > { %v7191_v51 = vpop.permute.xlu1 %4105 }
 0x558   : > { %3332 = vrot.lane.b32.xlu0 %v7186_v40, %s5243_s24  ;;  %v4622_v28 = vcombine.high %v4598_v31, %v7208_v35 }
 0x559   : > { %3563 = vrot.lane.b32.xlu1 %v3478_v55, %s5246_s27  ;;  %v7202_v15 = vpop.permute.xlu0 %4107  ;;  %v3299_v55 = vcombine.low %v3267_v46, %v7228_v34 }
 0x55a   : > { %v7246_v39 = vrot.slane %v4622_v28, %v8185_v49  ;;  %v3528_v28 = vcombine.high %v3495_v0, %v3510_v7  ;;  %v4816_v7 = vshrl.u32 %v7119_v37, 16  ;;  %v3479_v0 = vcombine.high %v7276_v38, %v8189_v8 }
 0x55b   : > { %v7213_v56 = vpop.permute.xlu1 %4109  ;;  %v7260_v23 = vrot.slane %v3299_v55, %v8185_v49  ;;  %v4807_v37 = vshrl.u32 %v7089_v12, 16 }
 0x55c   : > { %3335 = vrot.lane.b32.xlu0 %v3250_v50, %s5246_s27  ;;  %v3543_v50 = vcombine.high %v3519_v5, %v8189_v8  ;;  %v3252_v5 = vcombine.high %v3248_v52, %v8189_v8  ;;  %v7281_v55 = vrot.slane %v3528_v28, %v8185_v49  ;;  %v4621_v28 = vcombine.low %v4598_v31, %v7208_v35 }
 0x55d   : > { %4961 = vrot.lane.b32.xlu1 %v7216_v62, %s5245_s26  ;;  %v7225_v61 = vpop.permute.xlu0 %3875  ;;  %v4587_v35 = vshrl.u32 %v7156_v60, 16  ;;  %v3544_v60 = vcombine.high %v3526_v1, %v8189_v8 }
 0x55f   : > { %v7232_v20 = vpop.permute.xlu1 %3877  ;;  %v4589_v12 = vpack.i.b16 %v4588_v22, %v4587_v35 }
 0x560   : > { %3560 = vrot.lane.b32.xlu0 %v3526_v1, %s5243_s24 }
 0x561   : > { %3569 = vrot.lane.b32.xlu1 %v7235_v43, %s5249_s30  ;;  %v7241_v25 = vpop.permute.xlu0 %3879  ;;  %v4679_v1 = vrot.slane %v4589_v12, %v8184_v29 }
 0x563   : > { %v7249_v54 = vpop.permute.xlu1 %3881 }
 0x564   : > { %4733 = vrot.lane.b32.xlu0 %v7246_v39, %s5245_s26 }
 0x565   : > { %3554 = vrot.lane.b32.xlu1 %v3543_v50, %s5248_s29  ;;  %v7255_v33 = vpop.permute.xlu0 %3097 }
 0x566   : > { %8192 = vst [vmem:[#allocation18_spill] sm:$0xff] %v7255_v33 }
 0x567   : > { %v7265_v3 = vpop.permute.xlu1 %3091 }
 0x568   : > { %8193 = vst [vmem:[#allocation19_spill] sm:$0xff] %v7265_v3  ;;  %3341 = vrot.lane.b32.xlu0 %v7260_v23, %s5249_s30  ;;  %v4808_v3 = vshrl.u32 %v7094_v6, 16  ;;  %v4579_v6 = vshrl.u32 %v7135_v48, 16 }
 0x569   : > { %3356 = vrot.lane.b32.xlu1 %v3252_v5, %s5246_s27  ;;  %v7271_v50 = vpop.permute.xlu0 %3088  ;;  %v4606_v5 = vcombine.high %v7183_v53, %v8187_v14  ;;  %v4591_v53 = vcombine.high %v7196_v41, %v8187_v14  ;;  %v7321_v41 = vrot.slane %v4621_v28, %v8185_v49 }
 0x56a   : > { %8194 = vst [vmem:[#allocation20_spill] sm:$0xff] %v7271_v50  ;;  %v4581_v48 = vpack.i.b16 %v4580_v4, %v4579_v6  ;;  %v4849_v4 = vcombine.low %v7176_v42, %v7166_v47  ;;  %v4834_v47 = vcombine.high %v7143_v2, %v8187_v14 }
 0x56b   : > { %v7278_v59 = vpop.permute.xlu1 %3118  ;;  %v7315_v44 = vrot.slane %v4606_v5, %v8184_v29 }
 0x56c   : > { %3344 = vrot.lane.b32.xlu0 %v3251_v17, %s5247_s28  ;;  %v3480_v17 = vcombine.high %v7159_v58, %v8189_v8  ;;  %v4664_v28 = vrot.slane %v4581_v48, %v8184_v29 }
 0x56d   : > { %3581 = vrot.lane.b32.xlu1 %v7281_v55, %s5243_s24  ;;  %v7286_v52 = vpop.permute.xlu0 %3100 }
 0x56e   : > { %8195 = vst [vmem:[#allocation25_spill] sm:$0xff] %v7286_v52  ;;  %v4815_v52 = vshrl.u32 %v7109_v10, 16  ;;  %v3315_v10 = vcombine.high %v7097_v21, %v8189_v8 }
 0x56f   : > { %v7295_v33 = vpop.permute.xlu1 %3103 }
 0x570   : > { %8196 = vst [vmem:[#allocation23_spill] sm:$0xff] %v7295_v33  ;;  %3572 = vrot.lane.b32.xlu0 %v3479_v0, %s5247_s28  ;;  %v4817_v58 = vpack.i.b16 %v4816_v7, %v4815_v52  ;;  %v3300_v0 = vcombine.high %v3267_v46, %v7228_v34  ;;  %v7325_v52 = vrot.slane %v4591_v53, %v8184_v29 }
 0x571   : > { %3584 = vrot.lane.b32.xlu1 %v3480_v17, %s5246_s27  ;;  %v7308_v31 = vpop.permute.xlu0 %4505  ;;  %v4809_v17 = vpack.i.b16 %v4808_v3, %v4807_v37  ;;  %v4653_v3 = vcombine.high %v7321_v41, %v8189_v8  ;;  %v3316_v53 = vcombine.high %v7186_v40, %v8189_v8  ;;  %v7368_v40 = vrot.slane %v4849_v4, %v8185_v49 }
 0x572   : > { %8197 = vst [vmem:[#allocation13_spill] sm:$0xff] %v7308_v31  ;;  %v7331_v34 = vrot.slane %v4817_v58, %v8184_v29  ;;  %v3314_v46 = vrot.slane %v3300_v0, %v8185_v49  ;;  %v4638_v22 = vcombine.high %v7325_v52, %v7315_v44  ;;  %v4688_v0 = vcombine.high %v4664_v28, %v4679_v1 }
 0x573   : > { %v7317_v33 = vpop.permute.xlu1 %3112  ;;  %v4892_v5 = vrot.slane %v4809_v17, %v8184_v29  ;;  %v4885_v2 = vcombine.high %v4809_v17, %v8187_v14  ;;  %v3545_v17 = vcombine.high %v7235_v43, %v8189_v8 }
 0x574   : > { %3326 = vrot.lane.b32.xlu0 %v3315_v10, %s5248_s29  ;;  %v7355_v10 = vrot.slane %v4638_v22, %v8185_v49 }
 0x575   : > { %3566 = vrot.lane.b32.xlu1 %v3544_v60, %s5244_s25  ;;  %v7328_v21 = vpop.permute.xlu0 %3109  ;;  %v4915_v35 = vcombine.low %v4892_v5, %v7331_v34 }
 0x577   : > { %v7335_v7 = vpop.permute.xlu1 %3121  ;;  %v7365_v42 = vrot.slane %v4915_v35, %v8185_v49  ;;  %v4881_v35 = vcombine.high %v7368_v40, %v8189_v8 }
 0x578   : > { %3353 = vrot.lane.b32.xlu0 %v3314_v46, %s5243_s24 }
 0x579   : > { %4727 = vrot.lane.b32.xlu1 %v4653_v3, %s5247_s28  ;;  %v7345_v37 = vpop.permute.xlu0 %3094  ;;  %v4900_v3 = vcombine.high %v4817_v58, %v8187_v14  ;;  %v4848_v58 = vrot.slane %v4834_v47, %v8184_v29  ;;  %v4899_v47 = vrot.slane %v4885_v2, %v8184_v29 }
 0x57a   : > { %8198 = vst [vmem:[#allocation11_spill] sm:$0xff] %v7345_v37  ;;  %v4819_v37 = vcombine.high %v7153_v19, %v8187_v14  ;;  %v4672_v19 = vcombine.high %v4589_v12, %v8187_v14 }
 0x57b   : > { %v7352_v6 = vpop.permute.xlu1 %3124  ;;  %v7389_v45 = vrot.slane %v4900_v3, %v8184_v29 }
 0x57c   : > { %3338 = vrot.lane.b32.xlu0 %v3316_v53, %s5244_s25  ;;  %v7374_v53 = vrot.slane %v4688_v0, %v8185_v49  ;;  %v4687_v0 = vcombine.low %v4664_v28, %v4679_v1  ;;  %v4833_v24 = vrot.slane %v4819_v37, %v8184_v29  ;;  %v7407_v3 = vrot.slane %v4672_v19, %v8184_v29 }
 0x57d   : > { %4754 = vrot.lane.b32.xlu1 %v7355_v10, %s5245_s26  ;;  %v7360_v60 = vpop.permute.xlu0 %4499  ;;  %v3318_v37 = vcombine.high %v3314_v46, %v8189_v8  ;;  %v4916_v19 = vcombine.high %v4892_v5, %v7331_v34  ;;  %v7445_v34 = vpack.i.b16 %v7213_v56, %v7202_v15 }
 0x57e   : > { %8199 = vst [vmem:[#allocation22_spill] sm:$0xff] %v7360_v60  ;;  %v7404_v28 = vrot.slane %v4687_v0, %v8185_v49  ;;  %v4866_v12 = vcombine.high %v4833_v24, %v4848_v58  ;;  %v4932_v60 = vcombine.high %v4899_v47, %v7389_v45 }
 0x57f   : > { %v7371_v22 = vpop.permute.xlu1 %4496 }
 0x580   : > { %8200 = vst [vmem:[#allocation10_spill] sm:$0xff] %v7371_v22  ;;  %4952 = vrot.lane.b32.xlu0 %v7365_v42, %s5249_s30  ;;  %v7422_v0 = vrot.slane %v4866_v12, %v8185_v49  ;;  %v7439_v12 = vrot.slane %v4916_v19, %v8185_v49 }
 0x581   : > { %4736 = vrot.lane.b32.xlu1 %v7374_v53, %s5243_s24  ;;  %v7383_v4 = vpop.permute.xlu0 %4526 }
 0x582   : > { %8201 = vst [vmem:[#allocation28_spill] sm:$0xff] %v7383_v4  ;;  %v4657_v4 = vcombine.high %v4581_v48, %v8187_v14  ;;  %v4884_v9 = vcombine.high %v7422_v0, %v8189_v8 }
 0x583   : > { %v7392_v50 = vpop.permute.xlu1 %4511 }
 0x584   : > { %8202 = vst [vmem:[#allocation7_spill] sm:$0xff] %v7392_v50  ;;  %4955 = vrot.lane.b32.xlu0 %v4881_v35, %s5247_s28  ;;  %v4931_v35 = vcombine.low %v4899_v47, %v7389_v45  ;;  %v7416_v48 = vrot.slane %v4657_v4, %v8184_v29  ;;  %v7516_v45 = vrot.slane %v4932_v60, %v8185_v49 }
 0x585   : > { %3575 = vrot.lane.b32.xlu1 %v3545_v17, %s5248_s29  ;;  %v7401_v1 = vpop.permute.xlu0 %4508  ;;  %v4865_v17 = vcombine.low %v4833_v24, %v4848_v58  ;;  %v4637_v24 = vcombine.low %v7325_v52, %v7315_v44  ;;  %v4882_v52 = vcombine.high %v7216_v62, %v8189_v8 }
 0x586   : > { %8203 = vst [vmem:[#allocation27_spill] sm:$0xff] %v7401_v1  ;;  %v7428_v46 = vrot.slane %v4931_v35, %v8185_v49  ;;  %v7459_v35 = vpack.i.b16 %v7191_v51, %v7179_v30  ;;  %v4654_v1 = vcombine.high %v7246_v39, %v8189_v8  ;;  %v4704_v47 = vcombine.high %v7416_v48, %v7407_v3 }
 0x587   : > { %v7409_v43 = vpop.permute.xlu1 %4517 }
 0x588   : > { %8204 = vst [vmem:[#allocation29_spill] sm:$0xff] %v7409_v43  ;;  %4724 = vrot.lane.b32.xlu0 %v7404_v28, %s5249_s30  ;;  %v4703_v43 = vcombine.low %v7416_v48, %v7407_v3  ;;  %v4947_v48 = vcombine.high %v7365_v42, %v8189_v8  ;;  %v4123_v42 = vshrl.u32 %v7202_v15, 16 }
 0x589   : > { %3359 = vrot.lane.b32.xlu1 %v3318_v37, %s5244_s25  ;;  %v7419_v2 = vpop.permute.xlu0 %3115  ;;  %v7453_v37 = vrot.slane %v4865_v17, %v8185_v49 }
 0x58a   : > { %v7450_v58 = vrot.slane %v4703_v43, %v8185_v49  ;;  %v7469_v43 = vrot.slane %v7445_v34, %v8184_v29 }
 0x58b   : > { %v7425_v50 = vpop.permute.xlu1 %4502  ;;  %v4883_v17 = vcombine.high %v7453_v37, %v8189_v8 }
 0x58c   : > { %8205 = vst [vmem:[#allocation14_spill] sm:$0xff] %v7425_v50  ;;  %4982 = vrot.lane.b32.xlu0 %v7422_v0, %s5245_s26 }
 0x58d   : > { %4973 = vrot.lane.b32.xlu1 %v7428_v46, %s5249_s30  ;;  %v7436_v4 = vpop.permute.xlu0 %3127 }
 0x58f   : > { %v7447_v5 = vpop.permute.xlu1 %4529 }
 0x590   : > { %8206 = vst [vmem:[#allocation17_spill] sm:$0xff] %v7447_v5  ;;  %4964 = vrot.lane.b32.xlu0 %v7439_v12, %s5243_s24  ;;  %v7476_v5 = vrot.slane %v4637_v24, %v8185_v49 }
 0x591   : > { %4745 = vrot.lane.b32.xlu1 %v7450_v58, %s5249_s30  ;;  %v7463_v44 = vpop.permute.xlu0 %4520 }
 0x592   : > { %8207 = vst [vmem:[#allocation31_spill] sm:$0xff] %v7463_v44  ;;  %v7481_v44 = vrot.slane %v7459_v35, %v8184_v29  ;;  %v4655_v24 = vcombine.high %v7476_v5, %v8189_v8 }
 0x593   : > { %v7471_v19 = vpop.permute.xlu1 %4532 }
 0x594   : > { %8208 = vst [vmem:[#allocation24_spill] sm:$0xff] %v7471_v19  ;;  %4967 = vrot.lane.b32.xlu0 %v4882_v52, %s5246_s27  ;;  %v4158_v19 = vcombine.high %v7481_v44, %v7469_v43 }
 0x595   : > { %4976 = vrot.lane.b32.xlu1 %v4883_v17, %s5247_s28  ;;  %v3814_v62 = vpop.permute.xlu0 %3813  ;;  %v3317_v17 = vcombine.high %v7260_v23, %v8189_v8  ;;  %v3546_v23 = vcombine.high %v7281_v55, %v8189_v8 }
 0x596   : > { %v7499_v39 = vrot.slane %v4158_v19, %v8185_v49 }
 0x597   : > { %v7488_v31 = vpop.permute.xlu1 %4514 }
 0x598   : > { %8209 = vst [vmem:[#allocation58_spill] sm:$0xff] %v7488_v31  ;;  %4739 = vrot.lane.b32.xlu0 %v4654_v1, %s5246_s27  ;;  %v7509_v1 = vpack.i.b16 %v7249_v54, %v7241_v25 }
 0x599   : > { %4748 = vrot.lane.b32.xlu1 %v4655_v24, %s5247_s28  ;;  %v3805_v52 = vpop.permute.xlu0 %3804 }
 0x59a   : > { %v3847_v19 = vsel %vm677_vm7, %v7030_v18, %v3805_v52  ;;  %v3896_v18 = vshrl.u32 %v7249_v54, 16  ;;  %v7531_v60 = vrot.slane %v7509_v1, %v8184_v29  ;;  %v4124_v52 = vshrl.u32 %v7213_v56, 16 }
 0x59b   : > { %v7496_v50 = vpop.permute.xlu1 %4523  ;;  %v3887_v56 = vshrl.u32 %v7225_v61, 16 }
 0x59c   : > { %8210 = vst [vmem:[#allocation35_spill] sm:$0xff] %v7496_v50  ;;  %3347 = vrot.lane.b32.xlu0 %v3317_v17, %s5248_s29  ;;  %v7522_v17 = vpack.i.b16 %v7232_v20, %v7225_v61  ;;  %v3895_v50 = vshrl.u32 %v7241_v25, 16  ;;  %v4115_v25 = vshrl.u32 %v7179_v30, 16 }
 0x59d   : > { %4269 = vrot.lane.b32.xlu1 %v7499_v39, %s5245_s26  ;;  %v7505_v31 = vpop.permute.xlu0 %4535 }
 0x59e   : > { %8211 = vst [vmem:[#allocation57_spill] sm:$0xff] %v7505_v31  ;;  %v7543_v54 = vrot.slane %v7522_v17, %v8184_v29 }
 0x59f   : > { %v3808_v24 = vpop.permute.xlu1 %3807 }
 0x5a0   : > { %v3849_v31 = vsel %vm681_vm8, %v3847_v19, %v3808_v24  ;;  %3587 = vrot.lane.b32.xlu0 %v3546_v23, %s5244_s25  ;;  %v7538_v23 = vrot.slane %v4704_v47, %v8185_v49  ;;  %v3888_v24 = vshrl.u32 %v7232_v20, 16  ;;  %v7552_v47 = vpack.i.b16 %v3896_v18, %v3895_v50 }
 0x5a1   : > { %4985 = vrot.lane.b32.xlu1 %v7516_v45, %s5243_s24  ;;  %v3811_v55 = vpop.permute.xlu0 %3810  ;;  %v3930_v20 = vcombine.high %v7543_v54, %v7531_v60 }
 0x5a2   : > { %v3851_v3 = vsel %vm684_vm9, %v3849_v31, %v3811_v55  ;;  %v4116_v31 = vshrl.u32 %v7191_v51, 16  ;;  %v4719_v55 = vcombine.high %v7404_v28, %v8189_v8  ;;  %v7564_v22 = vpack.i.b16 %v3888_v24, %v3887_v56 }
 0x5a3   : > { %v3835_v19 = vpop.permute.xlu1 %3834  ;;  %v3853_v15 = vsel %vm687_vm10, %v3851_v3, %v3814_v62  ;;  %v7575_v30 = vrot.slane %v7552_v47, %v8184_v29  ;;  %v7578_v62 = vrot.slane %v3930_v20, %v8185_v49  ;;  %v4948_v3 = vcombine.high %v7439_v12, %v8189_v8 }
 0x5a4   : > { %4958 = vrot.lane.b32.xlu0 %v4947_v48, %s5248_s29  ;;  %v7559_v48 = vpack.i.b16 %v4124_v52, %v4123_v42  ;;  %v7570_v50 = vpack.i.b16 %v4116_v31, %v4115_v25  ;;  %v3972_v52 = vrot.slane %v7564_v22, %v8184_v29  ;;  %v4142_v24 = vcombine.high %v7445_v34, %v8187_v14 }
 0x5a5   : > { %4757 = vrot.lane.b32.xlu1 %v7538_v23, %s5243_s24  ;;  %v3841_v28 = vpop.permute.xlu0 %3840  ;;  %v4656_v31 = vcombine.high %v7355_v10, %v8189_v8  ;;  %v4157_v12 = vcombine.low %v7481_v44, %v7469_v43  ;;  %v4127_v10 = vcombine.high %v7459_v35, %v8187_v14 }
 0x5a6   : > { %v4215_v0 = vrot.slane %v7559_v48, %v8184_v29  ;;  %v3995_v42 = vcombine.low %v3972_v52, %v7575_v30 }
 0x5a7   : > { %v3817_v51 = vpop.permute.xlu1 %3816 }
 0x5a8   : > { %v7567_v61 = vsel %vm690_vm11, %v3853_v15, %v3817_v51  ;;  %4730 = vrot.lane.b32.xlu0 %v4719_v55, %s5248_s29  ;;  %v4720_v55 = vcombine.high %v7374_v53, %v8189_v8  ;;  %v7613_v53 = vrot.slane %v4142_v24, %v8184_v29 }
 0x5a9   : > { %4988 = vrot.lane.b32.xlu1 %v4884_v9, %s5246_s27  ;;  %v4200_v9 = vrot.slane %v7570_v50, %v8184_v29  ;;  %v3832_v51 = vpop.permute.xlu0 %3831 }
 0x5ab   : > { %v3826_v18 = vpop.permute.xlu1 %3825  ;;  %v4223_v25 = vcombine.low %v4200_v9, %v4215_v0 }
 0x5ac   : > { %4041 = vrot.lane.b32.xlu0 %v7578_v62, %s5245_s26  ;;  %v3862_v56 = vsel %vm677_vm7, %v7056_v32, %v3826_v18  ;;  %v7610_v32 = vrot.slane %v3995_v42, %v8185_v49  ;;  %v4224_v42 = vcombine.high %v4200_v9, %v4215_v0 }
 0x5ad   : > { %4970 = vrot.lane.b32.xlu1 %v4948_v3, %s5244_s25  ;;  %v7616_v18 = vrot.slane %v4223_v25, %v8185_v49  ;;  %v7619_v3 = vrot.slane %v4157_v12, %v8185_v49  ;;  %v3899_v25 = vcombine.high %v7522_v17, %v8187_v14  ;;  %v4949_v17 = vcombine.high %v7428_v46, %v8189_v8 }
 0x5af   : > { %v3829_v20 = vpop.permute.xlu1 %3828  ;;  %v4189_v12 = vcombine.high %v7619_v3, %v8189_v8 }
 0x5b0   : > { %v3864_v15 = vsel %vm681_vm8, %v3862_v56, %v3829_v20  ;;  %4760 = vrot.lane.b32.xlu0 %v4656_v31, %s5246_s27  ;;  %v4721_v31 = vcombine.high %v7450_v58, %v8189_v8  ;;  %v3929_v58 = vcombine.low %v7543_v54, %v7531_v60  ;;  %v4190_v60 = vcombine.high %v7499_v39, %v8189_v8 }
 0x5b1   : > { %v3866_v34 = vsel %vm684_vm9, %v3864_v15, %v3832_v51  ;;  %4742 = vrot.lane.b32.xlu1 %v4720_v55, %s5244_s25  ;;  %v7640_v55 = vrot.slane %v4224_v42, %v8185_v49  ;;  %v4208_v51 = vcombine.high %v7559_v48, %v8187_v14  ;;  %v3996_v54 = vcombine.high %v3972_v52, %v7575_v30 }
 0x5b2   : > { %v3868_v44 = vsel %vm687_vm10, %v3866_v34, %v3835_v19  ;;  %v4141_v19 = vrot.slane %v4127_v10, %v8184_v29  ;;  %v4193_v48 = vcombine.high %v7570_v50, %v8187_v14  ;;  %v3913_v39 = vrot.slane %v3899_v25, %v8184_v29 }
 0x5b3   : > { %v3838_v43 = vpop.permute.xlu1 %3837  ;;  %v7680_v46 = vrot.slane %v3996_v54, %v8185_v49 }
 0x5b4   : > { %v3870_v35 = vsel %vm690_vm11, %v3868_v44, %v3838_v43  ;;  %4032 = vrot.lane.b32.xlu0 %v7610_v32, %s5249_s30  ;;  %v4174_v20 = vcombine.high %v4141_v19, %v7613_v53  ;;  %v7668_v44 = vrot.slane %v3929_v58, %v8185_v49 }
 0x5b5   : > { %4260 = vrot.lane.b32.xlu1 %v7616_v18, %s5249_s30  ;;  %v7628_v24 = vsel %vm693_vm12, %v3870_v35, %v3841_v28  ;;  %v3914_v28 = vcombine.high %v7509_v1, %v8187_v14 }
 0x5b6   : > { %v7647_v9 = vrot.slane %v4174_v20, %v8185_v49  ;;  %v3961_v35 = vcombine.high %v7668_v44, %v8189_v8  ;;  %v4173_v20 = vcombine.low %v4141_v19, %v7613_v53 }
 0x5b7   : > { %v7632_v56 = vpop.permute.xlu1 %3329  ;;  %v3928_v15 = vrot.slane %v3914_v28, %v8184_v29  ;;  %v3980_v28 = vcombine.high %v7552_v47, %v8187_v14 }
 0x5b8   : > { %4751 = vrot.lane.b32.xlu0 %v4721_v31, %s5248_s29  ;;  %v4207_v31 = vrot.slane %v4193_v48, %v8184_v29 }
 0x5b9   : > { %4263 = vrot.lane.b32.xlu1 %v4189_v12, %s5247_s28  ;;  %v3946_v50 = vcombine.high %v3913_v39, %v3928_v15  ;;  %v3994_v53 = vrot.slane %v3980_v28, %v8184_v29  ;;  %v3945_v54 = vcombine.low %v3913_v39, %v3928_v15  ;;  %v4722_v15 = vcombine.high %v7538_v23, %v8189_v8 }
 0x5ba   : > { %v4255_v23 = vcombine.high %v7616_v18, %v8189_v8  ;;  %v4192_v28 = vcombine.high %v7647_v9, %v8189_v8 }
 0x5bb   : > { %v3321_v0 = vpop.permute.xlu1 %3320  ;;  %v7727_v39 = vrot.slane %v3945_v54, %v8185_v49 }
 0x5bc   : > { %4272 = vrot.lane.b32.xlu0 %v7640_v55, %s5243_s24  ;;  %v3363_v10 = vsel %vm677_vm7, %v7100_v13, %v3321_v0  ;;  %v4222_v13 = vrot.slane %v4208_v51, %v8184_v29  ;;  %v4950_v0 = vcombine.high %v7516_v45, %v8189_v8  ;;  %v7712_v45 = vrot.slane %v4173_v20, %v8185_v49 }
 0x5bd   : > { %4290 = vrot.lane.b32.xlu1 %v7647_v9, %s5245_s26 }
 0x5be   : > { %v7657_v1 = vpop.permute.xlu0 %3557  ;;  %v4239_v25 = vcombine.low %v4207_v31, %v4222_v13 }
 0x5bf   : > { %v3324_v34 = vpop.permute.xlu1 %3323 }
 0x5c0   : > { %v7673_v43 = vsel %vm681_vm8, %v3363_v10, %v3324_v34  ;;  %4275 = vrot.lane.b32.xlu0 %v4190_v60, %s5246_s27  ;;  %v3965_v60 = vcombine.high %v7564_v22, %v8187_v14  ;;  %v7709_v19 = vrot.slane %v4239_v25, %v8185_v49  ;;  %v3962_v34 = vcombine.high %v7578_v62, %v8189_v8 }
 0x5c1   : > { %4979 = vrot.lane.b32.xlu1 %v4949_v17, %s5248_s29  ;;  %v4191_v17 = vcombine.high %v7712_v45, %v8189_v8 }
 0x5c2   : > { %v3552_v30 = vpop.permute.xlu0 %3551  ;;  %v3979_v14 = vrot.slane %v3965_v60, %v8184_v29 }
 0x5c3   : > { %v3549_v52 = vpop.permute.xlu1 %3548 }
 0x5c4   : > { %v3591_v42 = vsel %vm677_vm7, %v7124_v26, %v3549_v52  ;;  %4044 = vrot.lane.b32.xlu0 %v7680_v46, %s5243_s24  ;;  %v3960_v26 = vrot.slane %v3946_v50, %v8185_v49  ;;  %v4011_v48 = vcombine.low %v3979_v14, %v3994_v53 }
 0x5c5   : > { %4035 = vrot.lane.b32.xlu1 %v3961_v35, %s5247_s28  ;;  %v3593_v12 = vsel %vm681_vm8, %v3591_v42, %v3552_v30  ;;  %v3963_v35 = vcombine.high %v7727_v39, %v8189_v8  ;;  %v4240_v42 = vcombine.high %v4207_v31, %v4222_v13 }
 0x5c6   : > { %v7694_v58 = vpop.permute.xlu0 %3578  ;;  %v4019_v62 = vrot.slane %v4011_v48, %v8185_v49  ;;  %v3964_v48 = vcombine.high %v3960_v26, %v8189_v8 }
 0x5c7   : > { %v7698_v51 = vpop.permute.xlu1 %3350 }
 0x5c8   : > { %4991 = vrot.lane.b32.xlu0 %v4950_v0, %s5244_s25  ;;  %v4012_v0 = vcombine.high %v3979_v14, %v3994_v53  ;;  %v4027_v53 = vcombine.high %v7610_v32, %v8189_v8 }
 0x5c9   : > { %4062 = vrot.lane.b32.xlu1 %v3960_v26, %s5245_s26 }
 0x5ca   : > { %v7706_v47 = vpop.permute.xlu0 %3332  ;;  %v4026_v31 = vrot.slane %v4012_v0, %v8185_v49 }
 0x5cb   : > { %v3564_v10 = vpop.permute.xlu1 %3563 }
 0x5cc   : > { %4281 = vrot.lane.b32.xlu0 %v7709_v19, %s5249_s30 }
 0x5cd   : > { %4047 = vrot.lane.b32.xlu1 %v3962_v34, %s5246_s27  ;;  %v4254_v34 = vrot.slane %v4240_v42, %v8185_v49 }
 0x5ce   : > { %v3336_v22 = vpop.permute.xlu0 %3335 }
 0x5cf   : > { %v7722_v30 = vpop.permute.xlu1 %4961 }
 0x5d0   : > { %4284 = vrot.lane.b32.xlu0 %v4191_v17, %s5247_s28 }
 0x5d1   : > { %4763 = vrot.lane.b32.xlu1 %v4722_v15, %s5244_s25 }
 0x5d2   : > { %v3561_v29 = vpop.permute.xlu0 %3560 }
 0x5d3   : > { %v3570_v52 = vpop.permute.xlu1 %3569 }
 0x5d4   : > { %4053 = vrot.lane.b32.xlu0 %v4019_v62, %s5249_s30  ;;  %v3606_v49 = vsel %vm677_vm7, %v7276_v38, %v3570_v52 }
 0x5d5   : > { %4056 = vrot.lane.b32.xlu1 %v3963_v35, %s5247_s28  ;;  %v4028_v35 = vcombine.high %v7680_v46, %v8189_v8 }
 0x5d6   : > { %v7736_v50 = vpop.permute.xlu0 %4733 }
 0x5d7   : > { %v3555_v20 = vpop.permute.xlu1 %3554 }
 0x5d8   : > { %v3595_v25 = vsel %vm684_vm9, %v3593_v12, %v3555_v20  ;;  %4266 = vrot.lane.b32.xlu0 %v4255_v23, %s5248_s29 }
 0x5d9   : > { %v3597_v60 = vsel %vm687_vm10, %v3595_v25, %v7657_v1  ;;  %4296 = vrot.lane.b32.xlu1 %v4192_v28, %s5246_s27  ;;  %v4029_v25 = vcombine.high %v4019_v62, %v8189_v8 }
 0x5da   : > { %v3342_v54 = vpop.permute.xlu0 %3341  ;;  %v3599_v18 = vsel %vm690_vm11, %v3597_v60, %v3561_v29  ;;  %v4258_v29 = vcombine.high %v4254_v34, %v8189_v8 }
 0x5db   : > { %v7749_v13 = vpop.permute.xlu1 %3356  ;;  %v3601_v9 = vsel %vm693_vm12, %v3599_v18, %v3564_v10  ;;  %v3378_v1 = vsel %vm677_vm7, %v7263_v36, %v3342_v54  ;;  %v4256_v36 = vcombine.high %v7640_v55, %v8189_v8  ;;  %v3802_v55 = vcombine.high %v7069_v63, %v8189_v8 }
 0x5dc   : > { %4293 = vrot.lane.b32.xlu0 %v4254_v34, %s5243_s24  ;;  %v3734_v34 = vcombine.high %v7016_v27, %v8189_v8 }
 0x5dd   : > { %4065 = vrot.lane.b32.xlu1 %v4026_v31, %s5243_s24 }
 0x5de   : > { %v3345_v12 = vpop.permute.xlu0 %3344 }
 0x5df   : > { %v7760_v14 = vsel %vm681_vm8, %v3378_v1, %v3345_v12  ;;  %v3582_v17 = vpop.permute.xlu1 %3581 }
 0x5e0   : > { %4038 = vrot.lane.b32.xlu0 %v4027_v53, %s5248_s29 }
 0x5e1   : > { %4068 = vrot.lane.b32.xlu1 %v3964_v48, %s5246_s27 }
 0x5e2   : > { %v3573_v10 = vpop.permute.xlu0 %3572 }
 0x5e3   : > { %v3608_v15 = vsel %vm681_vm8, %v3606_v49, %v3573_v10  ;;  %v3585_v32 = vpop.permute.xlu1 %3584 }
 0x5e4   : > { %4278 = vrot.lane.b32.xlu0 %v4256_v36, %s5244_s25 }
 0x5e5   : > { %4299 = vrot.lane.b32.xlu1 %v4258_v29, %s5244_s25 }
 0x5e6   : > { %v3327_v26 = vpop.permute.xlu0 %3326 }
 0x5e7   : > { %v3367_v38 = vsel %vm684_vm9, %v7673_v43, %v3327_v26  ;;  %v3567_v52 = vpop.permute.xlu1 %3566  ;;  %v4257_v43 = vcombine.high %v7709_v19, %v8189_v8 }
 0x5e8   : > { %v3369_v23 = vsel %vm687_vm10, %v3367_v38, %v7632_v56  ;;  %v7782_v42 = vsel %vm696_vm13, %v3601_v9, %v3567_v52  ;;  %4050 = vrot.lane.b32.xlu0 %v4028_v35, %s5244_s25  ;;  %v3800_v56 = vcombine.high %v7049_v11, %v8189_v8 }
 0x5e9   : > { %3843 = vrot.lane.b32.xlu1 %v3802_v55, %s5244_s25  ;;  %v3371_v46 = vsel %vm690_vm11, %v3369_v23, %v7706_v47 }
 0x5ea   : > { %v3354_v20 = vpop.permute.xlu0 %3353  ;;  %v3373_v28 = vsel %vm693_vm12, %v3371_v46, %v3336_v22  ;;  %v4030_v22 = vcombine.high %v4026_v31, %v8189_v8  ;;  %v3084_v31 = vcombine.high %v6932_v57, %v8189_v8 }
 0x5eb   : > { %v4728_v63 = vpop.permute.xlu1 %4727 }
 0x5ec   : > { %4287 = vrot.lane.b32.xlu0 %v4257_v43, %s5248_s29 }
 0x5ed   : > { %3822 = vrot.lane.b32.xlu1 %v3800_v56, %s5244_s25 }
 0x5ee   : > { %v3339_v0 = vpop.permute.xlu0 %3338 }
 0x5ef   : > { %v7797_v60 = vsel %vm696_vm13, %v3373_v28, %v3339_v0  ;;  %v7799_v47 = vpop.permute.xlu1 %4754 }
 0x5f0   : > { %4059 = vrot.lane.b32.xlu0 %v4029_v25, %s5248_s29 }
 0x5f2   : > { %v7802_v19 = vpop.permute.xlu0 %4952 }
 0x5f3   : > { %v4737_v54 = vpop.permute.xlu1 %4736 }
 0x5f4   : > { %4071 = vrot.lane.b32.xlu0 %v4030_v22, %s5244_s25 }
 0x5f6   : > { %v7806_v11 = vpop.permute.xlu0 %4955 }
 0x5f7   : > { %v3576_v62 = vpop.permute.xlu1 %3575 }
 0x5f8   : > { %v3610_v18 = vsel %vm684_vm9, %v3608_v15, %v3576_v62  ;;  %3819 = vrot.lane.b32.xlu0 %v3734_v34, %s5246_s27 }
 0x5f9   : > { %v3612_v9 = vsel %vm687_vm10, %v3610_v18, %v7694_v58  ;;  %v5076_v58 = vld [vmem:[%s8031_s4] sm:$0xf] }
 0x5fa   : > { %v4725_v1 = vpop.permute.xlu0 %4724  ;;  %v3614_v12 = vsel %vm690_vm11, %v3612_v9, %v3582_v17 }
 0x5fb   : > { %v4767_v53 = vsel %vm677_vm7, %v7321_v41, %v4725_v1  ;;  %v3360_v48 = vpop.permute.xlu1 %3359  ;;  %v3616_v27 = vsel %vm693_vm12, %v3614_v12, %v3585_v32  ;;  %v3146_v41 = vsel %vm677_vm7, %v6940_v16, %v7328_v21 }
 0x5fc   : > { %3106 = vrot.lane.b32.xlu0 %v3084_v31, %s5244_s25  ;;  %v4769_v49 = vsel %vm681_vm8, %v4767_v53, %v4728_v63  ;;  %v3148_v32 = vsel %vm681_vm8, %v3146_v41, %v7317_v33 }
 0x5fd   : > { %v3150_v29 = vsel %vm684_vm9, %v3148_v32, %v7419_v2 }
 0x5fe   : > { %v7825_v10 = vpop.permute.xlu0 %4982  ;;  %v3152_v52 = vsel %vm687_vm10, %v3150_v29, %v7278_v59 }
 0x5ff   : > { %v4974_v36 = vpop.permute.xlu1 %4973  ;;  %v3154_v21 = vsel %vm690_vm11, %v3152_v52, %v7335_v7 }
 0x600   : > { %5079 = vperm.xlu0 %5232, %v5076_v58   ;;  %v3156_v46 = vsel %vm693_vm12, %v3154_v21, %v7352_v6 }
 0x601   : > { %v3158_v0 = vsel %vm696_vm13, %v3156_v46, %v7436_v4 }
 0x602   : > { %v7827_v8 = vpop.permute.xlu0 %4964 }
 0x603   : > { %v4746_v57 = vpop.permute.xlu1 %4745 }
 0x604   : > { %v4782_v35 = vsel %vm677_vm7, %v7476_v5, %v4746_v57 }
 0x606   : > { %v7832_v17 = vpop.permute.xlu0 %4967 }
 0x607   : > { %v4977_v15 = vpop.permute.xlu1 %4976 }
 0x60a   : > { %v4740_v26 = vpop.permute.xlu0 %4739 }
 0x60b   : > { %v4749_v38 = vpop.permute.xlu1 %4748 }
 0x60c   : > { %v4784_v55 = vsel %vm681_vm8, %v4782_v35, %v4749_v38 }
 0x60e   : > { %v3348_v16 = vpop.permute.xlu0 %3347 }
 0x60f   : > { %v3382_v33 = vsel %vm684_vm9, %v7760_v14, %v3348_v16  ;;  %v7847_v23 = vpop.permute.xlu1 %4269 }
 0x610   : > { %v3384_v2 = vsel %vm687_vm10, %v3382_v33, %v7698_v51 }
 0x611   : > { %v3386_v5 = vsel %vm690_vm11, %v3384_v2, %v3354_v20 }
 0x612   : > { %v3388_v59 = vsel %vm693_vm12, %v3386_v5, %v7749_v13  ;;  %v3588_v43 = vpop.permute.xlu0 %3587 }
 0x613   : > { %v3390_v28 = vsel %vm696_vm13, %v3388_v59, %v3360_v48  ;;  %v3618_v7 = vsel %vm696_vm13, %v3616_v27, %v3588_v43  ;;  %v4986_v63 = vpop.permute.xlu1 %4985 }
 0x614   : > { %v5030_v14 = vrot.slane %v3618_v7, 4  ;;  %v5026_v56 = vrot.slane %v3390_v28, 6 }
 0x616   : > { %v4959_v51 = vpop.permute.xlu0 %4958  ;;  %v5050_v20 = vsel %vm2604_vm14, %v3158_v0, %v5026_v56  ;;  %v8213_v56 = vld [vmem:[#allocation12_spill] sm:$0xff] }
 0x617   : > { %v4758_v25 = vpop.permute.xlu1 %4757  ;;  %v7862_v6 = vsel %vm2609_vm15, %v5050_v20, %v5030_v14  ;;  %v8212_v14 = vld [vmem:[#allocation10_spill] sm:$0xff] }
 0x618   : > { %v4539_v0 = vsel %vm677_vm7, %v8213_v56, %v8212_v14  ;;  %v8224_v14 = vld [vmem:[#allocation28_spill] sm:$0xff] }
 0x61a   : > { %v4731_v22 = vpop.permute.xlu0 %4730 }
 0x61b   : > { %v4771_v13 = vsel %vm684_vm9, %v4769_v49, %v4731_v22  ;;  %v4989_v34 = vpop.permute.xlu1 %4988 }
 0x61c   : > { %v4773_v62 = vsel %vm687_vm10, %v4771_v13, %v7736_v50  ;;  %v8214_v13 = vld [vmem:[#allocation22_spill] sm:$0xff] }
 0x61d   : > { %v4775_v18 = vsel %vm690_vm11, %v4773_v62, %v4737_v54  ;;  %v4995_v54 = vsel %vm677_vm7, %v7368_v40, %v7802_v19 }
 0x61e   : > { %v7868_v9 = vpop.permute.xlu0 %4041  ;;  %v4777_v4 = vsel %vm693_vm12, %v4775_v18, %v4740_v26  ;;  %v4997_v32 = vsel %vm681_vm8, %v4995_v54, %v7806_v11  ;;  %v8215_v18 = vld [vmem:[#allocation14_spill] sm:$0xff] }
 0x61f   : > { %v4971_v1 = vpop.permute.xlu1 %4970  ;;  %v4999_v35 = vsel %vm684_vm9, %v4997_v32, %v4959_v51  ;;  %v8217_v32 = vld [vmem:[#allocation27_spill] sm:$0xff] }
 0x620   : > { %v5001_v52 = vsel %vm687_vm10, %v4999_v35, %v7722_v30 }
 0x621   : > { %v5003_v21 = vsel %vm690_vm11, %v5001_v52, %v7827_v8  ;;  %v8219_v52 = vld [vmem:[#allocation21_spill] sm:$0xff] }
 0x622   : > { %v4761_v31 = vpop.permute.xlu0 %4760 }
 0x623   : > { %v4743_v12 = vpop.permute.xlu1 %4742 }
 0x624   : > { %v7872_v53 = vsel %vm696_vm13, %v4777_v4, %v4743_v12 }
 0x626   : > { %v4033_v48 = vpop.permute.xlu0 %4032 }
 0x627   : > { %v4261_v27 = vpop.permute.xlu1 %4260 }
 0x628   : > { %v4303_v20 = vsel %vm677_vm7, %v7619_v3, %v4261_v27  ;;  %v4075_v3 = vsel %vm677_vm7, %v7668_v44, %v4033_v48 }
 0x62a   : > { %v4752_v58 = vpop.permute.xlu0 %4751 }
 0x62b   : > { %v4786_v49 = vsel %vm684_vm9, %v4784_v55, %v4752_v58  ;;  %v4264_v57 = vpop.permute.xlu1 %4263  ;;  %v8216_v58 = vld [vmem:[#allocation13_spill] sm:$0xff] }
 0x62c   : > { %v4788_v50 = vsel %vm687_vm10, %v4786_v49, %v7799_v47  ;;  %v5010_v47 = vsel %vm677_vm7, %v7453_v37, %v4974_v36  ;;  %v5005_v37 = vsel %vm693_vm12, %v5003_v21, %v7832_v17  ;;  %v4305_v22 = vsel %vm681_vm8, %v4303_v20, %v4264_v57 }
 0x62d   : > { %v4790_v41 = vsel %vm690_vm11, %v4788_v50, %v4758_v25  ;;  %v5012_v19 = vsel %vm681_vm8, %v5010_v47, %v4977_v15  ;;  %v5007_v30 = vsel %vm696_vm13, %v5005_v37, %v4971_v1  ;;  %v8218_v47 = vld [vmem:[#allocation29_spill] sm:$0xff]  ;;  %v8222_v37 = vld [vmem:[#allocation58_spill] sm:$0xff]  ;;  %v5045_v20 = vrot.slane %v7872_v53, 2 }
 0x62e   : > { %v4273_v29 = vpop.permute.xlu0 %4272  ;;  %v7884_v26 = vsel %vm693_vm12, %v4790_v41, %v4761_v31 }
 0x62f   : > { %v7887_v38 = vpop.permute.xlu1 %4290 }
 0x632   : > { %v4276_v40 = vpop.permute.xlu0 %4275 }
 0x633   : > { %v4980_v55 = vpop.permute.xlu1 %4979 }
 0x634   : > { %v5014_v11 = vsel %vm684_vm9, %v5012_v19, %v4980_v55  ;;  %v4554_v19 = vsel %vm677_vm7, %v8219_v52, %v8218_v47  ;;  %v8220_v55 = vld [vmem:[#allocation31_spill] sm:$0xff] }
 0x635   : > { %v5016_v16 = vsel %vm687_vm10, %v5014_v11, %v7825_v10  ;;  %v5085_v10 = vsel %vm2604_vm14, %v5007_v30, 0  ;;  %v4556_v11 = vsel %vm681_vm8, %v4554_v19, %v8220_v55  ;;  %v8223_v30 = vld [vmem:[#allocation35_spill] sm:$0xff] }
 0x636   : > { %v4045_v33 = vpop.permute.xlu0 %4044  ;;  %v5018_v5 = vsel %vm690_vm11, %v5016_v16, %v4986_v63  ;;  %v8221_v16 = vld [vmem:[#allocation7_spill] sm:$0xff] }
 0x637   : > { %v4036_v2 = vpop.permute.xlu1 %4035  ;;  %v5020_v15 = vsel %vm693_vm12, %v5018_v5, %v4989_v34  ;;  %v4541_v34 = vsel %vm681_vm8, %v4539_v0, %v8214_v13  ;;  %v8231_v19 = vld [vmem:[#allocation11_spill] sm:$0xff] }
 0x638   : > { %v4543_v4 = vsel %vm684_vm9, %v4541_v34, %v8215_v18  ;;  %v4077_v27 = vsel %vm681_vm8, %v4075_v3, %v4036_v2  ;;  %v8227_v3 = vld [vmem:[#allocation8_spill] sm:$0xff] }
 0x639   : > { %v4545_v49 = vsel %vm687_vm10, %v4543_v4, %v8216_v58 }
 0x63a   : > { %v4992_v36 = vpop.permute.xlu0 %4991  ;;  %v4547_v35 = vsel %vm690_vm11, %v4545_v49, %v8217_v32 }
 0x63b   : > { %v7904_v46 = vpop.permute.xlu1 %4062  ;;  %v5022_v59 = vsel %vm696_vm13, %v5020_v15, %v4992_v36  ;;  %v4549_v21 = vsel %vm693_vm12, %v4547_v35, %v8221_v16  ;;  %v4558_v36 = vsel %vm684_vm9, %v4556_v11, %v8223_v30  ;;  %v8229_v35 = vld [vmem:[#allocation19_spill] sm:$0xff] }
 0x63c   : > { %5205 = vmatprep.subr.msk.bf16.mxu1 %vm2604_vm14, %v5022_v59  ;;  %v4560_v56 = vsel %vm687_vm10, %v4558_v36, %v8224_v14  ;;  %v5025_v36 = vrot.slane %v7797_v60, 6  ;;  %v5075_v60 = vld [vmem:[%s8030_s3] sm:$0x3] }
 0x63d   : > { %5100 = vmatpush1.bf16.msra.mxu1 %v5085_v10 }
 0x63e   : > { %v4282_v8 = vpop.permute.xlu0 %4281 }
 0x63f   : > { %v4048_v43 = vpop.permute.xlu1 %4047  ;;  %v4318_v13 = vsel %vm677_vm7, %v7712_v45, %v4282_v8  ;;  %v8226_v8 = vld [vmem:[#allocation20_spill] sm:$0xff] }
 0x642   : > { %v4285_v28 = vpop.permute.xlu0 %4284 }
 0x643   : > { %v7909_v7 = vpop.permute.xlu1 %4763  ;;  %v4320_v4 = vsel %vm681_vm8, %v4318_v13, %v4285_v28  ;;  %v5234_v13 = vld [vmem:[%s5302_s23] sm:$0xff] }
 0x646   : > { %v4054_v17 = vpop.permute.xlu0 %4053 }
 0x647   : > { %v4057_v63 = vpop.permute.xlu1 %4056  ;;  %v4090_v53 = vsel %vm677_vm7, %v7727_v39, %v4054_v17 }
 0x64a   : > { %v4267_v51 = vpop.permute.xlu0 %4266 }
 0x64b   : > { %v4297_v25 = vpop.permute.xlu1 %4296  ;;  %v4307_v62 = vsel %vm684_vm9, %v4305_v22, %v4267_v51 }
 0x64c   : > { %v4309_v12 = vsel %vm687_vm10, %v4307_v62, %v7847_v23  ;;  %v8225_v62 = vld [vmem:[#allocation17_spill] sm:$0xff] }
 0x64d   : > { %v4311_v41 = vsel %vm690_vm11, %v4309_v12, %v4273_v29  ;;  %v4562_v18 = vsel %vm690_vm11, %v4560_v56, %v8225_v62 }
 0x64e   : > { %v4294_v1 = vpop.permute.xlu0 %4293  ;;  %v4313_v44 = vsel %vm693_vm12, %v4311_v41, %v4276_v40  ;;  %v4092_v41 = vsel %vm681_vm8, %v4090_v53, %v4057_v63  ;;  %v4794_v63 = vsel %vm696_vm13, %v7884_v26, %v7909_v7 }
 0x64f   : > { %v4066_v31 = vpop.permute.xlu1 %4065 }
 0x652   : > { %v4039_v57 = vpop.permute.xlu0 %4038 }
 0x653   : > { %v4079_v50 = vsel %vm684_vm9, %v4077_v27, %v4039_v57  ;;  %v4069_v54 = vpop.permute.xlu1 %4068  ;;  %v3131_v27 = vsel %vm677_vm7, %v8227_v3, %v8226_v8  ;;  %v8228_v57 = vld [vmem:[#allocation24_spill] sm:$0xff] }
 0x654   : > { %v4081_v23 = vsel %vm687_vm10, %v4079_v50, %v7868_v9  ;;  %v4551_v9 = vsel %vm696_vm13, %v4549_v21, %v8222_v37  ;;  %v4564_v28 = vsel %vm693_vm12, %v4562_v18, %v8228_v57  ;;  %v8232_v21 = vld [vmem:[#allocation18_spill] sm:$0xff] }
 0x655   : > { %v4083_v5 = vsel %vm690_vm11, %v4081_v23, %v4045_v33  ;;  %v5041_v10 = vrot.slane %v4551_v9, 4  ;;  %v8230_v23 = vld [vmem:[#allocation57_spill] sm:$0xff]  ;;  %v8235_v18 = vld [vmem:[#allocation2_spill] sm:$0xff] }
 0x656   : > { %v4279_v48 = vpop.permute.xlu0 %4278  ;;  %v4085_v40 = vsel %vm693_vm12, %v4083_v5, %v4048_v43  ;;  %v4566_v47 = vsel %vm696_vm13, %v4564_v28, %v8230_v23 }
 0x657   : > { %v4315_v29 = vsel %vm696_vm13, %v4313_v44, %v4279_v48  ;;  %v4300_v2 = vpop.permute.xlu1 %4299  ;;  %v5042_v11 = vrot.slane %v4566_v47, 4 }
 0x658   : > { %v5037_v15 = vrot.slane %v4315_v29, 6 }
 0x65a   : > { %v4051_v59 = vpop.permute.xlu0 %4050 }
 0x65b   : > { %v4087_v0 = vsel %vm696_vm13, %v4085_v40, %v4051_v59  ;;  %v3844_v51 = vpop.permute.xlu1 %3843 }
 0x65c   : > { %v5062_v33 = vsel %vm2604_vm14, %v4087_v0, %v5037_v15  ;;  %v3874_v22 = vsel %vm696_vm13, %v7628_v24, %v3844_v51  ;;  %v8234_v15 = vld [vmem:[#allocation23_spill] sm:$0xff] }
 0x65d   : > { %v5034_v34 = vrot.slane %v3874_v22, 2  ;;  %v5066_v43 = vsel %vm2609_vm15, %v5062_v33, %v5041_v10  ;;  %v5029_v10 = vrot.slane %v7782_v42, 4 }
 0x65e   : > { %v4288_v12 = vpop.permute.xlu0 %4287  ;;  %v5070_v58 = vsel %vm2614_vm0, %v5066_v43, %v5045_v20 }
 0x65f   : > { %v4322_v49 = vsel %vm684_vm9, %v4320_v4, %v4288_v12  ;;  %v5059_v24 = vsel %vm2614_vm0, %v7862_v6, %v5034_v34  ;;  %v3823_v9 = vpop.permute.xlu1 %3822 }
 0x660   : > { %v4324_v45 = vsel %vm687_vm10, %v4322_v49, %v7887_v38  ;;  %v3133_v38 = vsel %vm681_vm8, %v3131_v27, %v8229_v35 }
 0x661   : > { %v4326_v50 = vsel %vm690_vm11, %v4324_v45, %v4294_v1  ;;  %v3135_v1 = vsel %vm684_vm9, %v3133_v38, %v8231_v19 }
 0x662   : > { %v4328_v39 = vsel %vm693_vm12, %v4326_v50, %v4297_v25  ;;  %v4060_v17 = vpop.permute.xlu0 %4059  ;;  %v3137_v29 = vsel %vm687_vm10, %v3135_v1, %v8232_v21 }
 0x663   : > { %v4094_v32 = vsel %vm684_vm9, %v4092_v41, %v4060_v17  ;;  %v4330_v6 = vsel %vm696_vm13, %v4328_v39, %v4300_v2 }
 0x664   : > { %v4096_v52 = vsel %vm687_vm10, %v4094_v32, %v7904_v46  ;;  %v5038_v48 = vrot.slane %v4330_v6, 6  ;;  %v5046_v46 = vrot.slane %v4794_v63, 2 }
 0x665   : > { %v4098_v25 = vsel %vm690_vm11, %v4096_v52, %v4066_v31  ;;  %v8233_v31 = vld [vmem:[#allocation25_spill] sm:$0xff] }
 0x666   : > { %v4100_v44 = vsel %vm693_vm12, %v4098_v25, %v4069_v54  ;;  %v4072_v55 = vpop.permute.xlu0 %4071  ;;  %v3139_v54 = vsel %vm690_vm11, %v3137_v29, %v8233_v31 }
 0x667   : > { %v4102_v16 = vsel %vm696_vm13, %v4100_v44, %v4072_v55  ;;  %v3141_v40 = vsel %vm693_vm12, %v3139_v54, %v8234_v15 }
 0x668   : > { %v5064_v2 = vsel %vm2604_vm14, %v4102_v16, %v5038_v48 }
 0x669   : > { %v5068_v5 = vsel %vm2609_vm15, %v5064_v2, %v5042_v11 }
 0x66a   : > { %v3820_v37 = vpop.permute.xlu0 %3819  ;;  %v5073_v26 = vsel %vm2614_vm0, %v5068_v5, %v5046_v46 }
 0x66b   : > { %v3857_v7 = vsel %vm693_vm12, %v7567_v61, %v3820_v37  ;;  %5101 = vmatprep.subr.bf16.mxu1 %v5073_v26 }
 0x66c   : > { %5102 = vmatpush1.bf16.msra.mxu1 %v5070_v58  ;;  %v3859_v30 = vsel %vm696_vm13, %v3857_v7, %v3823_v9 }
 0x66d   : > { %5103 = vmatprep.subr.bf16.mxu1 %v5059_v24  ;;  %v5033_v14 = vrot.slane %v3859_v30, 2 }
 0x66e   : > { %v3107_v59 = vpop.permute.xlu0 %3106 }
 0x66f   : > { %v3143_v61 = vsel %vm696_vm13, %v3141_v40, %v3107_v59 }
 0x670   : > { %v5048_v56 = vsel %vm2604_vm14, %v3143_v61, %v5025_v36 }
 0x671   : > { %v5052_v0 = vsel %vm2609_vm15, %v5048_v56, %v5029_v10 }
 0x672   : > { %v5056_v51 = vsel %vm2614_vm0, %v5052_v0, %v5033_v14 }
 0x673   : > { %5104 = vmatpush1.bf16.msra.mxu1 %v5056_v51 }
 0x676   : > { %5206 = vmatmul.mubr.msk.bf16.vlgmr.msra.gmra.mxu1 %vm2642_vm1, %v5075_v60 }
 0x67b   : > { %v5080_v20 = vpop.permute.xlu0 %5079 }
 0x736   : > { %v5123_v33 = vpop.f32.mrf.mxu1 }
 0x737   : > { %v5124_v42 = vadd.f32 %v5123_v33, %v5080_v20 }
 0x738   : > { %v5125_v22 = vpop.f32.mrf.mxu1 }
 0x739   : > { %v5130_v34 = vadd.f32 %v5234_v13, %v5124_v42  ;;  %v5126_v43 = vadd.f32 %v5125_v22, %v5080_v20 }
 0x73a   : > { %v5127_v62 = vpop.f32.mrf.mxu1 }
 0x73b   : > { %v5131_v4 = vadd.f32 %v5126_v43, %v8235_v18  ;;  %v5132_v58 = vmax.f32 %v5130_v34, 0.0 }
 0x73c   : > { %v5128_v12 = vpop.f32.mrf.mxu1 }
 0x73d   : > { %v5133_v53 = vmax.f32 %v5131_v4, 0.0 }
 0x73f   : > { %v5136_v49 = vcombine.low %v5132_v58, %v5133_v53 }
 0x741   : > { %5138 = vst [vmem:[%s224_s22] sm:$0xff] %v5136_v49 }
 0x742 PF: > { %s15_s18 = sadd.s32 1, %s5241_s18  }
 0x743   : > { %p12_p4 = scmp.ge.s32.totalorder %s15_s18, 4  }
 0x745   :  { %14 = sbr.rel (!%p12_p4) target bundleno = 1 (0x1), region = 70 }

</bundles_post_ra>
